<compile_context>
chip_gen: v7x
topology: tpu7x:2x2x1
jax: 0.10.0
libtpu: 0.0.40
codegen_flags: <defaults>
</compile_context>

<pallas_src>
import functools

import jax
import jax.numpy as jnp
import numpy as np
from jax.experimental import pallas as pl
from jax.experimental.pallas import tpu as pltpu


def _round_up(x, m):
    return ((x + m - 1) // m) * m


# ----------------------------- Fused Pallas kernel -------------------------

def _fused_siren_kernel(*refs, n_layers, apply_sine):
    # refs = (x_ref, w0, b0, w1, b1, ..., w_{L-1}, b_{L-1}, out_ref)
    #   x_ref : (Fin, TN)        feature-major, points on the 128-lane axis
    #   w_l   : (Fout_l, Fin_l)  (omega already folded in for sine layers)
    #   b_l   : (Fout_l, 1)
    #   out   : (Fout_last, TN)
    x_ref = refs[0]
    out_ref = refs[1 + 2 * n_layers]

    x = x_ref[...]

    # ---- Layer 0: tiny contraction (Fin=2) -> VPU broadcast MACs, no MXU ----
    w0 = refs[1][...]
    b0 = refs[2][...]
    fin0 = w0.shape[1]
    acc = w0[:, 0:1] * x[0:1, :]
    for k in range(1, fin0):
        acc = acc + w0[:, k:k + 1] * x[k:k + 1, :]
    acc = acc + b0
    h = jnp.sin(acc) if apply_sine[0] else acc

    # ---- Remaining layers: MXU matmuls, weights fully resident in VMEM -----
    # (unrolled at trace time: n_layers is small and static)
    for li in range(1, n_layers):
        w = refs[1 + 2 * li][...]
        b = refs[2 + 2 * li][...]
        y = jnp.dot(w, h, preferred_element_type=jnp.float32) + b
        h = jnp.sin(y) if apply_sine[li] else y

    out_ref[...] = h.astype(out_ref.dtype)


def siren_forward(coords, params, tile_n=1024):
    """Fused SIREN forward.  coords: (N, in_features) f32 -> (N, out_features)."""
    N, fin = coords.shape
    n_layers = len(params)
    apply_sine = tuple(bool(p[3]) for p in params)

    # Fold omega into the parameters: sin(omega*(Wx+b)) == sin((omega*W)x + omega*b)
    ws, bs = [], []
    for (W, b, omega, sine) in params:
        scale = float(omega) if sine else 1.0
        ws.append((scale * W).astype(jnp.float32))                 # (Fout, Fin)
        bs.append((scale * b).reshape(-1, 1).astype(jnp.float32))  # (Fout, 1)
    fout = ws[-1].shape[0]

    # Lane-dense point tiling: tile is a multiple of 128; pad N up to the tile.
    tile = _round_up(min(_round_up(tile_n, 128), _round_up(N, 128)), 128)
    n_pad = _round_up(N, tile)
    grid = (n_pad // tile,)

    # Feature-major layout: points on the lane axis.
    x_t = coords.T.astype(jnp.float32)                 # (Fin, N)
    if n_pad != N:
        x_t = jnp.pad(x_t, ((0, 0), (0, n_pad - N)))   # (Fin, Npad)

    in_specs = [pl.BlockSpec((fin, tile), lambda i: (0, i))]
    operands = [x_t]
    for W, b in zip(ws, bs):
        in_specs.append(pl.BlockSpec(W.shape, lambda i: (0, 0)))   # resident W
        in_specs.append(pl.BlockSpec(b.shape, lambda i: (0, 0)))   # resident b
        operands.extend([W, b])

    kernel = functools.partial(_fused_siren_kernel,
                               n_layers=n_layers, apply_sine=apply_sine)

    out_t = pl.pallas_call(
        kernel,
        out_shape=jax.ShapeDtypeStruct((fout, n_pad), jnp.float32),
        grid_spec=pltpu.PrefetchScalarGridSpec(
            num_scalar_prefetch=0,
            grid=grid,
            in_specs=in_specs,
            out_specs=pl.BlockSpec((fout, tile), lambda i: (0, i)),
        ),
        compiler_params=pltpu.CompilerParams(
            dimension_semantics=("parallel",)),
    )(*operands)

    return out_t[:, :N].T                              # (N, Fout)


# ------------------------ Parameter init (deterministic) -------------------

def init_siren_params(key, in_features, hidden_features, hidden_layers,
                      out_features, outermost_linear=False,
                      first_omega_0=30.0, hidden_omega_0=30.0,
                      init_c=6.0, first_layer_init_c=1.0):
    """Mimics the PyTorch init ranges (uniform), deterministically via PRNGKey.

    Returns a list of (W (Fout,Fin), b (Fout,), omega, apply_sine) — the same
    (out, in) weight layout as torch.nn.Linear.
    """
    params = []
    dims = ([in_features] + [hidden_features] * (hidden_layers + 1)
            + [out_features])
    n_layers = hidden_layers + 2
    keys = jax.random.split(key, 2 * n_layers)

    for li in range(n_layers):
        f_in, f_out = dims[li], dims[li + 1]
        kw, kb = keys[2 * li], keys[2 * li + 1]
        is_first = (li == 0)
        is_last = (li == n_layers - 1)

        if is_first:
            wlim = first_layer_init_c / f_in
            omega = first_omega_0
        else:
            wlim = np.sqrt(init_c / f_in) / hidden_omega_0
            omega = hidden_omega_0

        W = jax.random.uniform(kw, (f_out, f_in), jnp.float32, -wlim, wlim)
        # PyTorch nn.Linear default bias init: U(-1/sqrt(fin), 1/sqrt(fin))
        blim = 1.0 / np.sqrt(f_in)
        b = jax.random.uniform(kb, (f_out,), jnp.float32, -blim, blim)

        apply_sine = not (is_last and outermost_linear)
        params.append((W, b, float(omega), apply_sine))

    return params


# Pure-JAX reference (original, un-folded formulation) for correctness.
def siren_forward_ref(coords, params):
    x = coords
    for (W, b, omega, sine) in params:
        y = x @ W.T + b
        x = jnp.sin(omega * y) if sine else y
    return x


# --------------------------------- Main -------------------------------------

if __name__ == "__main__":
    key = jax.random.PRNGKey(0)
    kp, kx = jax.random.split(key)

    in_features = 2
    hidden_features = 32
    hidden_layers = 2
    out_features = 1

    # N deliberately NOT a multiple of the tile -> exercises the padding path;
    # tile_n=256 -> 2 grid steps at this small demo size.
    N = 500
    coords = jax.random.uniform(kx, (N, in_features), jnp.float32, -1.0, 1.0)

    for outermost_linear in (False, True):
        params = init_siren_params(
            kp, in_features, hidden_features, hidden_layers, out_features,
            outermost_linear=outermost_linear,
            first_omega_0=30.0, hidden_omega_0=30.0,
            init_c=6.0, first_layer_init_c=1.0)

        out = jax.block_until_ready(siren_forward(coords, params, tile_n=256))
        ref = jax.block_until_ready(siren_forward_ref(coords, params))

        np.testing.assert_allclose(np.asarray(out), np.asarray(ref),
                                   rtol=5e-5, atol=5e-5)
        assert out.shape == (N, out_features)

    print("KERNEL_OK")
</pallas_src>

<mosaic_0001>
module attributes {stable_mosaic.version = 11 : i64} {
  func.func @_fused_siren_kernel(%arg0: i32, %arg1: memref<2x256xf32, #tpu.memory_space<vmem>>, %arg2: memref<32x2xf32, #tpu.memory_space<vmem>>, %arg3: memref<32x1xf32, #tpu.memory_space<vmem>>, %arg4: memref<32x32xf32, #tpu.memory_space<vmem>>, %arg5: memref<32x1xf32, #tpu.memory_space<vmem>>, %arg6: memref<32x32xf32, #tpu.memory_space<vmem>>, %arg7: memref<32x1xf32, #tpu.memory_space<vmem>>, %arg8: memref<1x32xf32, #tpu.memory_space<vmem>>, %arg9: memref<1x1xf32, #tpu.memory_space<vmem>>, %arg10: memref<1x256xf32, #tpu.memory_space<vmem>>) attributes {dimension_semantics = [#tpu.dimension_semantics<parallel>], iteration_bounds = array<i64: 2>, scalar_prefetch = 0 : i64, scratch_operands = 0 : i64, tpu.core_type = #tpu.core_type<tc>, window_params = [{transform_indices = @transform_0, window_bounds = array<i64: 2, 256>}, {pipeline_mode = #tpu.pipeline_mode<synchronous>, transform_indices = @transform_1, window_bounds = array<i64: 32, 2>}, {pipeline_mode = #tpu.pipeline_mode<synchronous>, transform_indices = @transform_2, window_bounds = array<i64: 32, 1>}, {pipeline_mode = #tpu.pipeline_mode<synchronous>, transform_indices = @transform_3, window_bounds = array<i64: 32, 32>}, {pipeline_mode = #tpu.pipeline_mode<synchronous>, transform_indices = @transform_4, window_bounds = array<i64: 32, 1>}, {pipeline_mode = #tpu.pipeline_mode<synchronous>, transform_indices = @transform_5, window_bounds = array<i64: 32, 32>}, {pipeline_mode = #tpu.pipeline_mode<synchronous>, transform_indices = @transform_6, window_bounds = array<i64: 32, 1>}, {pipeline_mode = #tpu.pipeline_mode<synchronous>, transform_indices = @transform_7, window_bounds = array<i64: 1, 32>}, {pipeline_mode = #tpu.pipeline_mode<synchronous>, transform_indices = @transform_8, window_bounds = array<i64: 1, 1>}, {transform_indices = @transform_9, window_bounds = array<i64: 1, 256>}]} {
    %c0 = arith.constant 0 : index
    %c0_0 = arith.constant 0 : index
    %0 = vector.load %arg1[%c0, %c0_0] : memref<2x256xf32, #tpu.memory_space<vmem>>, vector<2x256xf32>
    %c0_1 = arith.constant 0 : index
    %c0_2 = arith.constant 0 : index
    %1 = vector.load %arg2[%c0_1, %c0_2] : memref<32x2xf32, #tpu.memory_space<vmem>>, vector<32x2xf32>
    %c0_3 = arith.constant 0 : index
    %c0_4 = arith.constant 0 : index
    %2 = vector.load %arg3[%c0_3, %c0_4] : memref<32x1xf32, #tpu.memory_space<vmem>>, vector<32x1xf32>
    %3 = vector.extract_strided_slice %1 {offsets = [0, 0], sizes = [32, 1], strides = [1, 1]} : vector<32x2xf32> to vector<32x1xf32>
    %4 = vector.extract_strided_slice %0 {offsets = [0, 0], sizes = [1, 256], strides = [1, 1]} : vector<2x256xf32> to vector<1x256xf32>
    %5 = vector.broadcast %3 : vector<32x1xf32> to vector<32x256xf32>
    %6 = vector.broadcast %4 : vector<1x256xf32> to vector<32x256xf32>
    %7 = arith.mulf %5, %6 : vector<32x256xf32>
    %8 = vector.extract_strided_slice %1 {offsets = [0, 1], sizes = [32, 1], strides = [1, 1]} : vector<32x2xf32> to vector<32x1xf32>
    %9 = vector.extract_strided_slice %0 {offsets = [1, 0], sizes = [1, 256], strides = [1, 1]} : vector<2x256xf32> to vector<1x256xf32>
    %10 = vector.broadcast %8 : vector<32x1xf32> to vector<32x256xf32>
    %11 = vector.broadcast %9 : vector<1x256xf32> to vector<32x256xf32>
    %12 = arith.mulf %10, %11 : vector<32x256xf32>
    %13 = arith.addf %7, %12 : vector<32x256xf32>
    %14 = vector.broadcast %2 : vector<32x1xf32> to vector<32x256xf32>
    %15 = arith.addf %13, %14 : vector<32x256xf32>
    %16 = math.sin %15 : vector<32x256xf32>
    %c0_5 = arith.constant 0 : index
    %c0_6 = arith.constant 0 : index
    %17 = vector.load %arg4[%c0_5, %c0_6] : memref<32x32xf32, #tpu.memory_space<vmem>>, vector<32x32xf32>
    %c0_7 = arith.constant 0 : index
    %c0_8 = arith.constant 0 : index
    %18 = vector.load %arg5[%c0_7, %c0_8] : memref<32x1xf32, #tpu.memory_space<vmem>>, vector<32x1xf32>
    %cst = arith.constant dense<0.000000e+00> : vector<32x256xf32>
    %19 = tpu.matmul %17, %16, %cst {dimension_numbers = #tpu.dot_dimension_numbers<[1], [0], [0], [1], [0, 0, 1, 1], [], []>} : vector<32x32xf32>, vector<32x256xf32>, vector<32x256xf32> -> vector<32x256xf32>
    %20 = vector.broadcast %18 : vector<32x1xf32> to vector<32x256xf32>
    %21 = arith.addf %19, %20 : vector<32x256xf32>
    %22 = math.sin %21 : vector<32x256xf32>
    %c0_9 = arith.constant 0 : index
    %c0_10 = arith.constant 0 : index
    %23 = vector.load %arg6[%c0_9, %c0_10] : memref<32x32xf32, #tpu.memory_space<vmem>>, vector<32x32xf32>
    %c0_11 = arith.constant 0 : index
    %c0_12 = arith.constant 0 : index
    %24 = vector.load %arg7[%c0_11, %c0_12] : memref<32x1xf32, #tpu.memory_space<vmem>>, vector<32x1xf32>
    %cst_13 = arith.constant dense<0.000000e+00> : vector<32x256xf32>
    %25 = tpu.matmul %23, %22, %cst_13 {dimension_numbers = #tpu.dot_dimension_numbers<[1], [0], [0], [1], [0, 0, 1, 1], [], []>} : vector<32x32xf32>, vector<32x256xf32>, vector<32x256xf32> -> vector<32x256xf32>
    %26 = vector.broadcast %24 : vector<32x1xf32> to vector<32x256xf32>
    %27 = arith.addf %25, %26 : vector<32x256xf32>
    %28 = math.sin %27 : vector<32x256xf32>
    %c0_14 = arith.constant 0 : index
    %c0_15 = arith.constant 0 : index
    %29 = vector.load %arg8[%c0_14, %c0_15] : memref<1x32xf32, #tpu.memory_space<vmem>>, vector<1x32xf32>
    %c0_16 = arith.constant 0 : index
    %c0_17 = arith.constant 0 : index
    %30 = vector.load %arg9[%c0_16, %c0_17] : memref<1x1xf32, #tpu.memory_space<vmem>>, vector<1x1xf32>
    %cst_18 = arith.constant dense<0.000000e+00> : vector<1x256xf32>
    %31 = tpu.matmul %29, %28, %cst_18 {dimension_numbers = #tpu.dot_dimension_numbers<[1], [0], [0], [1], [0, 0, 1, 1], [], []>} : vector<1x32xf32>, vector<32x256xf32>, vector<1x256xf32> -> vector<1x256xf32>
    %32 = vector.broadcast %30 : vector<1x1xf32> to vector<1x256xf32>
    %33 = arith.addf %31, %32 : vector<1x256xf32>
    %34 = math.sin %33 : vector<1x256xf32>
    %c0_19 = arith.constant 0 : index
    %c0_20 = arith.constant 0 : index
    %35 = vector.load %arg10[%c0_19, %c0_20] : memref<1x256xf32, #tpu.memory_space<vmem>>, vector<1x256xf32>
    tpu.vector_store %arg10[%c0_19, %c0_20], %34 {strides = array<i32>} : memref<1x256xf32, #tpu.memory_space<vmem>>, vector<1x256xf32>,
    return
  }
  func.func @transform_0(%arg0: i32) -> (i32, i32) {
    %c0_i32 = arith.constant 0 : i32
    %c0_i32_0 = arith.constant 0 : i32
    return %c0_i32, %arg0 : i32, i32
  }
  func.func @transform_1(%arg0: i32) -> (i32, i32) {
    %c0_i32 = arith.constant 0 : i32
    %c0_i32_0 = arith.constant 0 : i32
    %c0_i32_1 = arith.constant 0 : i32
    return %c0_i32, %c0_i32_0 : i32, i32
  }
  func.func @transform_2(%arg0: i32) -> (i32, i32) {
    %c0_i32 = arith.constant 0 : i32
    %c0_i32_0 = arith.constant 0 : i32
    %c0_i32_1 = arith.constant 0 : i32
    return %c0_i32, %c0_i32_0 : i32, i32
  }
  func.func @transform_3(%arg0: i32) -> (i32, i32) {
    %c0_i32 = arith.constant 0 : i32
    %c0_i32_0 = arith.constant 0 : i32
    %c0_i32_1 = arith.constant 0 : i32
    return %c0_i32, %c0_i32_0 : i32, i32
  }
  func.func @transform_4(%arg0: i32) -> (i32, i32) {
    %c0_i32 = arith.constant 0 : i32
    %c0_i32_0 = arith.constant 0 : i32
    %c0_i32_1 = arith.constant 0 : i32
    return %c0_i32, %c0_i32_0 : i32, i32
  }
  func.func @transform_5(%arg0: i32) -> (i32, i32) {
    %c0_i32 = arith.constant 0 : i32
    %c0_i32_0 = arith.constant 0 : i32
    %c0_i32_1 = arith.constant 0 : i32
    return %c0_i32, %c0_i32_0 : i32, i32
  }
  func.func @transform_6(%arg0: i32) -> (i32, i32) {
    %c0_i32 = arith.constant 0 : i32
    %c0_i32_0 = arith.constant 0 : i32
    %c0_i32_1 = arith.constant 0 : i32
    return %c0_i32, %c0_i32_0 : i32, i32
  }
  func.func @transform_7(%arg0: i32) -> (i32, i32) {
    %c0_i32 = arith.constant 0 : i32
    %c0_i32_0 = arith.constant 0 : i32
    %c0_i32_1 = arith.constant 0 : i32
    return %c0_i32, %c0_i32_0 : i32, i32
  }
  func.func @transform_8(%arg0: i32) -> (i32, i32) {
    %c0_i32 = arith.constant 0 : i32
    %c0_i32_0 = arith.constant 0 : i32
    %c0_i32_1 = arith.constant 0 : i32
    return %c0_i32, %c0_i32_0 : i32, i32
  }
  func.func @transform_9(%arg0: i32) -> (i32, i32) {
    %c0_i32 = arith.constant 0 : i32
    %c0_i32_0 = arith.constant 0 : i32
    return %c0_i32, %arg0 : i32, i32
  }
}

</mosaic_0001>

<bundles_post_ra>
// kernel: tpu_custom_call.1
= control target key start
LH: loop header
LB: loop body
LE: loop exit
PB: predicated region body
PF: predicated region fallthrough
CT: control target
= control target key end

     0   :  { %s6790_s0 = inlined_call_operand.vmem [shape: f32[2,512], index: 0, kind: input, shape index: {}]   ;;  %s6791_s1 = inlined_call_operand.vmem [shape: f32[32,2], index: 1, kind: input, shape index: {}]   ;;  %s6792_s2 = inlined_call_operand.vmem [shape: f32[32,1], index: 2, kind: input, shape index: {}]   ;;  %s6793_s3 = inlined_call_operand.vmem [shape: f32[32,32], index: 3, kind: input, shape index: {}]   ;;  %s6794_s4 = inlined_call_operand.vmem [shape: f32[32,1], index: 4, kind: input, shape index: {}]   ;;  %s6795_s5 = inlined_call_operand.vmem [shape: f32[32,32], index: 5, kind: input, shape index: {}]   ;;  %s6796_s6 = inlined_call_operand.vmem [shape: f32[32,1], index: 6, kind: input, shape index: {}]   ;;  %s6797_s7 = inlined_call_operand.vmem [shape: f32[1,32], index: 7, kind: input, shape index: {}]   ;;  %s6798_s8 = inlined_call_operand.<no memory space> [shape: f32[1,1], index: 8, kind: input, shape index: {}]   ;;  %s6799_s9 = inlined_call_operand.hbm [shape: f32[1,512], index: 9, kind: output, shape index: {}]  }
   0x1   :  { %v14_v0 = vstv %s6798_s8 }
   0x2   :  { %15 = vst [vmem:[#allocation2] sm:$0x1] %v14_v0 }
   0x3   :  { %16 = vsyncpa [#allocation4], 0 }
   0x4   :  { %18 = vsyncpa [#allocation4 + $0x1], 0  ;;  %s4156_s11 = smov 0   ;;  %s4158_s12 = smov 0  }
   0x5   :  { %s4160_s13 = smov 0   ;;  %s4162_s14 = smov 0  }
   0x6 LB: > { %s4177_s8 = sadd.s32 4294967295, %s4090_s14   ;;  %s3615_s15 = sadd.s32 4294967294, %s4090_s14   ;;  %s4090_s14 = sphi %s4162_s14, %s7057_s14   ;;  %s4086_s13 = sphi %s4160_s13, %s7056_s13   ;;  %s4082_s12 = sphi %s4158_s12, %s7055_s12   ;;  %s4078_s11 = sphi %s4156_s11, %s7054_s11  }
   0x7   : > { %s4181_s16 = sadd.s32 1, %s4090_s14   ;;  %s225_s17 = sadd.s32 1, %s4086_s13 }
   0x8   : > { %s222_s18 = ssub.s32 %s4090_s14, %s4181_s16  ;;  %p235_p0 = scmp.ne.s32.totalorder %s4086_s13, %s4082_s12 }
   0x9   : > { %p223_p1 = scmp.eq.s32.totalorder %s222_s18, 0  ;;  %p236_p2 = scmp.eq.s32.totalorder %s4177_s8, 1 }
   0xa   : > { %p241_p3 = scmp.ne.s32.totalorder %s4082_s12, %s4078_s11  ;;  %p242_p4 = scmp.eq.s32.totalorder %s3615_s15, 1 }
   0xb   : > { %s4192_s19 = scalar_select %p223_p1, %s4086_s13, %s225_s17  }
   0xc   : > { %p4194_p5 = por %p236_p2, %p235_p0  ;;  %p4198_p6 = por %p242_p4, %p241_p3 }
   0xd   : > { %p3618_p7 = scmp.ge.s32.totalorder %s4090_s14, 1  ;;  %p293_p8 = scmp.lt.s32.totalorder %s4090_s14, 3 }
   0xf   : > { %p294_p9 = pnand %p3618_p7, %p293_p8 }
  0x11   : > { %297 = sbr.rel (%p294_p9) target bundleno = 1578 (0x62a), region = 56 }
  0x18   : > { %v339_v1 = vld [vmem:[%s6791_s1 + $0x10] sm:$0xff]  ;;  %v337_v2 = vld [vmem:[%s6791_s1] sm:$0xff]  ;;  %v4092_v3 = vmov 1   ;;  %v338_v4 = vld [vmem:[%s6791_s1 + $0x8] sm:$0xff]  ;;  %v4093_v5 = vmov 0   ;;  %s3620_s28 = sshll.u32 %s4177_s8, 1  ;;  %v6800_v22 = vlaneseq }
  0x19   : > { %3920 = vset.pattern.permute.xlu0 %v4092_v3  ;;  %3918 = vset.pattern.permute.xlu1 %v4092_v3  ;;  %v340_v6 = vld [vmem:[%s6791_s1 + $0x18] sm:$0xff]  ;;  %v342_v7 = vld [vmem:[%s6792_s2 + $0x8] sm:$0xff]  ;;  %v341_v8 = vld [vmem:[%s6792_s2] sm:$0xff]  ;;  %p330_p10 = scmp.lt.s32.totalorder %s3620_s28, 3  ;;  %s326_s25 = sand.u32 1, %s4082_s12  }
  0x1a   : > { %401 = vperm.xlu0 %3920, %v339_v1   ;;  %393 = vperm.xlu1 %3918, %v337_v2   ;;  %v1306_v9 = vld [vmem:[%s6794_s4] sm:$0xff]  ;;  %v343_v10 = vld [vmem:[%s6792_s2 + $0x10] sm:$0xff]  ;;  %v344_v12 = vld [vmem:[%s6792_s2 + $0x18] sm:$0xff]  ;;  %v4254_v25 = vshrl.u32 %v6800_v22, 7  ;;  %s3619_s26 = sshll.u32 %s326_s25, 1  ;;  %s3740_s27 = sshll.u32 %s4177_s8, 5 }
  0x1b   : > { %v1308_v11 = vld [vmem:[%s6794_s4 + $0x10] sm:$0xff]  ;;  %v2268_v13 = vld [vmem:[%s6796_s6] sm:$0xff]  ;;  %v1307_v14 = vld [vmem:[%s6794_s4 + $0x8] sm:$0xff]  ;;  %s7059_s28 = smov (!%p330_p10, %s3620_s28), 3  ;;  %s3542_s17 = scalar_lea.sflag [#allocation4], %s326_s25 }
  0x1c   : > { %v2270_v15 = vld [vmem:[%s6796_s6 + $0x10] sm:$0xff]  ;;  %v1309_v16 = vld [vmem:[%s6794_s4 + $0x18] sm:$0xff]  ;;  %v3226_v17 = vld [vmem:[#allocation2] sm:$0x1]  ;;  %s3621_s29 = sshll.u32 %s7059_s28, 1  ;;  %6891 = vst [vmem:[#allocation6_spill] sm:$0xff] %v4254_v25 }
  0x1d   : > { %v2269_v18 = vld [vmem:[%s6796_s6 + $0x8] sm:$0xff]  ;;  %v2271_v19 = vld [vmem:[%s6796_s6 + $0x18] sm:$0xff]  ;;  %s333_s15 = scalar_lea.vmem %s6790_s0, %s3621_s29  ;;  %v4260_v26 = vsub.s32 0, %v4254_v25  ;;  %v410_v29 = vsub.s32 1, %v4254_v25  ;;  %v372_v32 = vsub.s32 2, %v4254_v25  ;;  %v414_v35 = vsub.s32 3, %v4254_v25 }
  0x1e   : > { %3921 = vset.pattern.permute.xlu0 %v4093_v5  ;;  %397 = vperm.xlu1 %3918, %v338_v4   ;;  %v336_v30 = vld [vmem:[%s333_s15] sm:$0xf]  ;;  %s328_s28 = scalar_lea.vmem [#allocation3], %s3619_s26  ;;  %s6748_s15 = scalar_lea.hbm %s6799_s9, %s3740_s27 }
  0x1f   : > { %347 = vperm.xlu0 %3921, %v337_v2   ;;  %6892 = vst [vmem:[#allocation7_spill] sm:$0xff] %v4260_v26  ;;  %v369_v31 = vrot.slane %v336_v30, %v4260_v26  ;;  %v411_v34 = vrot.slane %v336_v30, %v410_v29  ;;  %v373_v38 = vrot.slane %v336_v30, %v372_v32  ;;  %s3556_s29 = sshll.u32 %s328_s28, 4  ;;  %s4102_s8 = smov [#allocation3]   ;;  %s6750_s29 = int_to_ptr.vmem [resolvable:$true] %s3556_s29 }
  0x20   : > { %v415_v42 = vrot.slane %v336_v30, %v414_v35  ;;  %s4028_s18 = scalar_lea.vmem %s6750_s29, 32  ;;  %s4032_s22 = sshll.u32 %s4102_s8, 4  ;;  %s4033_s22 = int_to_ptr.vmem [resolvable:$false] %s4032_s22 }
  0x21   : > { %v379_v37 = vrot.slane %v369_v31, %v4260_v26  ;;  %v421_v39 = vrot.slane %v411_v34, %v410_v29  ;;  %v383_v44 = vrot.slane %v373_v38, %v4260_v26  ;;  %p4029_p11 = scmp.ne.s32.totalorder %s6750_s29, %s4028_s18  ;;  %s4034_s23 = scalar_lea.vmem %s4033_s22, 64 }
  0x22   : > { %3919 = vset.pattern.permute.xlu1 %v4093_v5  ;;  %v425_v47 = vrot.slane %v415_v42, %v410_v29  ;;  %p4035_p0 = scmp.lt.s32.totalorder %s6750_s29, %s4033_s22  ;;  %p4036_p1 = scmp.lt.s32.totalorder %s4034_s23, %s4028_s18 }
  0x23   : > { %352 = vperm.xlu0 %3921, %v338_v4   ;;  %362 = vperm.xlu1 %3919, %v340_v6   ;;  %p4030_p12 = pnand %p4029_p11, %p4194_p5 }
  0x24   : > { %p4037_p2 = por %p4036_p1, %p4035_p0 }
  0x25   : > { %p4031_p13 = pneg %p4030_p12 }
  0x27   : > { %357 = vperm.xlu0 %3921, %v339_v1   ;;  %3922 = vset.pattern.permute.xlu1 %v4092_v3  ;;  %p4038_p3 = pnand %p4037_p2, %p4031_p13 }
  0x28   : > { %405 = vperm.xlu1 %3922, %v340_v6  }
  0x2b   : > { %449 = vperm.xlu0 %3921, %v342_v7  }
  0x2c   : > { %3923 = vset.pattern.permute.xlu1 %v4093_v5 }
  0x2d   : > { %444 = vperm.xlu1 %3923, %v341_v8  }
  0x2f   : > { %1312 = vperm.xlu0 %3921, %v1306_v9  }
  0x31   : > { %454 = vperm.xlu1 %3923, %v343_v10  }
  0x33   : > { %1322 = vperm.xlu0 %3921, %v1308_v11  }
  0x35   : > { %459 = vperm.xlu1 %3923, %v344_v12  }
  0x37   : > { %2274 = vperm.xlu0 %3921, %v2268_v13  }
  0x39   : > { %1317 = vperm.xlu1 %3923, %v1307_v14  }
  0x3b   : > { %2284 = vperm.xlu0 %3921, %v2270_v15  }
  0x3d   : > { %1327 = vperm.xlu1 %3923, %v1309_v16  }
  0x3f   : > { %3229 = vperm.xlu0 %3921, %v3226_v17  }
  0x41   : > { %2279 = vperm.xlu1 %3923, %v2269_v18  }
  0x45   : > { %2289 = vperm.xlu1 %3923, %v2271_v19  }
  0x99   : > { %v394_v20 = vpop.permute.xlu1 %393  ;;  %v402_v21 = vpop.permute.xlu0 %401 }
  0x9a   : > { %v430_v43 = vmul.f32 %v421_v39, %v402_v21  ;;  %v426_v59 = vmul.f32 %v421_v39, %v394_v20  ;;  %v427_v62 = vmul.f32 %v425_v47, %v394_v20  ;;  %v431_v7 = vmul.f32 %v425_v47, %v402_v21 }
  0x9d   : > { %v398_v23 = vpop.permute.xlu1 %397 }
  0x9e   : > { %v348_v24 = vpop.permute.xlu0 %347  ;;  %v428_v51 = vmul.f32 %v421_v39, %v398_v23  ;;  %v429_v52 = vmul.f32 %v425_v47, %v398_v23 }
  0x9f   : > { %v384_v54 = vmul.f32 %v379_v37, %v348_v24  ;;  %v385_v57 = vmul.f32 %v383_v44, %v348_v24 }
  0xa1   : > { %v434_v63 = vadd.f32 %v426_v59, %v384_v54  ;;  %v435_v0 = vadd.f32 %v427_v62, %v385_v57  ;;  %v6812_v54 = vmov 920167782   ;;  %v6815_v57 = vmov 1326507024  }
  0xa2   : > { %v4262_v27 = vpop.permute.xlu1 %362  ;;  %v353_v28 = vpop.permute.xlu0 %352 }
  0xa3   : > { %v386_v48 = vmul.f32 %v379_v37, %v353_v28  ;;  %v387_v49 = vmul.f32 %v383_v44, %v353_v28  ;;  %v390_v21 = vmul.f32 %v379_v37, %v4262_v27  ;;  %v391_v30 = vmul.f32 %v383_v44, %v4262_v27 }
  0xa4   : > { %v6807_v27 = vmov 2475754826  }
  0xa5   : > { %v436_v55 = vadd.f32 %v428_v51, %v386_v48  ;;  %v437_v56 = vadd.f32 %v429_v52, %v387_v49  ;;  %v6810_v51 = vmov 2102212464  }
  0xa6   : > { %v358_v36 = vpop.permute.xlu0 %357 }
  0xa7   : > { %v406_v33 = vpop.permute.xlu1 %405  ;;  %v388_v40 = vmul.f32 %v379_v37, %v358_v36  ;;  %v389_v2 = vmul.f32 %v383_v44, %v358_v36 }
  0xa8   : > { %v432_v17 = vmul.f32 %v421_v39, %v406_v33  ;;  %v433_v31 = vmul.f32 %v425_v47, %v406_v33  ;;  %v6805_v47 = vmov 2131351028  }
  0xa9   : > { %v438_v46 = vadd.f32 %v430_v43, %v388_v40  ;;  %v439_v12 = vadd.f32 %v431_v7, %v389_v2 }
  0xaa   : > { %v450_v53 = vpop.permute.xlu0 %449  ;;  %v440_v38 = vadd.f32 %v432_v17, %v390_v21 }
  0xab   : > { %v4273_v60 = vadd.f32 %v450_v53, %v436_v55  ;;  %v4275_v61 = vadd.f32 %v450_v53, %v437_v56 }
  0xac   : > { %v445_v41 = vpop.permute.xlu1 %444 }
  0xad   : > { %6894 = vst [vmem:[#allocation9_spill] sm:$0xff] %v4273_v60  ;;  %v681_v3 = vand.u32 2139095040, %v4273_v60  ;;  %v785_v4 = vand.u32 2139095040, %v4275_v61  ;;  %v4279_v5 = vadd.f32 %v445_v41, %v434_v63  ;;  %v4281_v6 = vadd.f32 %v445_v41, %v435_v0 }
  0xaf   : > { %6895 = vst [vmem:[#allocation10_spill] sm:$0xff] %v4279_v5  ;;  %6896 = vst [vmem:[#allocation11_spill] sm:$0xff] %v4281_v6  ;;  %v682_v9 = vshrl.u32 %v681_v3, 23  ;;  %v786_v10 = vshrl.u32 %v785_v4, 23  ;;  %v473_v11 = vand.u32 2139095040, %v4279_v5  ;;  %v577_v13 = vand.u32 2139095040, %v4281_v6 }
  0xb0   : > { %v455_v45 = vpop.permute.xlu1 %454 }
  0xb1   : > { %v4270_v50 = vadd.f32 %v455_v45, %v438_v46  ;;  %v4285_v14 = vadd.f32 %v455_v45, %v439_v12  ;;  %v3630_v18 = vadd.s32 4294967169, %v682_v9  ;;  %v3634_v19 = vadd.s32 4294967169, %v786_v10 }
  0xb2   : > { %v474_v20 = vshrl.u32 %v473_v11, 23  ;;  %v578_v23 = vshrl.u32 %v577_v13, 23  ;;  %v6830_v45 = vmov 683565275  }
  0xb3   : > { %6893 = vst [vmem:[#allocation8_spill] sm:$0xff] %v4270_v50  ;;  %v889_v58 = vand.u32 2139095040, %v4270_v50  ;;  %6897 = vst [vmem:[#allocation12_spill] sm:$0xff] %v4285_v14  ;;  %v6802_v15 = vand.u32 2147483647, %v4270_v50  ;;  %v993_v29 = vand.u32 2139095040, %v4285_v14 }
  0xb4   : > { %v4293_v34 = vadd.s32 1, %v3630_v18  ;;  %v4295_v35 = vadd.s32 1, %v3634_v19  ;;  %v3622_v36 = vadd.s32 4294967169, %v474_v20  ;;  %v3626_v39 = vadd.s32 4294967169, %v578_v23  ;;  %v460_v13 = vpop.permute.xlu1 %459 }
  0xb5   : > { %v890_v1 = vshrl.u32 %v889_v58, 23  ;;  %v893_v24 = vand.u32 8388607, %v6802_v15  ;;  %v6803_v37 = vand.u32 2147483647, %v4285_v14  ;;  %v994_v41 = vshrl.u32 %v993_v29, 23 }
  0xb6   : > { %vm689_vm1 = vcmp.gt.s32.totalorder %v4293_v34, 0  ;;  %vm793_vm3 = vcmp.gt.s32.totalorder %v4295_v35, 0  ;;  %v441_v29 = vadd.f32 %v433_v31, %v391_v30 }
  0xb7   : > { %v3638_v8 = vadd.s32 4294967169, %v890_v1  ;;  %v894_v42 = vor.u32 8388608, %v893_v24  ;;  %v3642_v0 = vadd.s32 4294967169, %v994_v41  ;;  %v997_v18 = vand.u32 8388607, %v6803_v37 }
  0xb8   : > { %v4349_v41 = vadd.s32 1, %v3622_v36 }
  0xb9   : > { %v896_v16 = vadd.s32 1, %v3638_v8  ;;  %v1000_v9 = vadd.s32 1, %v3642_v0  ;;  %v4328_v12 = vshll.u32 %v894_v42, 8  ;;  %v998_v36 = vor.u32 8388608, %v997_v18 }
  0xba   : > { %vm481_vm14 = vcmp.gt.s32.totalorder %v4349_v41, 0 }
  0xbb   : > { %vm897_vm0 = vcmp.gt.s32.totalorder %v896_v16, 0  ;;  %vm1001_vm7 = vcmp.gt.s32.totalorder %v1000_v9, 0 }
  0xbc   : > { %v898_v28 = vsel %vm897_vm0, %v896_v16, 0 }
  0xbd   : > { %v900_v32 = vand.u32 31, %v898_v28  ;;  %v4298_v43 = vshrl.u32 %v898_v28, 5  ;;  %v1002_v28 = vsel %vm1001_vm7, %v1000_v9, 0  ;;  %v1038_v9 = vshll.u32 %v998_v36, 8 }
  0xbf   : > { %v901_v40 = vsub.s32 32, %v900_v32  ;;  %v903_v46 = vshll.u32 %v6830_v45, %v900_v32  ;;  %v906_v33 = vshll.u32 %v6807_v27, %v900_v32  ;;  %v909_v49 = vshll.u32 %v6805_v47, %v900_v32 }
  0xc0   : > { %v912_v53 = vshll.u32 %v6810_v51, %v900_v32  ;;  %v915_v56 = vshll.u32 %v6812_v54, %v900_v32  ;;  %vm918_vm2 = vcmp.lt.s32.totalorder %v4298_v43, 1  ;;  %vm921_vm4 = vcmp.lt.s32.totalorder %v4298_v43, 4 }
  0xc1   : > { %v904_v44 = vshrl.u32 %v6807_v27, %v901_v40  ;;  %v907_v48 = vshrl.u32 %v6805_v47, %v901_v40  ;;  %v910_v52 = vshrl.u32 %v6810_v51, %v901_v40  ;;  %v913_v55 = vshrl.u32 %v6812_v54, %v901_v40 }
  0xc2   : > { %v916_v58 = vshrl.u32 %v6815_v57, %v901_v40  ;;  %vm920_vm5 = vcmp.lt.s32.totalorder %v4298_v43, 3  ;;  %vm919_vm6 = vcmp.lt.s32.totalorder %v4298_v43, 2  ;;  %v4347_v32 = vadd.f32 %v460_v13, %v440_v38 }
  0xc3   : > { %v905_v59 = vor.u32 %v904_v44, %v903_v46  ;;  %v908_v62 = vor.u32 %v907_v48, %v906_v33  ;;  %v911_v63 = vor.u32 %v910_v52, %v909_v49  ;;  %v914_v1 = vor.u32 %v913_v55, %v912_v53 }
  0xc4   : > { %v917_v2 = vor.u32 %v916_v58, %v915_v56  ;;  %6898 = vst [vmem:[#allocation13_spill] sm:$0xff] %v4347_v32  ;;  %v902_v42 = vshrl.u32 %v6830_v45, %v901_v40  ;;  %v1004_v46 = vand.u32 31, %v1002_v28  ;;  %v6804_v33 = vand.u32 2147483647, %v4281_v6 }
  0xc5   : > { %v926_v3 = vsel %vm918_vm2, %v905_v59, %v908_v62  ;;  %v930_v4 = vsel %vm918_vm2, %v908_v62, %v911_v63  ;;  %v927_v7 = vsel %vm921_vm4, %v914_v1, 920167782  ;;  %v923_v24 = vsel %vm921_vm4, %v911_v63, 2102212464 }
  0xc6   : > { %v931_v8 = vsel %vm921_vm4, %v917_v2, 1326507024  ;;  %v928_v10 = vsel %vm920_vm5, %v911_v63, %v927_v7  ;;  %v690_v44 = vsel %vm689_vm1, %v4293_v34, 0  ;;  %v794_v48 = vsel %vm793_vm3, %v4295_v35, 0 }
  0xc7   : > { %v932_v11 = vsel %vm920_vm5, %v914_v1, %v931_v8  ;;  %v929_v16 = vsel %vm919_vm6, %v926_v3, %v928_v10  ;;  %v584_v49 = vadd.s32 1, %v3626_v39  ;;  %v4359_v52 = vadd.f32 %v460_v13, %v441_v29 }
  0xc8   : > { %v933_v17 = vsel %vm919_vm6, %v930_v4, %v932_v11  ;;  %v4341_v23 = vmul.u32.u64.low %v4328_v12, %v929_v16  ;;  %v4342_v21 = vmul.u32.u64.high %v4328_v12, %v929_v16, %v4341_v23  ;;  %v922_v30 = vsel %vm918_vm2, %v902_v42, %v905_v59 }
  0xc9   : > { %v4337_v19 = vmul.u32.u64.low %v4328_v12, %v933_v17  ;;  %v4338_v20 = vmul.u32.u64.high %v4328_v12, %v933_v17, %v4337_v19  ;;  %6899 = vst [vmem:[#allocation14_spill] sm:$0xff] %v4359_v52  ;;  %v924_v31 = vsel %vm920_vm5, %v908_v62, %v923_v24  ;;  %v1005_v38 = vsub.s32 32, %v1004_v46 }
  0xca   : > { %v944_v34 = vadd.s32 1, %v4342_v21  ;;  %v1003_v40 = vshrl.u32 %v1002_v28, 5  ;;  %v1097_v53 = vand.u32 2139095040, %v4347_v32  ;;  %v1007_v35 = vshll.u32 %v6830_v45, %v1004_v46 }
  0xcb   : > { %vm943_vm8 = vc.u32 %v4338_v20, %v4341_v23  ;;  %v1008_v39 = vshrl.u32 %v6807_v27, %v1005_v38  ;;  %v1010_v55 = vshll.u32 %v6807_v27, %v1004_v46  ;;  %v1011_v56 = vshrl.u32 %v6805_v47, %v1005_v38 }
  0xcc   : > { %vm585_vm9 = vcmp.gt.s32.totalorder %v584_v49, 0  ;;  %v1013_v58 = vshll.u32 %v6805_v47, %v1004_v46  ;;  %v1014_v59 = vshrl.u32 %v6810_v51, %v1005_v38  ;;  %v1016_v62 = vshll.u32 %v6810_v51, %v1004_v46 }
  0xcd   : > { %v1017_v63 = vshrl.u32 %v6812_v54, %v1005_v38  ;;  %v1009_v0 = vor.u32 %v1008_v39, %v1007_v35  ;;  %v1012_v1 = vor.u32 %v1011_v56, %v1010_v55  ;;  %v1019_v2 = vshll.u32 %v6812_v54, %v1004_v46 }
  0xce   : > { %v1020_v3 = vshrl.u32 %v6815_v57, %v1005_v38  ;;  %v925_v4 = vsel %vm919_vm6, %v922_v30, %v924_v31  ;;  %v1015_v7 = vor.u32 %v1014_v59, %v1013_v58  ;;  %vm1022_vm10 = vcmp.lt.s32.totalorder %v1003_v40, 1 }
  0xcf   : > { %v1018_v8 = vor.u32 %v1017_v63, %v1016_v62  ;;  %vm1025_vm11 = vcmp.lt.s32.totalorder %v1003_v40, 4  ;;  %v1098_v11 = vshrl.u32 %v1097_v53, 23  ;;  %v945_v13 = vsel %vm943_vm8, %v944_v34, %v4342_v21 }
  0xd0   : > { %v1021_v10 = vor.u32 %v1020_v3, %v1019_v2  ;;  %vm1024_vm12 = vcmp.lt.s32.totalorder %v1003_v40, 3  ;;  %v1030_v16 = vsel %vm1022_vm10, %v1009_v0, %v1012_v1  ;;  %vm1023_vm13 = vcmp.lt.s32.totalorder %v1003_v40, 2 }
  0xd1   : > { %v1031_v17 = vsel %vm1025_vm11, %v1018_v8, 920167782  ;;  %v1034_v18 = vsel %vm1022_vm10, %v1012_v1, %v1015_v7  ;;  %v941_v24 = vmul.u32 %v4328_v12, %v925_v4  ;;  %v1006_v28 = vshrl.u32 %v6830_v45, %v1005_v38 }
  0xd2   : > { %v1032_v43 = vsel %vm1024_vm12, %v1015_v7, %v1031_v17  ;;  %v1035_v19 = vsel %vm1025_vm11, %v1021_v10, 1326507024  ;;  %v1027_v46 = vsel %vm1025_vm11, %v1015_v7, 2102212464  ;;  %v3646_v35 = vadd.s32 4294967169, %v1098_v11 }
  0xd3   : > { %v1033_v29 = vsel %vm1023_vm13, %v1030_v16, %v1032_v43  ;;  %v1036_v42 = vsel %vm1024_vm12, %v1018_v8, %v1035_v19  ;;  %v4397_v36 = vadd.s32 %v945_v13, %v941_v24  ;;  %v4402_v12 = vshrl.u32 %v690_v44, 5 }
  0xd4   : > { %v1037_v21 = vsel %vm1023_vm13, %v1034_v18, %v1036_v42  ;;  %v4393_v30 = vmul.u32.u64.low %v1038_v9, %v1033_v29  ;;  %v4394_v31 = vmul.u32.u64.high %v1038_v9, %v1033_v29, %v4393_v30  ;;  %v4404_v38 = vand.u32 31, %v690_v44 }
  0xd5   : > { %v4399_v34 = vmul.u32.u64.low %v1038_v9, %v1037_v21  ;;  %v4400_v53 = vmul.u32.u64.high %v1038_v9, %v1037_v21, %v4399_v34  ;;  %v4408_v39 = vand.u32 8388607, %v6804_v33  ;;  %v4411_v56 = vand.u32 31, %v794_v48 }
  0xd6   : > { %6900 = vst [vmem:[#allocation15_spill] sm:$0xff] %v4404_v38  ;;  %v1026_v58 = vsel %vm1022_vm10, %v1006_v28, %v1009_v0  ;;  %v1028_v59 = vsel %vm1024_vm12, %v1012_v1, %v1027_v46  ;;  %v1104_v62 = vadd.s32 1, %v3646_v35  ;;  %v4415_v63 = vshrl.u32 %v794_v48, 5 }
  0xd7   : > { %v4419_v44 = vsel %vm585_vm9, %v584_v49, 0  ;;  %v1048_v2 = vadd.s32 1, %v4394_v31  ;;  %v947_v3 = vadd.s32 536870912, %v4397_v36  ;;  %vm1047_vm15 = vc.u32 %v4400_v53, %v4393_v30 }
  0xd8   : > { %vm1105_vm0 = vcmp.gt.s32.totalorder %v1104_v62, 0  ;;  %v1201_v0 = vand.u32 2139095040, %v4359_v52  ;;  %v4427_v1 = vsub.s32 32, %v4404_v38  ;;  %v1029_v48 = vsel %vm1023_vm13, %v1026_v58, %v1028_v59 }
  0xd9   : > { %v6801_v4 = vand.u32 2147483647, %v4347_v32  ;;  %v1106_v7 = vsel %vm1105_vm0, %v1104_v62, 0  ;;  %v4433_v49 = vshll.u32 %v6810_v51, %v4404_v38  ;;  %v4437_v8 = vshll.u32 %v6812_v54, %v4404_v38 }
  0xda   : > { %6901 = vst [vmem:[#allocation16_spill] sm:$0xff] %v4427_v1  ;;  %v4440_v10 = vsub.s32 32, %v4411_v56  ;;  %v1108_v11 = vand.u32 31, %v1106_v7  ;;  %v4444_v13 = vshll.u32 %v6810_v51, %v4411_v56  ;;  %v4448_v40 = vshll.u32 %v6812_v54, %v4411_v56 }
  0xdb   : > { %v4451_v16 = vand.u32 31, %v4419_v44  ;;  %v1049_v17 = vsel %vm1047_vm15, %v1048_v2, %v4394_v31  ;;  %v4454_v43 = vshrl.u32 %v947_v3, 30  ;;  %v1045_v18 = vmul.u32 %v1038_v9, %v1029_v48 }
  0xdc   : > { %v1109_v19 = vsub.s32 32, %v1108_v11  ;;  %v1202_v24 = vshrl.u32 %v1201_v0, 23  ;;  %v4458_v28 = vshrl.u32 %v6812_v54, %v4427_v1  ;;  %v4462_v29 = vshrl.u32 %v6815_v57, %v4427_v1 }
  0xdd   : > { %6902 = vst [vmem:[#allocation17_spill] sm:$0xff] %v4454_v43  ;;  %v482_v42 = vsel %vm481_vm14, %v4349_v41, 0  ;;  %v1101_v46 = vand.u32 8388607, %v6801_v4  ;;  %v4469_v21 = vadd.s32 %v1049_v17, %v1045_v18  ;;  %v1111_v9 = vshll.u32 %v6830_v45, %v1108_v11 }
  0xde   : > { %v1112_v31 = vshrl.u32 %v6807_v27, %v1109_v19  ;;  %v1114_v34 = vshll.u32 %v6807_v27, %v1108_v11  ;;  %v1115_v35 = vshrl.u32 %v6805_v47, %v1109_v19  ;;  %v1118_v58 = vshrl.u32 %v6810_v51, %v1109_v19 }
  0xdf   : > { %v1120_v59 = vshll.u32 %v6810_v51, %v1108_v11  ;;  %v1121_v62 = vshrl.u32 %v6812_v54, %v1109_v19  ;;  %v4479_v41 = vsub.s32 32, %v4451_v16  ;;  %v949_v2 = vshll.u32 %v4454_v43, 30 }
  0xe0   : > { %v4482_v3 = vshrl.u32 %v1106_v7, 5  ;;  %v3650_v0 = vadd.s32 4294967169, %v1202_v24  ;;  %v1113_v48 = vor.u32 %v1112_v31, %v1111_v9  ;;  %v1116_v17 = vor.u32 %v1115_v35, %v1114_v34 }
  0xe1   : > { %v1117_v18 = vshll.u32 %v6805_v47, %v1108_v11  ;;  %v1122_v22 = vor.u32 %v1121_v62, %v1120_v59  ;;  %v1051_v4 = vadd.s32 536870912, %v4469_v21  ;;  %v1102_v15 = vor.u32 8388608, %v1101_v46 }
  0xe2   : > { %v1123_v37 = vshll.u32 %v6812_v54, %v1108_v11  ;;  %v1124_v33 = vshrl.u32 %v6815_v57, %v1109_v19  ;;  %v809_v55 = vshrl.u32 %v6812_v54, %v4440_v10  ;;  %v4492_v7 = vshrl.u32 %v6815_v57, %v4440_v10 }
  0xe3   : > { %v1119_v24 = vor.u32 %v1118_v58, %v1117_v18  ;;  %v6809_v9 = vand.u32 2147483647, %v4359_v52  ;;  %vm1126_vm1 = vcmp.lt.s32.totalorder %v4482_v3, 1  ;;  %vm1129_vm2 = vcmp.lt.s32.totalorder %v4482_v3, 4 }
  0xe4   : > { %v1125_v31 = vor.u32 %v1124_v33, %v1123_v37  ;;  %v1208_v46 = vadd.s32 1, %v3650_v0  ;;  %v4497_v34 = vshrl.u32 %v482_v42, 5  ;;  %v4500_v11 = vsub.s32 %v4397_v36, %v949_v2 }
  0xe5   : > { %v1134_v35 = vsel %vm1126_vm1, %v1113_v48, %v1116_v17  ;;  %v1135_v59 = vsel %vm1129_vm2, %v1122_v22, 920167782  ;;  %v601_v58 = vshrl.u32 %v6812_v54, %v4479_v41  ;;  %v4508_v37 = vshrl.u32 %v1051_v4, 30 }
  0xe6   : > { %6903 = vst [vmem:[#allocation18_spill] sm:$0xff] %v4497_v34  ;;  %vm1128_vm3 = vcmp.lt.s32.totalorder %v4482_v3, 3  ;;  %v4511_v33 = vshll.u32 %v1102_v15, 8  ;;  %vm1127_vm4 = vcmp.lt.s32.totalorder %v4482_v3, 2  ;;  %v1138_v62 = vsel %vm1126_vm1, %v1116_v17, %v1119_v24 }
  0xe7   : > { %6904 = vst [vmem:[#allocation19_spill] sm:$0xff] %v4508_v37  ;;  %v1136_v36 = vsel %vm1128_vm3, %v1119_v24, %v1135_v59  ;;  %v1139_v2 = vsel %vm1129_vm2, %v1125_v31, 1326507024  ;;  %v1205_v15 = vand.u32 8388607, %v6809_v9  ;;  %vm1209_vm5 = vcmp.gt.s32.totalorder %v1208_v46, 0 }
  0xe8   : > { %v1137_v0 = vsel %vm1127_vm4, %v1134_v35, %v1136_v36  ;;  %v1140_v4 = vsel %vm1128_vm3, %v1122_v22, %v1139_v2  ;;  %v952_v18 = vsub.s32 0, %v4500_v11  ;;  %v600_v31 = vshll.u32 %v6810_v51, %v4451_v16 }
  0xe9   : > { %v1141_v59 = vsel %vm1127_vm4, %v1138_v62, %v1140_v4  ;;  %v4530_v47 = vmul.u32.u64.low %v4511_v33, %v1137_v0  ;;  %v4531_v27 = vmul.u32.u64.high %v4511_v33, %v1137_v0, %v4530_v47  ;;  %v1053_v35 = vshll.u32 %v4508_v37, 30 }
  0xea   : > { %v4538_v22 = vmul.u32.u64.low %v4511_v33, %v1141_v59  ;;  %v4539_v36 = vmul.u32.u64.high %v4511_v33, %v1141_v59, %v4538_v22  ;;  %v4541_v2 = vand.u32 31, %v482_v42  ;;  %v4544_v9 = vshrl.u32 %v4419_v44, 5 }
  0xeb   : > { %6905 = vst [vmem:[#allocation20_spill] sm:$0xff] %v4530_v47  ;;  %v1131_v62 = vsel %vm1129_vm2, %v1119_v24, 2102212464  ;;  %v1210_v0 = vsel %vm1209_vm5, %v1208_v46, 0  ;;  %v4548_v4 = vor.u32 %v601_v58, %v600_v31  ;;  %v4552_v51 = vshrl.u32 %v6815_v57, %v4479_v41 }
  0xec   : > { %6906 = vst [vmem:[#allocation21_spill] sm:$0xff] %v4539_v36  ;;  %v1110_v54 = vshrl.u32 %v6830_v45, %v1109_v19  ;;  %v1212_v25 = vand.u32 31, %v1210_v0  ;;  %v4557_v42 = vor.u32 %v4458_v28, %v4433_v49  ;;  %v4560_v44 = vor.u32 %v809_v55, %v4444_v13 }
  0xed   : > { %v4563_v59 = vmin.u32 %v952_v18, %v4500_v11  ;;  %v1206_v24 = vor.u32 8388608, %v1205_v15  ;;  %v6907_v46 = vmov 920167782   ;;  %v4570_v31 = vsub.s32 %v4469_v21, %v1053_v35 }
  0xee   : > { %v4567_v58 = vshll.u32 %v6907_v46, %v4451_v16  ;;  %v1130_v19 = vsel %vm1126_vm1, %v1110_v54, %v1113_v48  ;;  %v1132_v49 = vsel %vm1128_vm3, %v1116_v17, %v1131_v62  ;;  %v4579_v13 = vsub.s32 32, %v4541_v2 }
  0xef   : > { %vm609_vm6 = vcmp.lt.s32.totalorder %v4544_v9, 4  ;;  %v1213_v28 = vsub.s32 32, %v1212_v25  ;;  %v6908_v15 = vmov 2102212464   ;;  %v1152_v48 = vadd.s32 1, %v4531_v27 }
  0xf0   : > { %v4584_v18 = vshll.u32 %v6908_v15, %v4541_v2  ;;  %v605_v21 = vor.u32 %v4552_v51, %v4567_v58  ;;  %v4591_v54 = vsel %vm609_vm6, %v4548_v4, 920167782  ;;  %v954_v17 = vclz %v4563_v59 }
  0xf1   : > { %v1133_v35 = vsel %vm1127_vm4, %v1130_v19, %v1132_v49  ;;  %vm1151_vm7 = vc.u32 %v4539_v36, %v4530_v47  ;;  %v4599_v22 = vshll.u32 %v1206_v24, 8  ;;  %v1056_v62 = vsub.s32 0, %v4570_v31 }
  0xf2   : > { %v1215_v51 = vshll.u32 %v6830_v45, %v1212_v25  ;;  %v6909_v58 = vmov 2475754826   ;;  %v591_v57 = vshll.u32 %v6830_v45, %v4451_v16  ;;  %v6910_v59 = vmov 2131351028  }
  0xf3   : > { %v1216_v55 = vshrl.u32 %v6909_v58, %v1213_v28  ;;  %v1218_v26 = vshll.u32 %v6909_v58, %v1212_v25  ;;  %v1219_v43 = vshrl.u32 %v6910_v59, %v1213_v28  ;;  %v1221_v3 = vshll.u32 %v6910_v59, %v1212_v25 }
  0xf4   : > { %v1222_v19 = vshrl.u32 %v6908_v15, %v1213_v28  ;;  %v1149_v24 = vmul.u32 %v4511_v33, %v1133_v35  ;;  %v1153_v49 = vsel %vm1151_vm7, %v1152_v48, %v4531_v27  ;;  %v1211_v37 = vshrl.u32 %v1210_v0, 5 }
  0xf5   : > { %v1217_v52 = vor.u32 %v1216_v55, %v1215_v51  ;;  %v1220_v32 = vor.u32 %v1219_v43, %v1218_v26  ;;  %v1224_v14 = vshll.u32 %v6908_v15, %v1212_v25  ;;  %v1225_v45 = vshrl.u32 %v6907_v46, %v1213_v28 }
  0xf6   : > { %v1223_v50 = vor.u32 %v1222_v19, %v1221_v3  ;;  %v1227_v38 = vshll.u32 %v6907_v46, %v1212_v25  ;;  %v6911_v1 = vmov 1326507024   ;;  %v592_v47 = vshrl.u32 %v6909_v58, %v4479_v41 }
  0xf7   : > { %v1228_v60 = vshrl.u32 %v6911_v1, %v1213_v28  ;;  %v594_v33 = vshll.u32 %v6909_v58, %v4451_v16  ;;  %v3643_v27 = vmin.u32 %v1056_v62, %v4570_v31  ;;  %v4621_v0 = vadd.s32 %v1153_v49, %v1149_v24 }
  0xf8   : > { %v1226_v26 = vor.u32 %v1225_v45, %v1224_v14  ;;  %v595_v43 = vshrl.u32 %v6910_v59, %v4479_v41  ;;  %v6912_v55 = vmov 683565275   ;;  %vm1230_vm8 = vcmp.lt.s32.totalorder %v1211_v37, 1 }
  0xf9   : > { %v1214_v48 = vshrl.u32 %v6912_v55, %v1213_v28  ;;  %v1229_v35 = vor.u32 %v1228_v60, %v1227_v38  ;;  %vm1233_vm9 = vcmp.lt.s32.totalorder %v1211_v37, 4  ;;  %vm1232_vm10 = vcmp.lt.s32.totalorder %v1211_v37, 3 }
  0xfa   : > { %v1235_v25 = vsel %vm1233_vm9, %v1223_v50, 2102212464  ;;  %v1238_v51 = vsel %vm1230_vm8, %v1217_v52, %v1220_v32  ;;  %v1239_v3 = vsel %vm1233_vm9, %v1226_v26, 920167782  ;;  %vm1231_vm11 = vcmp.lt.s32.totalorder %v1211_v37, 2 }
  0xfb   : > { %v1240_v19 = vsel %vm1232_vm10, %v1223_v50, %v1239_v3  ;;  %v1242_v36 = vsel %vm1230_vm8, %v1220_v32, %v1223_v50  ;;  %v598_v62 = vshrl.u32 %v6908_v15, %v4479_v41  ;;  %v1234_v24 = vsel %vm1230_vm8, %v1214_v48, %v1217_v52 }
  0xfc   : > { %v1241_v14 = vsel %vm1231_vm11, %v1238_v51, %v1240_v19  ;;  %v1243_v45 = vsel %vm1233_vm9, %v1229_v35, 1326507024  ;;  %v597_v28 = vshll.u32 %v6910_v59, %v4451_v16  ;;  %v1236_v60 = vsel %vm1232_vm10, %v1220_v32, %v1235_v25 }
  0xfd   : > { %v1244_v38 = vsel %vm1232_vm10, %v1226_v26, %v1243_v45  ;;  %v4632_v49 = vmul.u32.u64.low %v4599_v22, %v1241_v14  ;;  %v4633_v6 = vmul.u32.u64.high %v4599_v22, %v1241_v14, %v4632_v49  ;;  %v1155_v3 = vadd.s32 536870912, %v4621_v0 }
  0xfe   : > { %v1245_v50 = vsel %vm1231_vm11, %v1242_v36, %v1244_v38  ;;  %v593_v5 = vor.u32 %v592_v47, %v591_v57  ;;  %v596_v34 = vor.u32 %v595_v43, %v594_v33  ;;  %vm817_vm12 = vcmp.lt.s32.totalorder %v4415_v63, 4 }
  0xff   : > { %v3640_v52 = vadd.s32 4294967294, %v954_v17  ;;  %v4640_v48 = vmul.u32.u64.low %v4599_v22, %v1245_v50  ;;  %v4641_v35 = vmul.u32.u64.high %v4599_v22, %v1245_v50, %v4640_v48  ;;  %v599_v32 = vor.u32 %v598_v62, %v597_v28 }
 0x100   : > { %v4645_v16 = vshll.u32 %v6907_v46, %v4541_v2  ;;  %v619_v26 = vsel %vm609_vm6, %v605_v21, 1326507024  ;;  %v1237_v25 = vsel %vm1231_vm11, %v1234_v24, %v1236_v60  ;;  %v582_v47 = vor.u32 8388608, %v4408_v39 }
 0x101   : > { %v1256_v57 = vadd.s32 1, %v4633_v6  ;;  %v590_v36 = vshrl.u32 %v6912_v55, %v4479_v41  ;;  %vm606_vm13 = vcmp.lt.s32.totalorder %v4544_v9, 1  ;;  %vm608_vm14 = vcmp.lt.s32.totalorder %v4544_v9, 3 }
 0x102   : > { %v1058_v17 = vclz %v3643_v27  ;;  %v4656_v33 = vshrl.u32 %v1155_v3, 30  ;;  %v614_v43 = vsel %vm606_vm13, %v593_v5, %v596_v34  ;;  %v616_v37 = vsel %vm608_vm14, %v599_v32, %v4591_v54 }
 0x103   : > { %vm3641_vm15 = vcmp.lt.s32.totalorder %v3640_v52, 0  ;;  %v1253_v39 = vmul.u32 %v4599_v22, %v1237_v25  ;;  %vm1255_vm0 = vc.u32 %v4641_v35, %v4632_v49  ;;  %vm607_vm1 = vcmp.lt.s32.totalorder %v4544_v9, 2 }
 0x104   : > { %v1257_v41 = vsel %vm1255_vm0, %v1256_v57, %v4633_v6  ;;  %v611_v21 = vsel %vm609_vm6, %v599_v32, 2102212464  ;;  %v618_v27 = vsel %vm606_vm13, %v596_v34, %v599_v32  ;;  %v620_v54 = vsel %vm608_vm14, %v4548_v4, %v619_v26 }
 0x105   : > { %v1258_v51 = vadd.s32 %v1257_v41, %v1253_v39  ;;  %v617_v22 = vsel %vm607_vm1, %v614_v43, %v616_v37  ;;  %v621_v19 = vsel %vm607_vm1, %v618_v27, %v620_v54  ;;  %v622_v62 = vshll.u32 %v582_v47, 8 }
 0x106   : > { %v4679_v24 = vsel %vm3641_vm15, 0, %v3640_v52  ;;  %v3644_v6 = vadd.s32 4294967294, %v1058_v17  ;;  %v1157_v14 = vshll.u32 %v4656_v33, 30  ;;  %v610_v45 = vsel %vm606_vm13, %v590_v36, %v593_v5 }
 0x107   : > { %v1259_v28 = vadd.s32 536870912, %v1258_v51  ;;  %v612_v4 = vsel %vm608_vm14, %v596_v34, %v611_v21  ;;  %v4686_v60 = vmul.u32.u64.low %v622_v62, %v621_v19  ;;  %v4687_v38 = vmul.u32.u64.high %v622_v62, %v621_v19, %v4686_v60 }
 0x108   : > { %v823_v3 = vsel %vm817_vm12, %v4560_v44, 920167782  ;;  %v6913_v50 = vor.u32 %v4492_v7, %v4448_v40  ;;  %v4697_v48 = vmul.u32.u64.low %v622_v62, %v617_v22  ;;  %v4698_v32 = vmul.u32.u64.high %v622_v62, %v617_v22, %v4697_v48 }
 0x109   : > { %v4703_v5 = vshrl.u32 %v6907_v46, %v4579_v13  ;;  %v4707_v34 = vshrl.u32 %v6911_v1, %v4579_v13  ;;  %v942_v26 = vadd.s32 %v4341_v23, %v4338_v20  ;;  %v1046_v40 = vadd.s32 %v4393_v30, %v4400_v53 }
 0x10a   : > { %v827_v52 = vsel %vm817_vm12, %v6913_v50, 1326507024  ;;  %v962_v7 = vsub.s32 4294967266, %v4679_v24  ;;  %vm3645_vm2 = vcmp.lt.s32.totalorder %v3644_v6, 0  ;;  %v613_v25 = vsel %vm607_vm1, %v610_v45, %v612_v4 }
 0x10b   : > { %v800_v47 = vshrl.u32 %v6909_v58, %v4440_v10  ;;  %v4719_v57 = vsub.s32 %v4621_v0, %v1157_v14  ;;  %v4721_v36 = vshrl.u32 %v1259_v28, 30  ;;  %vm631_vm3 = vc.u32 %v4687_v38, %v4697_v48 }
 0x10c   : > { %v803_v20 = vshrl.u32 %v6910_v59, %v4440_v10  ;;  %v632_v23 = vadd.s32 1, %v4698_v32  ;;  %v6914_v30 = vand.u32 2147483647, %v4275_v61  ;;  %v799_v9 = vshll.u32 %v6912_v55, %v4411_v56 }
 0x10d   : > { %v802_v0 = vshll.u32 %v6909_v58, %v4411_v56  ;;  %v1061_v17 = vsel %vm3645_vm2, 0, %v3644_v6  ;;  %v629_v43 = vmul.u32 %v622_v62, %v613_v25  ;;  %v805_v37 = vshll.u32 %v6910_v59, %v4411_v56 }
 0x10e   : > { %v789_v53 = vand.u32 8388607, %v6914_v30  ;;  %v806_v39 = vshrl.u32 %v6908_v15, %v4440_v10  ;;  %v958_v41 = vsub.s32 32, %v4679_v24  ;;  %v633_v21 = vsel %vm631_vm3, %v632_v23, %v4698_v32 }
 0x10f   : > { %v801_v27 = vor.u32 %v800_v47, %v799_v9  ;;  %v804_v54 = vor.u32 %v803_v20, %v802_v0  ;;  %v1261_v22 = vshll.u32 %v4721_v36, 30  ;;  %v634_v19 = vadd.s32 %v633_v21, %v629_v43 }
 0x110   : > { %v807_v14 = vor.u32 %v806_v39, %v805_v37  ;;  %vm816_vm4 = vcmp.lt.s32.totalorder %v4415_v63, 3  ;;  %vm713_vm5 = vcmp.lt.s32.totalorder %v4402_v12, 4  ;;  %v1066_v62 = vsub.s32 4294967266, %v1061_v17 }
 0x111   : > { %v1160_v56 = vsub.s32 0, %v4719_v57  ;;  %v790_v6 = vor.u32 8388608, %v789_v53  ;;  %v828_v45 = vsel %vm816_vm4, %v4560_v44, %v827_v52  ;;  %v963_v28 = vadd.s32 127, %v962_v7 }
 0x112   : > { %v1062_v4 = vsub.s32 32, %v1061_v17  ;;  %v635_v60 = vadd.s32 536870912, %v634_v19  ;;  %vm814_vm6 = vcmp.lt.s32.totalorder %v4415_v63, 1  ;;  %vm815_vm7 = vcmp.lt.s32.totalorder %v4415_v63, 2 }
 0x113   : > { %v822_v50 = vsel %vm814_vm6, %v801_v27, %v804_v54  ;;  %v824_v32 = vsel %vm816_vm4, %v807_v14, %v823_v3  ;;  %v826_v25 = vsel %vm814_vm6, %v804_v54, %v807_v14  ;;  %v959_v47 = vshll.u32 %v4500_v11, %v4679_v24 }
 0x114   : > { %v4757_v44 = vsub.s32 %v1258_v51, %v1261_v22  ;;  %v4759_v52 = vshrl.u32 %v635_v60, 30  ;;  %v829_v7 = vsel %vm815_vm7, %v826_v25, %v828_v45  ;;  %v1067_v20 = vadd.s32 127, %v1066_v62 }
 0x115   : > { %v3647_v23 = vmin.u32 %v1160_v56, %v4719_v57  ;;  %v819_v30 = vsel %vm817_vm12, %v807_v14, 2102212464  ;;  %v830_v3 = vshll.u32 %v790_v6, 8  ;;  %v960_v53 = vshrl.u32 %v942_v26, %v958_v41 }
 0x116   : > { %v637_v9 = vshll.u32 %v4759_v52, 30  ;;  %v798_v11 = vshrl.u32 %v6912_v55, %v4440_v10  ;;  %v825_v51 = vsel %vm815_vm7, %v822_v50, %v824_v32  ;;  %v964_v24 = vshll.u32 %v963_v28, 23 }
 0x117   : > { %v1064_v0 = vshrl.u32 %v1046_v40, %v1062_v4  ;;  %v4771_v43 = vmul.u32.u64.low %v830_v3, %v829_v7  ;;  %v4772_v37 = vmul.u32.u64.high %v830_v3, %v829_v7, %v4771_v43  ;;  %v1264_v39 = vsub.s32 0, %v4757_v44 }
 0x118   : > { %v4775_v21 = vsub.s32 %v634_v19, %v637_v9  ;;  %v818_v26 = vsel %vm814_vm6, %v798_v11, %v801_v27  ;;  %v820_v41 = vsel %vm816_vm4, %v804_v54, %v819_v30  ;;  %v1068_v22 = vshll.u32 %v1067_v20, 23  ;;  %v6916_v9 = vld [vmem:[#allocation10_spill] sm:$0xff] }
 0x119   : > { %v1162_v10 = vclz %v3647_v23  ;;  %v4781_v14 = vmul.u32.u64.low %v830_v3, %v825_v51  ;;  %v4782_v62 = vmul.u32.u64.high %v830_v3, %v825_v51, %v4781_v14  ;;  %v709_v40 = vor.u32 %v4462_v29, %v4437_v8 }
 0x11a   : > { %v4790_v19 = vsel %vm713_vm5, %v4557_v42, 920167782  ;;  %v4794_v27 = vor.u32 %v4703_v5, %v4584_v18  ;;  %v640_v54 = vsub.s32 0, %v4775_v21  ;;  %v501_v56 = vor.u32 %v4707_v34, %v4645_v16 }
 0x11b   : > { %v4799_v6 = vor.u32 %v960_v53, %v959_v47  ;;  %v1063_v45 = vshll.u32 %v4570_v31, %v1061_v17  ;;  %v821_v8 = vsel %vm815_vm7, %v818_v26, %v820_v41  ;;  %v4804_v29 = vor.u32 4788187, %v964_v24  ;;  %v6915_v31 = vld [vmem:[#allocation18_spill] sm:$0xff] }
 0x11c   : > { %v3651_v28 = vmin.u32 %v1264_v39, %v4757_v44  ;;  %v3627_v4 = vmin.u32 %v640_v54, %v4775_v21  ;;  %vm839_vm8 = vc.u32 %v4772_v37, %v4781_v14  ;;  %v4812_v5 = vor.u32 4788187, %v1068_v22 }
 0x11d   : > { %v4810_v18 = vor.u32 %v1064_v0, %v1063_v45  ;;  %v3648_v16 = vadd.s32 4294967294, %v1162_v10  ;;  %v840_v34 = vadd.s32 1, %v4782_v62  ;;  %v4817_v63 = vsel %vm713_vm5, %v709_v40, 1326507024 }
 0x11e   : > { %vm505_vm9 = vcmp.lt.s32.totalorder %v6915_v31, 4  ;;  %v642_v17 = vclz %v3627_v4  ;;  %v837_v60 = vmul.u32 %v830_v3, %v821_v8  ;;  %v968_v25 = vcvt.s32.f32 %v4799_v6 }
 0x11f   : > { %v511_v50 = vsel %vm505_vm9, %v4794_v27, 920167782  ;;  %v515_v32 = vsel %vm505_vm9, %v501_v56, 1326507024  ;;  %v841_v47 = vsel %vm839_vm8, %v840_v34, %v4782_v62  ;;  %v966_v7 = vand.u32 2147483647, %v4804_v29 }
 0x120   : > { %v1266_v20 = vclz %v3651_v28  ;;  %v3628_v23 = vadd.s32 4294967294, %v642_v17  ;;  %v842_v30 = vadd.s32 %v841_v47, %v837_v60  ;;  %v1070_v53 = vand.u32 2147483647, %v4812_v5  ;;  %v6917_v5 = vld [vmem:[#allocation11_spill] sm:$0xff] }
 0x121   : > { %v1072_v3 = vcvt.s32.f32 %v4810_v18  ;;  %vm3649_vm10 = vcmp.lt.s32.totalorder %v3648_v16, 0  ;;  %v470_v11 = vand.u32 2147483647, %v6916_v9  ;;  %v488_v24 = vshrl.u32 %v6909_v58, %v4579_v13 }
 0x122   : > { %vm3629_vm11 = vcmp.lt.s32.totalorder %v3628_v23, 0  ;;  %v843_v51 = vadd.s32 536870912, %v842_v30  ;;  %v494_v0 = vshrl.u32 %v6908_v15, %v4579_v13  ;;  %v630_v43 = vadd.s32 %v4697_v48, %v4687_v38 }
 0x123   : > { %v645_v39 = vsel %vm3629_vm11, 0, %v3628_v23  ;;  %v491_v26 = vshrl.u32 %v6910_v59, %v4579_v13  ;;  %v493_v41 = vshll.u32 %v6910_v59, %v4541_v2  ;;  %v3652_v22 = vadd.s32 4294967294, %v1266_v20 }
 0x124   : > { %v646_v10 = vsub.s32 32, %v645_v39  ;;  %v650_v62 = vsub.s32 4294967266, %v645_v39  ;;  %v487_v40 = vshll.u32 %v6912_v55, %v4541_v2  ;;  %v4843_v54 = vshrl.u32 %v843_v51, 30 }
 0x125   : > { %v477_v56 = vand.u32 8388607, %v470_v11  ;;  %v490_v38 = vshll.u32 %v6909_v58, %v4541_v2  ;;  %v495_v48 = vor.u32 %v494_v0, %v493_v41  ;;  %v647_v45 = vshll.u32 %v4775_v21, %v645_v39 }
 0x126   : > { %v648_v8 = vshrl.u32 %v630_v43, %v646_v10  ;;  %v651_v28 = vadd.s32 127, %v650_v62  ;;  %v489_v4 = vor.u32 %v488_v24, %v487_v40  ;;  %v4851_v18 = vsel %vm3649_vm10, 0, %v3648_v16 }
 0x127   : > { %vm576_vm12 = vcmp.lt.s32.totalorder %v6917_v5, 0  ;;  %v660_v34 = vsub.s32 4, %v4759_v52  ;;  %v845_v17 = vshll.u32 %v4843_v54, 30  ;;  %v492_v60 = vor.u32 %v491_v26, %v490_v38  ;;  %v6921_v38 = vld [vmem:[#allocation21_spill] sm:$0xff] }
 0x128   : > { %v649_v47 = vor.u32 %v648_v8, %v647_v45  ;;  %v652_v20 = vshll.u32 %v651_v28, 23  ;;  %v486_v2 = vshrl.u32 %v6912_v55, %v4579_v13  ;;  %v507_v21 = vsel %vm505_vm9, %v495_v48, 2102212464  ;;  %v6922_v45 = vld [vmem:[#allocation20_spill] sm:$0xff] }
 0x129   : > { %vm3653_vm13 = vcmp.lt.s32.totalorder %v3652_v22, 0  ;;  %v4860_v23 = vsub.s32 %v842_v30, %v845_v17  ;;  %v478_v16 = vor.u32 8388608, %v477_v56  ;;  %vm502_vm14 = vcmp.lt.s32.totalorder %v6915_v31, 1 }
 0x12a   : > { %v6918_v51 = vand.u32 2147483647, %v6917_v5  ;;  %v653_v0 = vor.u32 4788187, %v652_v20  ;;  %vm503_vm0 = vcmp.lt.s32.totalorder %v6915_v31, 2  ;;  %vm504_vm1 = vcmp.lt.s32.totalorder %v6915_v31, 3 }
 0x12b   : > { %v506_v13 = vsel %vm502_vm14, %v486_v2, %v489_v4  ;;  %v848_v43 = vsub.s32 0, %v4860_v23  ;;  %v508_v39 = vsel %vm504_vm1, %v492_v60, %v507_v21  ;;  %v510_v30 = vsel %vm502_vm14, %v489_v4, %v492_v60 }
 0x12c   : > { %vm4865_vm15 = vcmp.le.f32.partialorder %v6918_v51, 0.7853982  ;;  %v512_v26 = vsel %vm504_vm1, %v495_v48, %v511_v50  ;;  %v654_v41 = vand.u32 2147483647, %v653_v0  ;;  %v656_v10 = vcvt.s32.f32 %v649_v47 }
 0x12d   : > { %v514_v62 = vsel %vm502_vm14, %v492_v60, %v495_v48  ;;  %v516_v40 = vsel %vm504_vm1, %v4794_v27, %v515_v32  ;;  %v4873_v56 = vmul.f32 %v1072_v3, %v1070_v53  ;;  %v4877_v8 = vadd.s32 %v6922_v45, %v6921_v38  ;;  %v6923_v3 = vld [vmem:[#allocation9_spill] sm:$0xff] }
 0x12e   : > { %v3635_v28 = vmin.u32 %v848_v43, %v4860_v23  ;;  %v517_v17 = vsel %vm503_vm0, %v514_v62, %v516_v40  ;;  %v4883_v20 = vsel %vm3653_vm13, 0, %v3652_v22  ;;  %v657_v50 = vmul.f32 %v656_v10, %v654_v41  ;;  %v6925_v40 = vld [vmem:[#allocation15_spill] sm:$0xff] }
 0x12f   : > { %v513_v48 = vsel %vm503_vm0, %v510_v30, %v512_v26  ;;  %v518_v4 = vshll.u32 %v478_v16, 8  ;;  %v1170_v27 = vsub.s32 4294967266, %v4851_v18  ;;  %v509_v53 = vsel %vm503_vm0, %v506_v13, %v508_v39  ;;  %v6924_v26 = vld [vmem:[#allocation16_spill] sm:$0xff] }
 0x130   : > { %v850_v32 = vclz %v3635_v28  ;;  %v678_v60 = vand.u32 2147483647, %v6923_v3  ;;  %v658_v47 = vxor.u32 2147483648, %v657_v50  ;;  %v4894_v2 = vsel %vm576_vm12, %v660_v34, %v4759_v52 }
 0x131   : > { %v4896_v22 = vmul.u32.u64.low %v518_v4, %v517_v17  ;;  %v4897_v21 = vmul.u32.u64.high %v518_v4, %v517_v17, %v4896_v22  ;;  %v1274_v51 = vsub.s32 4294967266, %v4883_v20  ;;  %v838_v13 = vadd.s32 %v4781_v14, %v4772_v37 }
 0x132   : > { %v3636_v16 = vadd.s32 4294967294, %v850_v32  ;;  %v4900_v0 = vmul.u32.u64.low %v518_v4, %v513_v48  ;;  %v4901_v43 = vmul.u32.u64.high %v518_v4, %v513_v48, %v4900_v0  ;;  %v659_v31 = vsel %vm576_vm12, %v658_v47, %v657_v50 }
 0x133   : > { %v868_v39 = vsub.s32 4, %v4843_v54  ;;  %v525_v52 = vmul.u32 %v518_v4, %v509_v53  ;;  %v662_v34 = vsel %vm4865_vm15, %v6917_v5, %v659_v31  ;;  %v685_v30 = vand.u32 8388607, %v678_v60 }
 0x134   : > { %vm3637_vm2 = vcmp.lt.s32.totalorder %v3636_v16, 0  ;;  %v696_v41 = vshrl.u32 %v6909_v58, %v6924_v26  ;;  %v694_v62 = vshrl.u32 %v6912_v55, %v6924_v26  ;;  %v695_v37 = vshll.u32 %v6912_v55, %v6925_v40 }
 0x135   : > { %v853_v10 = vsel %vm3637_vm2, 0, %v3636_v16  ;;  %v698_v14 = vshll.u32 %v6909_v58, %v6925_v40  ;;  %3924 = vcosq.f32 %v662_v34  ;;  %vm527_vm3 = vc.u32 %v4897_v21, %v4900_v0 }
 0x136   : > { %v854_v38 = vsub.s32 32, %v853_v10  ;;  %v858_v45 = vsub.s32 4294967266, %v853_v10  ;;  %v855_v28 = vshll.u32 %v4860_v23, %v853_v10  ;;  %v528_v17 = vadd.s32 1, %v4901_v43 }
 0x137   : > { %v697_v50 = vor.u32 %v696_v41, %v695_v37  ;;  %v699_v48 = vshrl.u32 %v6910_v59, %v6924_v26  ;;  %v701_v53 = vshll.u32 %v6910_v59, %v6925_v40  ;;  %v702_v47 = vshrl.u32 %v6908_v15, %v6924_v26 }
 0x138   : > { %v856_v4 = vshrl.u32 %v838_v13, %v854_v38  ;;  %v859_v32 = vadd.s32 127, %v858_v45  ;;  %v529_v22 = vsel %vm527_vm3, %v528_v17, %v4901_v43  ;;  %v686_v16 = vor.u32 8388608, %v685_v30 }
 0x139   : > { %v700_v31 = vor.u32 %v699_v48, %v698_v14  ;;  %vm710_vm4 = vcmp.lt.s32.totalorder %v4402_v12, 1  ;;  %vm784_vm6 = vcmp.lt.s32.totalorder %v4275_v61, 0  ;;  %v530_v10 = vadd.s32 %v529_v22, %v525_v52 }
 0x13a   : > { %v857_v23 = vor.u32 %v856_v4, %v855_v28  ;;  %v860_v41 = vshll.u32 %v859_v32, 23  ;;  %v703_v37 = vor.u32 %v702_v47, %v701_v53  ;;  %3926 = vsinq.f32 %v662_v34 }
 0x13b   : > { %vm711_vm7 = vcmp.lt.s32.totalorder %v4402_v12, 2  ;;  %vm712_vm8 = vcmp.lt.s32.totalorder %v4402_v12, 3  ;;  %v718_v13 = vsel %vm710_vm4, %v697_v50, %v700_v31  ;;  %v6926_v43 = vand.u32 2147483647, %v4275_v61 }
 0x13c   : > { %v861_v26 = vor.u32 4788187, %v860_v41  ;;  %v531_v40 = vadd.s32 536870912, %v530_v10  ;;  %v714_v52 = vsel %vm710_vm4, %v694_v62, %v697_v50  ;;  %v715_v34 = vsel %vm713_vm5, %v703_v37, 2102212464 }
 0x13d   : > { %vm4941_vm9 = vcmp.le.f32.partialorder %v6926_v43, 0.7853982  ;;  %v720_v14 = vsel %vm712_vm8, %v703_v37, %v4790_v19  ;;  %v722_v38 = vsel %vm710_vm4, %v700_v31, %v703_v37  ;;  %v724_v45 = vsel %vm712_vm8, %v4557_v42, %v4817_v63 }
 0x13e   : > { %v726_v28 = vshll.u32 %v686_v16, 8  ;;  %v862_v17 = vand.u32 2147483647, %v861_v26  ;;  %v864_v48 = vcvt.s32.f32 %v857_v23  ;;  %v4954_v4 = vshrl.u32 %v531_v40, 30  ;;  %v6929_v23 = vld [vmem:[#allocation12_spill] sm:$0xff] }
 0x13f   : > { %v721_v32 = vsel %vm711_vm7, %v718_v13, %v720_v14  ;;  %v716_v62 = vsel %vm712_vm8, %v700_v31, %v715_v34  ;;  %v725_v50 = vsel %vm711_vm7, %v722_v38, %v724_v45  ;;  %v4964_v47 = vpop.eup %3924  ;;  %v1074_v42 = vxor.u32 2147483648, %v4873_v56 }
 0x140   : > { %v4960_v53 = vmul.u32.u64.low %v726_v28, %v721_v32  ;;  %v4961_v19 = vmul.u32.u64.high %v726_v28, %v721_v32, %v4960_v53  ;;  %v1275_v63 = vadd.s32 127, %v1274_v51  ;;  %v865_v22 = vmul.f32 %v864_v48, %v862_v17 }
 0x141   : > { %v533_v16 = vshll.u32 %v4954_v4, 30  ;;  %vm992_vm5 = vcmp.lt.s32.totalorder %v6929_v23, 0  ;;  %v1166_v41 = vsub.s32 32, %v4851_v18  ;;  %v663_v31 = vsel %vm4865_vm15, 0, %v4894_v2 }
 0x142   : > { %v4973_v37 = vmul.u32.u64.low %v726_v28, %v725_v50  ;;  %v4974_v13 = vmul.u32.u64.high %v726_v28, %v725_v50, %v4973_v37  ;;  %v1254_v43 = vadd.s32 %v4632_v49, %v4641_v35  ;;  %v866_v26 = vxor.u32 2147483648, %v865_v22 }
 0x143   : > { %v4978_v40 = vsub.s32 %v530_v10, %v533_v16  ;;  %v717_v51 = vsel %vm711_vm7, %v714_v52, %v716_v62  ;;  %v1171_v34 = vadd.s32 127, %v1170_v27  ;;  %v1270_v14 = vsub.s32 32, %v4883_v20 }
 0x144   : > { %v869_v24 = vsel %vm784_vm6, %v868_v39, %v4843_v54  ;;  %v736_v2 = vadd.s32 1, %v4961_v19  ;;  %v1276_v49 = vshll.u32 %v1275_v63, 23  ;;  %v667_v35 = vadd.s32 3, %v663_v31  ;;  %v3927_v52 = vpop.eup %3926 }
 0x145   : > { %v867_v10 = vsel %vm784_vm6, %v866_v26, %v865_v22  ;;  %v536_v12 = vsub.s32 0, %v4978_v40  ;;  %v1168_v27 = vshrl.u32 %v4877_v8, %v1166_v41  ;;  %v733_v45 = vmul.u32 %v726_v28, %v717_v51 }
 0x146   : > { %v870_v38 = vsel %vm4941_vm9, %v4275_v61, %v867_v10  ;;  %vm735_vm10 = vc.u32 %v4974_v13, %v4960_v53  ;;  %v871_v54 = vsel %vm4941_vm9, 0, %v869_v24  ;;  %v1172_v48 = vshll.u32 %v1171_v34, 23  ;;  %v6930_v10 = vld [vmem:[#allocation8_spill] sm:$0xff] }
 0x147   : > { %3928 = vcosq.f32 %v870_v38  ;;  %v3623_v39 = vmin.u32 %v536_v12, %v4978_v40  ;;  %v737_v17 = vsel %vm735_vm10, %v736_v2, %v4961_v19  ;;  %v1272_v32 = vshrl.u32 %v1254_v43, %v1270_v14 }
 0x148   : > { %3930 = vsinq.f32 %v870_v38  ;;  %v738_v8 = vadd.s32 %v737_v17, %v733_v45  ;;  %v5008_v28 = vmul.f32 %v968_v25, %v966_v7  ;;  %v1277_v62 = vor.u32 4788187, %v1276_v49 }
 0x149   : > { %v668_v50 = vand.u32 3, %v667_v35  ;;  %v538_v63 = vclz %v3623_v39  ;;  %v1167_v30 = vshll.u32 %v4719_v57, %v4851_v18  ;;  %v1271_v22 = vshll.u32 %v4757_v44, %v4883_v20 }
 0x14a   : > { %v875_v19 = vadd.s32 3, %v871_v54  ;;  %v739_v16 = vadd.s32 536870912, %v738_v8  ;;  %v1075_v41 = vsel %vm992_vm5, %v1074_v42, %v4873_v56  ;;  %v671_v29 = vxor.u32 2147483648, %v3927_v52 }
 0x14b   : > { %v674_v6 = vxor.u32 2147483648, %v4964_v47  ;;  %v3624_v25 = vadd.s32 4294967294, %v538_v63  ;;  %v1169_v7 = vor.u32 %v1168_v27, %v1167_v30  ;;  %v1173_v31 = vor.u32 4788187, %v1172_v48 }
 0x14c   : > { %v1273_v37 = vor.u32 %v1272_v32, %v1271_v22  ;;  %vm666_vm11 = vweird.f32 %v6917_v5  ;;  %v5019_v43 = vshrl.u32 %v739_v16, 30  ;;  %v1278_v57 = vand.u32 2147483647, %v1277_v62 }
 0x14d   : > { %vm670_vm12 = vcmp.eq.s32.totalorder %v668_v50, 0  ;;  %vm673_vm13 = vcmp.eq.s32.totalorder %v668_v50, 2  ;;  %vm3625_vm14 = vcmp.lt.s32.totalorder %v3624_v25, 0  ;;  %vm874_vm15 = vweird.f32 %v4275_v61 }
 0x14e   : > { %v876_v44 = vand.u32 3, %v875_v19  ;;  %v526_v18 = vadd.s32 %v4900_v0, %v4897_v21  ;;  %v541_v56 = vsel %vm3625_vm14, 0, %v3624_v25  ;;  %v741_v20 = vshll.u32 %v5019_v43, 30 }
 0x14f   : > { %v672_v42 = vsel %vm670_vm12, %v4964_v47, %v671_v29  ;;  %v675_v26 = vsel %vm673_vm13, %v674_v6, %v3927_v52  ;;  %v542_v51 = vsub.s32 32, %v541_v56  ;;  %v546_v34 = vsub.s32 4294967266, %v541_v56 }
 0x150   : > { %v1174_v14 = vand.u32 2147483647, %v1173_v31  ;;  %v1176_v24 = vcvt.s32.f32 %v1169_v7  ;;  %v1280_v2 = vcvt.s32.f32 %v1273_v37  ;;  %v5026_v49 = vsub.s32 %v738_v8, %v741_v20  ;;  %v6938_v20 = vld [vmem:[#allocation14_spill] sm:$0xff] }
 0x151   : > { %v3929_v35 = vpop.eup %3928  ;;  %vm888_vm0 = vcmp.lt.s32.totalorder %v6930_v10, 0  ;;  %vm669_vm1 = vcmp.lt.s32.totalorder %v668_v50, 2  ;;  %v543_v12 = vshll.u32 %v4978_v40, %v541_v56  ;;  %v544_v21 = vshrl.u32 %v526_v18, %v542_v51  ;;  %v6937_v18 = vld [vmem:[#allocation13_spill] sm:$0xff] }
 0x152   : > { %v547_v0 = vadd.s32 127, %v546_v34  ;;  %v3931_v27 = vpop.eup %3930  ;;  %v1281_v38 = vmul.f32 %v1280_v2, %v1278_v57  ;;  %v676_v45 = vsel %vm669_vm1, %v672_v42, %v675_v26  ;;  %v882_v47 = vxor.u32 2147483648, %v3929_v35 }
 0x153   : > { %v744_v52 = vsub.s32 0, %v5026_v49  ;;  %v879_v54 = vxor.u32 2147483648, %v3931_v27  ;;  %vm881_vm2 = vcmp.eq.s32.totalorder %v876_v44, 2  ;;  %v545_v39 = vor.u32 %v544_v21, %v543_v12 }
 0x154   : > { %v548_v17 = vshll.u32 %v547_v0, 23  ;;  %v1177_v48 = vmul.f32 %v1176_v24, %v1174_v14  ;;  %vm878_vm3 = vcmp.eq.s32.totalorder %v876_v44, 0  ;;  %v883_v32 = vsel %vm881_vm2, %v882_v47, %v3931_v27 }
 0x155   : > { %v3631_v8 = vmin.u32 %v744_v52, %v5026_v49  ;;  %v677_v40 = vsel %vm666_vm11, nan, %v676_v45  ;;  %vm877_vm4 = vcmp.lt.s32.totalorder %v876_v44, 2  ;;  %v880_v62 = vsel %vm878_vm3, %v3929_v35, %v879_v54 }
 0x156   : > { %v549_v50 = vor.u32 4788187, %v548_v17  ;;  %v970_v63 = vxor.u32 2147483648, %v5008_v28  ;;  %v1282_v30 = vxor.u32 2147483648, %v1281_v38  ;;  %v884_v22 = vsel %vm877_vm4, %v880_v62, %v883_v32 }
 0x157   : > { %v746_v19 = vclz %v3631_v8  ;;  %v6931_v16 = vand.u32 2147483647, %v6929_v23  ;;  %v885_v6 = vsel %vm874_vm15, nan, %v884_v22  ;;  %v552_v5 = vcvt.s32.f32 %v545_v39 }
 0x158   : > { %v550_v25 = vand.u32 2147483647, %v549_v50  ;;  %v6934_v7 = vand.u32 2147483647, %v6930_v10  ;;  %v3741_v57 = vpack.c.bf16 %v885_v6, %v677_v40  ;;  %vm1096_vm8 = vcmp.lt.s32.totalorder %v6937_v18, 0 }
 0x159   : > { %vm5037_vm6 = vcmp.le.f32.partialorder %v6931_v16, 0.7853982  ;;  %v3632_v44 = vadd.s32 4294967294, %v746_v19  ;;  %v1178_v56 = vxor.u32 2147483648, %v1177_v48  ;;  %vm1200_vm9 = vcmp.lt.s32.totalorder %v6938_v20, 0 }
 0x15a   : > { %vm5045_vm7 = vcmp.le.f32.partialorder %v6934_v7, 0.7853982  ;;  %v1078_v37 = vsel %vm5037_vm6, %v6929_v23, %v1075_v41  ;;  %v553_v61 = vmul.f32 %v552_v5, %v550_v25  ;;  %v971_v42 = vsel %vm888_vm0, %v970_v63, %v5008_v28  ;;  %3742 = vmatprep.subr.bf16.mxu0 %v3741_v57  ;;  %v6948_v7 = vld [vmem:[#allocation17_spill] sm:$0xff] }
 0x15b   : > { %v6939_v26 = vand.u32 2147483647, %v6938_v20  ;;  %v1283_v41 = vsel %vm1200_vm9, %v1282_v30, %v1281_v38  ;;  %vm3633_vm11 = vcmp.lt.s32.totalorder %v3632_v44, 0  ;;  %3932 = vcosq.f32 %v1078_v37 }
 0x15c   : > { %v554_v34 = vxor.u32 2147483648, %v553_v61  ;;  %v556_v14 = vsub.s32 4, %v4954_v4  ;;  %v749_v24 = vsel %vm3633_vm11, 0, %v3632_v44  ;;  %vm472_vm12 = vcmp.lt.s32.totalorder %v6916_v9, 0 }
 0x15d   : > { %vm5059_vm10 = vcmp.le.f32.partialorder %v6939_v26, 0.7853982  ;;  %v734_v28 = vadd.s32 %v4960_v53, %v4974_v13  ;;  %v750_v2 = vsub.s32 32, %v749_v24  ;;  %v754_v35 = vsub.s32 4294967266, %v749_v24  ;;  %v6944_v13 = vld [vmem:[#allocation19_spill] sm:$0xff] }
 0x15e   : > { %v1179_v12 = vsel %vm1096_vm8, %v1178_v56, %v1177_v48  ;;  %v1286_v21 = vsel %vm5059_vm10, %v6938_v20, %v1283_v41  ;;  %vm5076_vm13 = vcmp.le.f32.partialorder %v470_v11, 0.7853982  ;;  %v555_v27 = vsel %vm472_vm12, %v554_v34, %v553_v61 }
 0x15f   : > { %v751_v38 = vshll.u32 %v5026_v49, %v749_v24  ;;  %v752_v45 = vshrl.u32 %v734_v28, %v750_v2  ;;  %v755_v53 = vadd.s32 127, %v754_v35  ;;  %v1076_v47 = vsub.s32 4, %v6944_v13 }
 0x160   : > { %3934 = vsinq.f32 %v1078_v37  ;;  %v6945_v52 = vand.u32 2147483647, %v6937_v18  ;;  %v557_v39 = vsel %vm472_vm12, %v556_v14, %v4954_v4  ;;  %v558_v11 = vsel %vm5076_vm13, %v6916_v9, %v555_v27 }
 0x161   : > { %3936 = vcosq.f32 %v1286_v21  ;;  %v753_v17 = vor.u32 %v752_v45, %v751_v38  ;;  %v756_v49 = vshll.u32 %v755_v53, 23  ;;  %v1284_v48 = vsub.s32 4, %v4721_v36 }
 0x162   : > { %vm5084_vm14 = vcmp.le.f32.partialorder %v6945_v52, 0.7853982  ;;  %v974_v32 = vsel %vm5045_vm7, %v6930_v10, %v971_v42  ;;  %3938 = vsinq.f32 %v1286_v21  ;;  %v559_v4 = vsel %vm5076_vm13, 0, %v557_v39 }
 0x163   : > { %v1182_v8 = vsel %vm5084_vm14, %v6937_v18, %v1179_v12  ;;  %3940 = vcosq.f32 %v558_v11  ;;  %v757_v40 = vor.u32 4788187, %v756_v49  ;;  %v1077_v62 = vsel %vm992_vm5, %v1076_v47, %v6944_v13 }
 0x164   : > { %3942 = vsinq.f32 %v558_v11  ;;  %v764_v50 = vsub.s32 4, %v5019_v43  ;;  %v1180_v63 = vsub.s32 4, %v4656_v33  ;;  %v760_v22 = vcvt.s32.f32 %v753_v17 }
 0x165   : > { %3944 = vcosq.f32 %v1182_v8  ;;  %v758_v30 = vand.u32 2147483647, %v757_v40  ;;  %v1285_v19 = vsel %vm1200_vm9, %v1284_v48, %v4721_v36  ;;  %v6845_v16 = vmov 0.0   ;;  %v3933_v6 = vpop.eup %3932 }
 0x166   : > { %1407 = vmatprep.mubr.f32.mxu0 %v6845_v16  ;;  %2368 = vmatprep.mubr.f32.mxu1 %v6845_v16  ;;  %3946 = vsinq.f32 %v1182_v8  ;;  %v563_v25 = vadd.s32 3, %v559_v4  ;;  %v1079_v5 = vsel %vm5037_vm6, 0, %v1077_v62  ;;  %v972_v37 = vsub.s32 4, %v6948_v7 }
 0x167   : > { %3948 = vcosq.f32 %v974_v32  ;;  %vm680_vm5 = vcmp.lt.s32.totalorder %v6923_v3, 0  ;;  %v761_v57 = vmul.f32 %v760_v22, %v758_v30  ;;  %v1287_v44 = vsel %vm5059_vm10, 0, %v1285_v19 }
 0x168   : > { %3950 = vsinq.f32 %v974_v32  ;;  %v765_v36 = vsel %vm680_vm5, %v764_v50, %v5019_v43  ;;  %v1181_v56 = vsel %vm1096_vm8, %v1180_v63, %v4656_v33  ;;  %v1083_v42 = vadd.s32 3, %v1079_v5 }
 0x169   : > { %v762_v61 = vxor.u32 2147483648, %v761_v57  ;;  %v5121_v26 = vand.u32 3, %v563_v25  ;;  %vm5125_vm15 = vcmp.le.f32.partialorder %v678_v60, 0.7853982  ;;  %v973_v43 = vsel %vm888_vm0, %v972_v37, %v6948_v7 }
 0x16a   : > { %v3935_v29 = vpop.eup %3934  ;;  %v767_v33 = vsel %vm5125_vm15, 0, %v765_v36  ;;  %v1291_v14 = vadd.s32 3, %v1287_v44  ;;  %v1183_v24 = vsel %vm5084_vm14, 0, %v1181_v56  ;;  %v1084_v35 = vand.u32 3, %v1083_v42 }
 0x16b   : > { %v3937_v51 = vpop.eup %3936  ;;  %v763_v34 = vsel %vm680_vm5, %v762_v61, %v761_v57  ;;  %v1087_v12 = vxor.u32 2147483648, %v3935_v29  ;;  %v975_v21 = vsel %vm5045_vm7, 0, %v973_v43  ;;  %v771_v27 = vadd.s32 3, %v767_v33 }
 0x16c   : > { %v3939_v28 = vpop.eup %3938  ;;  %v766_v60 = vsel %vm5125_vm15, %v6923_v3, %v763_v34  ;;  %v1090_v38 = vxor.u32 2147483648, %v3933_v6  ;;  %v1187_v45 = vadd.s32 3, %v1183_v24  ;;  %vm565_vm0 = vcmp.lt.s32.totalorder %v5121_v26, 2 }
 0x16d   : > { %v3941_v2 = vpop.eup %3940  ;;  %3952 = vcosq.f32 %v766_v60  ;;  %vm566_vm1 = vcmp.eq.s32.totalorder %v5121_v26, 0  ;;  %v1292_v13 = vand.u32 3, %v1291_v14  ;;  %vm569_vm2 = vcmp.eq.s32.totalorder %v5121_v26, 2 }
 0x16e   : > { %v3943_v0 = vpop.eup %3942  ;;  %3954 = vsinq.f32 %v766_v60  ;;  %v1295_v52 = vxor.u32 2147483648, %v3939_v28  ;;  %v1298_v54 = vxor.u32 2147483648, %v3937_v51  ;;  %v979_v39 = vadd.s32 3, %v975_v21  ;;  %v1313_v21 = vpop.permute.xlu0 %1312 }
 0x16f   : > { %v3945_v53 = vpop.eup %3944  ;;  %v567_v31 = vxor.u32 2147483648, %v3943_v0  ;;  %v570_v17 = vxor.u32 2147483648, %v3941_v2  ;;  %vm1086_vm3 = vcmp.eq.s32.totalorder %v1084_v35, 0  ;;  %vm1089_vm4 = vcmp.eq.s32.totalorder %v1084_v35, 2 }
 0x170   : > { %v3947_v47 = vpop.eup %3946  ;;  %vm1290_vm6 = vweird.f32 %v6938_v20  ;;  %vm562_vm7 = vweird.f32 %v6916_v9  ;;  %v772_v48 = vand.u32 3, %v771_v27  ;;  %v1088_v32 = vsel %vm1086_vm3, %v3933_v6, %v1087_v12 }
 0x171   : > { %v3949_v11 = vpop.eup %3948  ;;  %v1091_v8 = vsel %vm1089_vm4, %v1090_v38, %v3935_v29  ;;  %v1188_v4 = vand.u32 3, %v1187_v45  ;;  %vm1082_vm8 = vweird.f32 %v6929_v23  ;;  %vm1294_vm9 = vcmp.eq.s32.totalorder %v1292_v13, 0  ;;  %v1302_v23 = vld [vmem:[%s6793_s3] sm:$0xff] }
 0x172   : > { %v3951_v49 = vpop.eup %3950  ;;  %vm1297_vm10 = vcmp.eq.s32.totalorder %v1292_v13, 2  ;;  %v1191_v40 = vxor.u32 2147483648, %v3947_v47  ;;  %v1194_v62 = vxor.u32 2147483648, %v3945_v53  ;;  %vm770_vm11 = vweird.f32 %v6923_v3  ;;  %v1303_v3 = vld [vmem:[%s6793_s3 + $0x8] sm:$0xff] }
 0x173   : > { %vm1085_vm12 = vcmp.lt.s32.totalorder %v1084_v35, 2  ;;  %v1296_v50 = vsel %vm1294_vm9, %v3937_v51, %v1295_v52  ;;  %v1299_v63 = vsel %vm1297_vm10, %v1298_v54, %v3939_v28  ;;  %v980_v30 = vand.u32 3, %v979_v39 }
 0x174   : > { %v568_v22 = vsel %vm566_vm1, %v3941_v2, %v567_v31  ;;  %v571_v19 = vsel %vm569_vm2, %v570_v17, %v3943_v0  ;;  %v983_v6 = vxor.u32 2147483648, %v3951_v49  ;;  %v986_v25 = vxor.u32 2147483648, %v3949_v11 }
 0x175   : > { %v1092_v5 = vsel %vm1085_vm12, %v1088_v32, %v1091_v8  ;;  %vm1293_vm13 = vcmp.lt.s32.totalorder %v1292_v13, 2  ;;  %vm1190_vm14 = vcmp.eq.s32.totalorder %v1188_v4, 0  ;;  %vm1193_vm5 = vcmp.eq.s32.totalorder %v1188_v4, 2 }
 0x176   : > { %vm777_vm15 = vcmp.eq.s32.totalorder %v772_v48, 2  ;;  %v1300_v37 = vsel %vm1293_vm13, %v1296_v50, %v1299_v63  ;;  %v1192_v57 = vsel %vm1190_vm14, %v3945_v53, %v1191_v40  ;;  %v1195_v36 = vsel %vm1193_vm5, %v1194_v62, %v3947_v47  ;;  %v1318_v53 = vpop.permute.xlu1 %1317 }
 0x177   : > { %v3953_v7 = vpop.eup %3952  ;;  %v572_v56 = vsel %vm565_vm0, %v568_v22, %v571_v19  ;;  %vm982_vm1 = vcmp.eq.s32.totalorder %v980_v30, 0  ;;  %vm985_vm3 = vcmp.eq.s32.totalorder %v980_v30, 2  ;;  %vm1189_vm2 = vcmp.lt.s32.totalorder %v1188_v4, 2 }
 0x178   : > { %v3955_v44 = vpop.eup %3954  ;;  %v778_v61 = vxor.u32 2147483648, %v3953_v7  ;;  %v984_v29 = vsel %vm982_vm1, %v3949_v11, %v983_v6  ;;  %v987_v41 = vsel %vm985_vm3, %v986_v25, %v3951_v49  ;;  %vm774_vm4 = vcmp.eq.s32.totalorder %v772_v48, 0 }
 0x179   : > { %v775_v42 = vxor.u32 2147483648, %v3955_v44  ;;  %v1301_v51 = vsel %vm1290_vm6, nan, %v1300_v37  ;;  %v1196_v34 = vsel %vm1189_vm2, %v1192_v57, %v1195_v36  ;;  %v573_v33 = vsel %vm562_vm7, nan, %v572_v56 }
 0x17a   : > { %v779_v43 = vsel %vm777_vm15, %v778_v61, %v3955_v44  ;;  %vm773_vm9 = vcmp.lt.s32.totalorder %v772_v48, 2  ;;  %vm981_vm10 = vcmp.lt.s32.totalorder %v980_v30, 2  ;;  %v1093_v24 = vsel %vm1082_vm8, nan, %v1092_v5 }
 0x17b   : > { %v776_v14 = vsel %vm774_vm4, %v3953_v7, %v775_v42  ;;  %v988_v28 = vsel %vm981_vm10, %v984_v29, %v987_v41  ;;  %vm1186_vm0 = vweird.f32 %v6937_v18  ;;  %v3745_v2 = vpack.c.bf16 %v1301_v51, %v1093_v24  ;;  %v1305_v18 = vld [vmem:[%s6793_s3 + $0x18] sm:$0xff] }
 0x17c   : > { %v780_v26 = vsel %vm773_vm9, %v776_v14, %v779_v43  ;;  %v1197_v20 = vsel %vm1186_vm0, nan, %v1196_v34  ;;  %vm978_vm6 = vweird.f32 %v6930_v10  ;;  %vm6883_vm7 = vcmask 261120   ;;  %v1304_v10 = vld [vmem:[%s6793_s3 + $0x10] sm:$0xff] }
 0x17d   : > { %v781_v60 = vsel %vm770_vm11, nan, %v780_v26  ;;  %v989_v9 = vsel %vm978_vm6, nan, %v988_v28 }
 0x17e   : > { %v3743_v35 = vpack.c.bf16 %v781_v60, %v573_v33  ;;  %v3747_v12 = vpack.c.bf16 %v1197_v20, %v989_v9 }
 0x180   : > { %3744 = vmatpush1.bf16.msra.mxu0 %v3743_v35 }
 0x181   : > { %3746 = vmatprep.subr.bf16.mxu0 %v3745_v2 }
 0x184   : > { %3748 = vmatpush1.bf16.msra.mxu0 %v3747_v12 }
 0x187   : > { %3654 = vmatmul.mubr.msk.f32.vlgmr.msra.gmra.mrb[0].mxu0 %vm6883_vm7, %v1302_v23 }
 0x188   : > { %1413 = vmatprep.mubr.f32.mxu0 %v6845_v16 }
 0x18b   : > { %3655 = vmatmul.mubr.msk.f32.gmra.mrb[2].mxu0 %vm6883_vm7, %v1303_v3 }
 0x18c   : > { %1419 = vmatprep.mubr.f32.mxu0 %v6845_v16 }
 0x18f   : > { %3656 = vmatmul.mubr.msk.f32.gmra.mrb[4].mxu0 %vm6883_vm7, %v1304_v10 }
 0x190   : > { %1425 = vmatprep.mubr.f32.mxu0 %v6845_v16 }
 0x193   : > { %3657 = vmatmul.mubr.msk.f32.gmra.mrb[6].mxu0 %vm6883_vm7, %v1305_v18 }
 0x194   : > { %3303 = vmatprep.mubr.f32.mxu0 %v6845_v16 }
 0x25a   : > { %v1409_v0 = vpop.f32.mrb[0].mxu0 }
 0x25b   : > { %v5184_v27 = vadd.f32 %v1409_v0, %v1313_v21  ;;  %v1411_v38 = vpop.f32.mrb[1].mxu0 }
 0x25c   : > { %v5195_v32 = vadd.f32 %v1411_v38, %v1313_v21 }
 0x25d   : > { %6951 = vst [vmem:[#allocation18_spill] sm:$0xff] %v5184_v27  ;;  %v1435_v45 = vand.u32 2139095040, %v5184_v27  ;;  %v6849_v48 = vand.u32 2147483647, %v5184_v27 }
 0x25e   : > { %v1415_v13 = vpop.f32.mrb[2].mxu0  ;;  %6953 = vst [vmem:[#allocation11_spill] sm:$0xff] %v5195_v32  ;;  %v1539_v22 = vand.u32 2139095040, %v5195_v32 }
 0x25f   : > { %v1436_v47 = vshrl.u32 %v1435_v45, 23  ;;  %v5187_v52 = vadd.f32 %v1415_v13, %v1318_v53  ;;  %v1417_v54 = vpop.f32.mrb[3].mxu0  ;;  %v1439_v63 = vand.u32 8388607, %v6849_v48 }
 0x260   : > { %v1540_v24 = vshrl.u32 %v1539_v22, 23  ;;  %v5229_v13 = vadd.f32 %v1417_v54, %v1318_v53 }
 0x261   : > { %6952 = vst [vmem:[#allocation10_spill] sm:$0xff] %v5187_v52  ;;  %v3658_v39 = vadd.s32 4294967169, %v1436_v47  ;;  %v1643_v11 = vand.u32 2139095040, %v5187_v52  ;;  %v1440_v29 = vor.u32 8388608, %v1439_v63  ;;  %v6847_v45 = vand.u32 2147483647, %v5187_v52 }
 0x262   : > { %v5190_v31 = vpop.f32.mrb[4].mxu0  ;;  %v1747_v53 = vand.u32 2139095040, %v5229_v13 }
 0x263   : > { %v1442_v17 = vadd.s32 1, %v3658_v39  ;;  %v5192_v49 = vpop.f32.mrb[5].mxu0  ;;  %v1644_v4 = vshrl.u32 %v1643_v11, 23  ;;  %v1480_v9 = vshll.u32 %v1440_v29, 8  ;;  %v1647_v63 = vand.u32 8388607, %v6847_v45 }
 0x265   : > { %vm1443_vm8 = vcmp.gt.s32.totalorder %v1442_v17, 0  ;;  %v3666_v5 = vadd.s32 4294967169, %v1644_v4  ;;  %v3662_v4 = vadd.s32 4294967169, %v1540_v24 }
 0x266   : > { %v1444_v8 = vsel %vm1443_vm8, %v1442_v17, 0  ;;  %v5197_v40 = vpop.f32.mrb[6].mxu0 }
 0x267   : > { %v1446_v62 = vand.u32 31, %v1444_v8  ;;  %v5199_v50 = vpop.f32.mrb[7].mxu0  ;;  %v1445_v19 = vshrl.u32 %v1444_v8, 5  ;;  %v1650_v2 = vadd.s32 1, %v3666_v5 }
 0x269   : > { %v1447_v30 = vsub.s32 32, %v1446_v62  ;;  %v1449_v6 = vshll.u32 %v6912_v55, %v1446_v62  ;;  %v1452_v25 = vshll.u32 %v6909_v58, %v1446_v62  ;;  %v1455_v57 = vshll.u32 %v6910_v59, %v1446_v62 }
 0x26a   : > { %v1458_v44 = vshll.u32 %v6908_v15, %v1446_v62  ;;  %v1461_v61 = vshll.u32 %v6907_v46, %v1446_v62  ;;  %vm1464_vm11 = vcmp.lt.s32.totalorder %v1445_v19, 1  ;;  %vm1467_vm12 = vcmp.lt.s32.totalorder %v1445_v19, 4 }
 0x26b   : > { %v1450_v7 = vshrl.u32 %v6909_v58, %v1447_v30  ;;  %v1453_v37 = vshrl.u32 %v6910_v59, %v1447_v30  ;;  %v1456_v36 = vshrl.u32 %v6908_v15, %v1447_v30  ;;  %v1459_v56 = vshrl.u32 %v6907_v46, %v1447_v30 }
 0x26c   : > { %v1462_v42 = vshrl.u32 %v6911_v1, %v1447_v30  ;;  %vm1466_vm13 = vcmp.lt.s32.totalorder %v1445_v19, 3  ;;  %vm1465_vm14 = vcmp.lt.s32.totalorder %v1445_v19, 2  ;;  %v1448_v12 = vshrl.u32 %v6912_v55, %v1447_v30 }
 0x26d   : > { %v1451_v41 = vor.u32 %v1450_v7, %v1449_v6  ;;  %v1454_v43 = vor.u32 %v1453_v37, %v1452_v25  ;;  %v1457_v51 = vor.u32 %v1456_v36, %v1455_v57  ;;  %v1460_v34 = vor.u32 %v1459_v56, %v1458_v44 }
 0x26e   : > { %v1463_v33 = vor.u32 %v1462_v42, %v1461_v61  ;;  %vm1651_vm5 = vcmp.gt.s32.totalorder %v1650_v2, 0  ;;  %v1648_v42 = vor.u32 8388608, %v1647_v63 }
 0x26f   : > { %v1472_v14 = vsel %vm1464_vm11, %v1451_v41, %v1454_v43  ;;  %v1476_v26 = vsel %vm1464_vm11, %v1454_v43, %v1457_v51  ;;  %v1473_v28 = vsel %vm1467_vm12, %v1460_v34, 920167782  ;;  %v1469_v23 = vsel %vm1467_vm12, %v1457_v51, 2102212464 }
 0x270   : > { %v1477_v60 = vsel %vm1467_vm12, %v1463_v33, 1326507024  ;;  %v1474_v20 = vsel %vm1466_vm13, %v1457_v51, %v1473_v28  ;;  %v1468_v47 = vsel %vm1464_vm11, %v1448_v12, %v1451_v41  ;;  %v1470_v39 = vsel %vm1466_vm13, %v1454_v43, %v1469_v23  ;;  %v1323_v43 = vpop.permute.xlu0 %1322 }
 0x271   : > { %v1478_v35 = vsel %vm1466_vm13, %v1460_v34, %v1477_v60  ;;  %v1475_v3 = vsel %vm1465_vm14, %v1472_v14, %v1474_v20  ;;  %v1652_v11 = vsel %vm1651_vm5, %v1650_v2, 0  ;;  %v1471_v62 = vsel %vm1465_vm14, %v1468_v47, %v1470_v39 }
 0x272   : > { %v1479_v10 = vsel %vm1465_vm14, %v1476_v26, %v1478_v35  ;;  %v5224_v0 = vmul.u32.u64.low %v1480_v9, %v1475_v3  ;;  %v5225_v38 = vmul.u32.u64.high %v1480_v9, %v1475_v3, %v5224_v0  ;;  %v1654_v17 = vand.u32 31, %v1652_v11 }
 0x273   : > { %v5221_v18 = vmul.u32.u64.low %v1480_v9, %v1479_v10  ;;  %v5222_v21 = vmul.u32.u64.high %v1480_v9, %v1479_v10, %v5221_v18  ;;  %v5240_v54 = vshrl.u32 %v1652_v11, 5  ;;  %v1487_v61 = vmul.u32 %v1480_v9, %v1471_v62 }
 0x274   : > { %v1490_v8 = vadd.s32 1, %v5225_v38  ;;  %v1655_v30 = vsub.s32 32, %v1654_v17  ;;  %v1657_v22 = vshll.u32 %v6912_v55, %v1654_v17  ;;  %v1660_v6 = vshll.u32 %v6909_v58, %v1654_v17 }
 0x275   : > { %vm1489_vm15 = vc.u32 %v5222_v21, %v5224_v0  ;;  %v1663_v25 = vshll.u32 %v6910_v59, %v1654_v17  ;;  %v1666_v37 = vshll.u32 %v6908_v15, %v1654_v17  ;;  %v1669_v44 = vshll.u32 %v6907_v46, %v1654_v17 }
 0x276   : > { %v1491_v5 = vsel %vm1489_vm15, %v1490_v8, %v5225_v38  ;;  %v1658_v7 = vshrl.u32 %v6909_v58, %v1655_v30  ;;  %v1661_v19 = vshrl.u32 %v6910_v59, %v1655_v30  ;;  %v1664_v57 = vshrl.u32 %v6908_v15, %v1655_v30 }
 0x277   : > { %v1667_v36 = vshrl.u32 %v6907_v46, %v1655_v30  ;;  %v1670_v56 = vshrl.u32 %v6911_v1, %v1655_v30  ;;  %vm1672_vm1 = vcmp.lt.s32.totalorder %v5240_v54, 1  ;;  %v1492_v14 = vadd.s32 %v1491_v5, %v1487_v61 }
 0x278   : > { %v1659_v29 = vor.u32 %v1658_v7, %v1657_v22  ;;  %v1662_v41 = vor.u32 %v1661_v19, %v1660_v6  ;;  %v1665_v51 = vor.u32 %v1664_v57, %v1663_v25  ;;  %vm1675_vm3 = vcmp.lt.s32.totalorder %v5240_v54, 4 }
 0x279   : > { %v1668_v34 = vor.u32 %v1667_v36, %v1666_v37  ;;  %v1671_v33 = vor.u32 %v1670_v56, %v1669_v44  ;;  %v5258_v24 = vadd.f32 %v5190_v31, %v1323_v43  ;;  %vm1674_vm2 = vcmp.lt.s32.totalorder %v5240_v54, 3 }
 0x27a   : > { %v1680_v26 = vsel %vm1672_vm1, %v1659_v29, %v1662_v41  ;;  %v1684_v60 = vsel %vm1672_vm1, %v1662_v41, %v1665_v51  ;;  %v1546_v20 = vadd.s32 1, %v3662_v4  ;;  %vm1673_vm4 = vcmp.lt.s32.totalorder %v5240_v54, 2 }
 0x27b   : > { %6954 = vst [vmem:[#allocation21_spill] sm:$0xff] %v5258_v24  ;;  %v1681_v28 = vsel %vm1675_vm3, %v1668_v34, 920167782  ;;  %v1685_v2 = vsel %vm1675_vm3, %v1671_v33, 1326507024  ;;  %v1688_v23 = vshll.u32 %v1648_v42, 8  ;;  %v1656_v63 = vshrl.u32 %v6912_v55, %v1655_v30 }
 0x27c   : > { %v1682_v35 = vsel %vm1674_vm2, %v1665_v51, %v1681_v28  ;;  %v1686_v31 = vsel %vm1674_vm2, %v1668_v34, %v1685_v2  ;;  %v1493_v3 = vadd.s32 536870912, %v1492_v14  ;;  %v1748_v38 = vshrl.u32 %v1747_v53, 23 }
 0x27d   : > { %v1683_v9 = vsel %vm1673_vm4, %v1680_v26, %v1682_v35  ;;  %v1687_v12 = vsel %vm1673_vm4, %v1684_v60, %v1686_v31  ;;  %vm1547_vm9 = vcmp.gt.s32.totalorder %v1546_v20, 0  ;;  %v1851_v11 = vand.u32 2139095040, %v5258_v24 }
 0x27e   : > { %v5276_v10 = vmul.u32.u64.low %v1688_v23, %v1683_v9  ;;  %v5277_v18 = vmul.u32.u64.high %v1688_v23, %v1683_v9, %v5276_v10  ;;  %v5280_v47 = vmul.u32.u64.low %v1688_v23, %v1687_v12  ;;  %v5281_v39 = vmul.u32.u64.high %v1688_v23, %v1687_v12, %v5280_v47 }
 0x27f   : > { %v5284_v17 = vshrl.u32 %v1493_v3, 30  ;;  %v5286_v8 = vsel %vm1547_vm9, %v1546_v20, 0  ;;  %v1677_v4 = vsel %vm1675_vm3, %v1665_v51, 2102212464  ;;  %v1852_v62 = vshrl.u32 %v1851_v11, 23 }
 0x280   : > { %v3670_v22 = vadd.s32 4294967169, %v1748_v38  ;;  %v5292_v6 = vadd.f32 %v5192_v49, %v1323_v43  ;;  %v5295_v25 = vand.u32 31, %v5286_v8  ;;  %v1676_v5 = vsel %vm1672_vm1, %v1656_v63, %v1659_v29  ;;  %v5345_v63 = vpop.permute.xlu1 %1327 }
 0x281   : > { %6955 = vst [vmem:[#allocation20_spill] sm:$0xff] %v5284_v17  ;;  %v3674_v53 = vadd.s32 4294967169, %v1852_v62  ;;  %v1678_v7 = vsel %vm1674_vm2, %v1662_v41, %v1677_v4  ;;  %v1495_v19 = vshll.u32 %v5284_v17, 30  ;;  %v1698_v37 = vadd.s32 1, %v5277_v18 }
 0x282   : > { %6956 = vst [vmem:[#allocation9_spill] sm:$0xff] %v5292_v6  ;;  %vm1697_vm10 = vc.u32 %v5281_v39, %v5276_v10  ;;  %v1754_v49 = vadd.s32 1, %v3670_v22  ;;  %v1955_v30 = vand.u32 2139095040, %v5292_v6  ;;  %v1679_v36 = vsel %vm1673_vm4, %v1676_v5, %v1678_v7 }
 0x283   : > { %v1858_v57 = vadd.s32 1, %v3674_v53  ;;  %v5309_v44 = vsub.s32 32, %v5295_v25  ;;  %v5311_v56 = vsub.s32 %v1492_v14, %v1495_v19  ;;  %v1699_v61 = vsel %vm1697_vm10, %v1698_v37, %v5277_v18 }
 0x284   : > { %v6851_v42 = vand.u32 2147483647, %v5258_v24  ;;  %v1695_v41 = vmul.u32 %v1688_v23, %v1679_v36  ;;  %vm1755_vm6 = vcmp.gt.s32.totalorder %v1754_v49, 0  ;;  %v1956_v43 = vshrl.u32 %v1955_v30, 23 }
 0x285   : > { %vm1859_vm0 = vcmp.gt.s32.totalorder %v1858_v57, 0  ;;  %6957 = vst [vmem:[#allocation16_spill] sm:$0xff] %v5311_v56  ;;  %v6848_v34 = vand.u32 2147483647, %v5195_v32  ;;  %v5318_v54 = vshll.u32 %v6908_v15, %v5295_v25  ;;  %v5322_v33 = vshrl.u32 %v6907_v46, %v5309_v44 }
 0x286   : > { %v1860_v29 = vsel %vm1859_vm0, %v1858_v57, 0  ;;  %v5326_v14 = vshrl.u32 %v6911_v1, %v5309_v44  ;;  %v5328_v26 = vadd.s32 %v1699_v61, %v1695_v41  ;;  %v1498_v28 = vsub.s32 0, %v5311_v56 }
 0x287   : > { %v1862_v51 = vand.u32 31, %v1860_v29  ;;  %v5331_v60 = vsel %vm1755_vm6, %v1754_v49, 0  ;;  %v1855_v2 = vand.u32 8388607, %v6851_v42  ;;  %v1861_v35 = vshrl.u32 %v1860_v29, 5 }
 0x288   : > { %v3678_v12 = vadd.s32 4294967169, %v1956_v43  ;;  %v1701_v47 = vadd.s32 536870912, %v5328_v26  ;;  %v5349_v19 = vmin.u32 %v1498_v28, %v5311_v56  ;;  %v6850_v57 = vand.u32 2147483647, %v5292_v6 }
 0x289   : > { %v1863_v20 = vsub.s32 32, %v1862_v51  ;;  %v1865_v31 = vshll.u32 %v6912_v55, %v1862_v51  ;;  %v1868_v9 = vshll.u32 %v6909_v58, %v1862_v51  ;;  %v1871_v18 = vshll.u32 %v6910_v59, %v1862_v51 }
 0x28a   : > { %v1874_v11 = vshll.u32 %v6908_v15, %v1862_v51  ;;  %v1877_v62 = vshll.u32 %v6907_v46, %v1862_v51  ;;  %v5354_v49 = vadd.f32 %v5197_v40, %v5345_v63  ;;  %v1856_v30 = vor.u32 8388608, %v1855_v2 }
 0x28b   : > { %v1866_v23 = vshrl.u32 %v6909_v58, %v1863_v20  ;;  %v1869_v3 = vshrl.u32 %v6910_v59, %v1863_v20  ;;  %v1872_v38 = vshrl.u32 %v6908_v15, %v1863_v20  ;;  %v1875_v4 = vshrl.u32 %v6907_v46, %v1863_v20 }
 0x28c   : > { %v1878_v7 = vshrl.u32 %v6911_v1, %v1863_v20  ;;  %6958 = vst [vmem:[#allocation15_spill] sm:$0xff] %v5354_v49  ;;  %vm1880_vm8 = vcmp.lt.s32.totalorder %v1861_v35, 1  ;;  %v1962_v61 = vadd.s32 1, %v3678_v12  ;;  %v5356_v29 = vshrl.u32 %v1701_v47, 30 }
 0x28d   : > { %v1867_v22 = vor.u32 %v1866_v23, %v1865_v31  ;;  %v1870_v53 = vor.u32 %v1869_v3, %v1868_v9  ;;  %v1873_v5 = vor.u32 %v1872_v38, %v1871_v18  ;;  %v1876_v37 = vor.u32 %v1875_v4, %v1874_v11 }
 0x28e   : > { %v1879_v36 = vor.u32 %v1878_v7, %v1877_v62  ;;  %6959 = vst [vmem:[#allocation12_spill] sm:$0xff] %v5356_v29  ;;  %vm1882_vm11 = vcmp.lt.s32.totalorder %v1861_v35, 3  ;;  %vm1883_vm12 = vcmp.lt.s32.totalorder %v1861_v35, 4  ;;  %v1864_v9 = vshrl.u32 %v6912_v55, %v1863_v20 }
 0x28f   : > { %v1888_v41 = vsel %vm1880_vm8, %v1867_v22, %v1870_v53  ;;  %v1885_v43 = vsel %vm1883_vm12, %v1873_v5, 2102212464  ;;  %v1889_v51 = vsel %vm1883_vm12, %v1876_v37, 920167782  ;;  %v1892_v28 = vsel %vm1880_vm8, %v1870_v53, %v1873_v5 }
 0x290   : > { %v1893_v31 = vsel %vm1883_vm12, %v1879_v36, 1326507024  ;;  %vm1881_vm13 = vcmp.lt.s32.totalorder %v1861_v35, 2  ;;  %v1890_v40 = vsel %vm1882_vm11, %v1873_v5, %v1889_v51  ;;  %v2059_v2 = vand.u32 2139095040, %v5354_v49 }
 0x291   : > { %v1891_v12 = vsel %vm1881_vm13, %v1888_v41, %v1890_v40  ;;  %v1894_v23 = vsel %vm1882_vm11, %v1876_v37, %v1893_v31  ;;  %v1896_v3 = vshll.u32 %v1856_v30, 8  ;;  %vm1963_vm14 = vcmp.gt.s32.totalorder %v1962_v61, 0 }
 0x292   : > { %v1884_v18 = vsel %vm1880_vm8, %v1864_v9, %v1867_v22  ;;  %v1886_v38 = vsel %vm1882_vm11, %v1870_v53, %v1885_v43  ;;  %v1895_v47 = vsel %vm1881_vm13, %v1892_v28, %v1894_v23  ;;  %v1959_v20 = vand.u32 8388607, %v6850_v57 }
 0x293   : > { %v5370_v11 = vmul.u32.u64.low %v1896_v3, %v1895_v47  ;;  %v5371_v4 = vmul.u32.u64.high %v1896_v3, %v1895_v47, %v5370_v11  ;;  %v5373_v62 = vmul.u32.u64.low %v1896_v3, %v1891_v12  ;;  %v5374_v5 = vmul.u32.u64.high %v1896_v3, %v1891_v12, %v5373_v62 }
 0x294   : > { %v5379_v7 = vshll.u32 %v6907_v46, %v5295_v25  ;;  %v1703_v22 = vshll.u32 %v5356_v29, 30  ;;  %v1964_v37 = vsel %vm1963_vm14, %v1962_v61, 0  ;;  %v2060_v53 = vshrl.u32 %v2059_v2, 23 }
 0x295   : > { %v5383_v30 = vshrl.u32 %v5286_v8, 5  ;;  %v1887_v36 = vsel %vm1881_vm13, %v1884_v18, %v1886_v38  ;;  %v1966_v41 = vand.u32 31, %v1964_v37  ;;  %v5388_v43 = vand.u32 8388607, %v6848_v34 }
 0x296   : > { %v5393_v28 = vor.u32 %v5322_v33, %v5318_v54  ;;  %v1567_v61 = vor.u32 %v5326_v14, %v5379_v7  ;;  %v5398_v31 = vand.u32 31, %v5331_v60  ;;  %vm1905_vm5 = vc.u32 %v5371_v4, %v5373_v62 }
 0x297   : > { %v1906_v8 = vadd.s32 1, %v5374_v5  ;;  %v1960_v35 = vor.u32 8388608, %v1959_v20  ;;  %v1967_v9 = vsub.s32 32, %v1966_v41  ;;  %v5404_v40 = vsub.s32 %v5328_v26, %v1703_v22 }
 0x298   : > { %v1903_v2 = vmul.u32 %v1896_v3, %v1887_v36  ;;  %v1969_v54 = vshll.u32 %v6912_v55, %v1966_v41  ;;  %v3682_v33 = vadd.s32 4294967169, %v2060_v53  ;;  %v1972_v23 = vshll.u32 %v6909_v58, %v1966_v41 }
 0x299   : > { %6960 = vst [vmem:[#allocation8_spill] sm:$0xff] %v5404_v40  ;;  %v1907_v12 = vsel %vm1905_vm5, %v1906_v8, %v5374_v5  ;;  %v1970_v14 = vshrl.u32 %v6909_v58, %v1967_v9  ;;  %v1973_v18 = vshrl.u32 %v6910_v59, %v1967_v9  ;;  %v1965_v47 = vshrl.u32 %v1964_v37, 5 }
 0x29a   : > { %v1908_v38 = vadd.s32 %v1907_v12, %v1903_v2  ;;  %v1975_v20 = vshll.u32 %v6910_v59, %v1966_v41  ;;  %v1976_v11 = vshrl.u32 %v6908_v15, %v1967_v9  ;;  %v1978_v3 = vshll.u32 %v6908_v15, %v1966_v41 }
 0x29b   : > { %v1971_v26 = vor.u32 %v1970_v14, %v1969_v54  ;;  %v1974_v7 = vor.u32 %v1973_v18, %v1972_v23  ;;  %v1979_v22 = vshrl.u32 %v6907_v46, %v1967_v9  ;;  %v2000_v36 = vshll.u32 %v1960_v35, 8 }
 0x29c   : > { %v1909_v53 = vadd.s32 536870912, %v1908_v38  ;;  %v1977_v5 = vor.u32 %v1976_v11, %v1975_v20  ;;  %v6852_v8 = vand.u32 2147483647, %v5354_v49  ;;  %v1706_v16 = vsub.s32 0, %v5404_v40 }
 0x29d   : > { %v1980_v45 = vor.u32 %v1979_v22, %v1978_v3  ;;  %v1981_v37 = vshll.u32 %v6907_v46, %v1966_v41  ;;  %v1982_v2 = vshrl.u32 %v6911_v1, %v1967_v9  ;;  %vm1984_vm15 = vcmp.lt.s32.totalorder %v1965_v47, 1 }
 0x29e   : > { %v5419_v12 = vshrl.u32 %v1909_v53, 30  ;;  %vm1987_vm1 = vcmp.lt.s32.totalorder %v1965_v47, 4  ;;  %v2066_v54 = vadd.s32 1, %v3682_v33  ;;  %v1968_v14 = vshrl.u32 %v6912_v55, %v1967_v9 }
 0x29f   : > { %v1983_v23 = vor.u32 %v1982_v2, %v1981_v37  ;;  %v1989_v18 = vsel %vm1987_vm1, %v1977_v5, 2102212464  ;;  %v1992_v20 = vsel %vm1984_vm15, %v1971_v26, %v1974_v7  ;;  %vm1985_vm3 = vcmp.lt.s32.totalorder %v1965_v47, 2 }
 0x2a0   : > { %6961 = vst [vmem:[#allocation13_spill] sm:$0xff] %v5419_v12  ;;  %v1911_v35 = vshll.u32 %v5419_v12, 30  ;;  %vm1986_vm2 = vcmp.lt.s32.totalorder %v1965_v47, 3  ;;  %v1993_v11 = vsel %vm1987_vm1, %v1980_v45, 920167782  ;;  %v1988_v3 = vsel %vm1984_vm15, %v1968_v14, %v1971_v26 }
 0x2a1   : > { %v1994_v22 = vsel %vm1986_vm2, %v1977_v5, %v1993_v11  ;;  %v1996_v41 = vsel %vm1984_vm15, %v1974_v7, %v1977_v5  ;;  %v1997_v34 = vsel %vm1987_vm1, %v1983_v23, 1326507024  ;;  %v1990_v53 = vsel %vm1986_vm2, %v1974_v7, %v1989_v18 }
 0x2a2   : > { %v5423_v48 = vsub.s32 %v1908_v38, %v1911_v35  ;;  %v1995_v57 = vsel %vm1985_vm3, %v1992_v20, %v1994_v22  ;;  %v1998_v33 = vsel %vm1986_vm2, %v1980_v45, %v1997_v34  ;;  %vm2067_vm4 = vcmp.gt.s32.totalorder %v2066_v54, 0 }
 0x2a3   : > { %v1999_v9 = vsel %vm1985_vm3, %v1996_v41, %v1998_v33  ;;  %v5427_v37 = vmul.u32.u64.low %v2000_v36, %v1995_v57  ;;  %v5428_v2 = vmul.u32.u64.high %v2000_v36, %v1995_v57, %v5427_v37  ;;  %v3667_v42 = vmin.u32 %v1706_v16, %v5404_v40 }
 0x2a4   : > { %v5432_v51 = vmul.u32.u64.low %v2000_v36, %v1999_v9  ;;  %v5433_v26 = vmul.u32.u64.high %v2000_v36, %v1999_v9, %v5432_v51  ;;  %v2068_v5 = vsel %vm2067_vm4, %v2066_v54, 0  ;;  %vm1571_vm9 = vcmp.lt.s32.totalorder %v5383_v30, 4 }
 0x2a5   : > { %v1991_v38 = vsel %vm1985_vm3, %v1988_v3, %v1990_v53  ;;  %v2063_v45 = vand.u32 8388607, %v6852_v8  ;;  %v2070_v34 = vand.u32 31, %v2068_v5  ;;  %v5442_v57 = vsel %vm1571_vm9, %v5393_v28, 920167782 }
 0x2a6   : > { %v5446_v16 = vsel %vm1571_vm9, %v1567_v61, 1326507024  ;;  %v1914_v51 = vsub.s32 0, %v5423_v48  ;;  %v6962_v47 = vclz %v5349_v19  ;;  %v5455_v14 = vsub.s32 32, %v5398_v31 }
 0x2a7   : > { %v2010_v23 = vadd.s32 1, %v5428_v2  ;;  %v2071_v18 = vsub.s32 32, %v2070_v34  ;;  %v1708_v20 = vclz %v3667_v42  ;;  %v2007_v35 = vmul.u32 %v2000_v36, %v1991_v38 }
 0x2a8   : > { %v5452_v54 = vadd.s32 4294967294, %v6962_v47  ;;  %vm2009_vm10 = vc.u32 %v5433_v26, %v5427_v37  ;;  %v5462_v61 = vadd.f32 %v5199_v50, %v5345_v63  ;;  %v2064_v19 = vor.u32 8388608, %v2063_v45 }
 0x2a9   : > { %v2011_v11 = vsel %vm2009_vm10, %v2010_v23, %v5428_v2  ;;  %v2074_v3 = vshrl.u32 %v6909_v58, %v2071_v18  ;;  %v2077_v22 = vshrl.u32 %v6910_v59, %v2071_v18  ;;  %v3675_v41 = vmin.u32 %v1914_v51, %v5423_v48 }
 0x2aa   : > { %6963 = vst [vmem:[#allocation14_spill] sm:$0xff] %v5462_v61  ;;  %v2012_v53 = vadd.s32 %v2011_v11, %v2007_v35  ;;  %v2073_v42 = vshll.u32 %v6912_v55, %v2070_v34  ;;  %v2080_v36 = vshrl.u32 %v6908_v15, %v2071_v18  ;;  %v2076_v33 = vshll.u32 %v6909_v58, %v2070_v34 }
 0x2ab   : > { %v2079_v9 = vshll.u32 %v6910_v59, %v2070_v34  ;;  %v2082_v50 = vshll.u32 %v6908_v15, %v2070_v34  ;;  %v2083_v63 = vshrl.u32 %v6907_v46, %v2071_v18  ;;  %v2069_v38 = vshrl.u32 %v2068_v5, 5 }
 0x2ac   : > { %v2013_v2 = vadd.s32 536870912, %v2012_v53  ;;  %v2075_v45 = vor.u32 %v2074_v3, %v2073_v42  ;;  %v2086_v47 = vshrl.u32 %v6911_v1, %v2071_v18  ;;  %v2078_v23 = vor.u32 %v2077_v22, %v2076_v33 }
 0x2ad   : > { %v2081_v51 = vor.u32 %v2080_v36, %v2079_v9  ;;  %v2084_v35 = vor.u32 %v2083_v63, %v2082_v50  ;;  %v2085_v11 = vshll.u32 %v6907_v46, %v2070_v34  ;;  %v5478_v8 = vadd.s32 %v5224_v0, %v5222_v21 }
 0x2ae   : > { %v5481_v7 = vshrl.u32 %v5331_v60, 5  ;;  %v1771_v12 = vshrl.u32 %v6907_v46, %v5455_v14  ;;  %v1916_v29 = vclz %v3675_v41  ;;  %vm3661_vm0 = vcmp.lt.s32.totalorder %v5452_v54, 0 }
 0x2af   : > { %v1774_v5 = vshrl.u32 %v6911_v1, %v5455_v14  ;;  %v2087_v3 = vor.u32 %v2086_v47, %v2085_v11  ;;  %v2163_v22 = vand.u32 2139095040, %v5462_v61  ;;  %v3668_v34 = vadd.s32 4294967294, %v1708_v20 }
 0x2b0   : > { %v5489_v42 = vshrl.u32 %v2013_v2, 30  ;;  %vm2088_vm6 = vcmp.lt.s32.totalorder %v2069_v38, 1  ;;  %vm2091_vm8 = vcmp.lt.s32.totalorder %v2069_v38, 4  ;;  %v2104_v36 = vshll.u32 %v2064_v19, 8 }
 0x2b1   : > { %v2093_v21 = vsel %vm2091_vm8, %v2081_v51, 2102212464  ;;  %v2096_v0 = vsel %vm2088_vm6, %v2075_v45, %v2078_v23  ;;  %v2097_v60 = vsel %vm2091_vm8, %v2084_v35, 920167782  ;;  %v3676_v33 = vadd.s32 4294967294, %v1916_v29 }
 0x2b2   : > { %6964 = vst [vmem:[#allocation19_spill] sm:$0xff] %v5489_v42  ;;  %v2072_v41 = vshrl.u32 %v6912_v55, %v2071_v18  ;;  %vm2089_vm11 = vcmp.lt.s32.totalorder %v2069_v38, 2  ;;  %vm2090_vm12 = vcmp.lt.s32.totalorder %v2069_v38, 3  ;;  %v2100_v50 = vsel %vm2088_vm6, %v2078_v23, %v2081_v51 }
 0x2b3   : > { %v2098_v9 = vsel %vm2090_vm12, %v2081_v51, %v2097_v60  ;;  %v2101_v63 = vsel %vm2091_vm8, %v2087_v3, 1326507024  ;;  %v2164_v47 = vshrl.u32 %v2163_v22, 23  ;;  %v2015_v11 = vshll.u32 %v5489_v42, 30 }
 0x2b4   : > { %v2092_v20 = vsel %vm2088_vm6, %v2072_v41, %v2075_v45  ;;  %v2094_v2 = vsel %vm2090_vm12, %v2078_v23, %v2093_v21  ;;  %v2099_v32 = vsel %vm2089_vm11, %v2096_v0, %v2098_v9  ;;  %v2102_v49 = vsel %vm2090_vm12, %v2084_v35, %v2101_v63 }
 0x2b5   : > { %v5494_v17 = vmul.u32.u64.low %v2104_v36, %v2099_v32  ;;  %v5495_v52 = vmul.u32.u64.high %v2104_v36, %v2099_v32, %v5494_v17  ;;  %v3686_v29 = vadd.s32 4294967169, %v2164_v47  ;;  %v1770_v18 = vshll.u32 %v6908_v15, %v5398_v31 }
 0x2b6   : > { %v1773_v19 = vshll.u32 %v6907_v46, %v5398_v31  ;;  %vm1779_vm13 = vcmp.lt.s32.totalorder %v5481_v7, 4  ;;  %v2103_v51 = vsel %vm2089_vm11, %v2100_v50, %v2102_v49  ;;  %v5507_v45 = vsel %vm3661_vm0, 0, %v5452_v54 }
 0x2b7   : > { %6965 = vst [vmem:[#allocation17_spill] sm:$0xff] %v5494_v17  ;;  %6966 = vst [vmem:[#allocation22_spill] sm:$0xff] %v5507_v45  ;;  %v5509_v23 = vmul.u32.u64.low %v2104_v36, %v2103_v51  ;;  %v5510_v32 = vmul.u32.u64.high %v2104_v36, %v2103_v51, %v5509_v23  ;;  %v2170_v35 = vadd.s32 1, %v3686_v29  ;;  %v5512_v3 = vor.u32 %v1771_v12, %v1770_v18 }
 0x2b8   : > { %v1775_v22 = vor.u32 %v1774_v5, %v1773_v19  ;;  %v5514_v21 = vsub.s32 %v2012_v53, %v2015_v11  ;;  %v2095_v0 = vsel %vm2089_vm11, %v2092_v20, %v2094_v2  ;;  %vm3669_vm14 = vcmp.lt.s32.totalorder %v3668_v34, 0 }
 0x2b9   : > { %6967 = vst [vmem:[#allocation23_spill] sm:$0xff] %v5510_v32  ;;  %vm3677_vm5 = vcmp.lt.s32.totalorder %v3676_v33, 0  ;;  %v2114_v49 = vadd.s32 1, %v5495_v52  ;;  %vm2171_vm15 = vcmp.gt.s32.totalorder %v2170_v35, 0  ;;  %v1504_v60 = vsub.s32 32, %v5507_v45 }
 0x2ba   : > { %v5521_v54 = vadd.s32 %v5276_v10, %v5281_v39  ;;  %v6865_v41 = vand.u32 2147483647, %v5462_v61  ;;  %v2172_v12 = vsel %vm2171_vm15, %v2170_v35, 0  ;;  %v1508_v5 = vsub.s32 4294967266, %v5507_v45 }
 0x2bb   : > { %v2111_v53 = vmul.u32 %v2104_v36, %v2095_v0  ;;  %vm2113_vm1 = vc.u32 %v5510_v32, %v5494_v17  ;;  %v2174_v38 = vand.u32 31, %v2172_v12  ;;  %v5527_v9 = vsel %vm3669_vm14, 0, %v3668_v34 }
 0x2bc   : > { %v5529_v50 = vsel %vm3677_vm5, 0, %v3676_v33  ;;  %v2018_v63 = vsub.s32 0, %v5514_v21  ;;  %v2115_v47 = vsel %vm2113_vm1, %v2114_v49, %v5495_v52  ;;  %v5536_v10 = vsel %vm1779_vm13, %v5512_v3, 920167782 }
 0x2bd   : > { %v5540_v39 = vsel %vm1779_vm13, %v1775_v22, 1326507024  ;;  %v2116_v36 = vadd.s32 %v2115_v47, %v2111_v53  ;;  %v2175_v11 = vsub.s32 32, %v2174_v38  ;;  %v5545_v33 = vshrl.u32 %v5478_v8, %v1504_v60 }
 0x2be   : > { %v2167_v52 = vand.u32 8388607, %v6865_v41  ;;  %v5551_v20 = vshrl.u32 %v6912_v55, %v5309_v44  ;;  %v5553_v2 = vadd.s32 127, %v1508_v5  ;;  %v1716_v29 = vsub.s32 4294967266, %v5527_v9 }
 0x2bf   : > { %6968 = vst [vmem:[#allocation24_spill] sm:$0xff] %v5545_v33  ;;  %v5558_v18 = vadd.s32 %v5373_v62, %v5371_v4  ;;  %v1924_v19 = vsub.s32 4294967266, %v5529_v50  ;;  %v3679_v8 = vmin.u32 %v2018_v63, %v5514_v21  ;;  %v2117_v51 = vadd.s32 536870912, %v2116_v36 }
 0x2c0   : > { %v2177_v23 = vshll.u32 %v6912_v55, %v2174_v38  ;;  %v2178_v35 = vshrl.u32 %v6909_v58, %v2175_v11  ;;  %v2180_v22 = vshll.u32 %v6909_v58, %v2174_v38  ;;  %v2181_v0 = vshrl.u32 %v6910_v59, %v2175_v11 }
 0x2c1   : > { %v2183_v49 = vshll.u32 %v6910_v59, %v2174_v38  ;;  %v2184_v60 = vshrl.u32 %v6908_v15, %v2175_v11  ;;  %v2168_v5 = vor.u32 8388608, %v2167_v52  ;;  %v2173_v4 = vshrl.u32 %v2172_v12, 5 }
 0x2c2   : > { %v2179_v62 = vor.u32 %v2178_v35, %v2177_v23  ;;  %v1553_v53 = vshll.u32 %v6912_v55, %v5295_v25  ;;  %v2182_v63 = vor.u32 %v2181_v0, %v2180_v22  ;;  %v2186_v41 = vshll.u32 %v6908_v15, %v2174_v38 }
 0x2c3   : > { %v2185_v47 = vor.u32 %v2184_v60, %v2183_v49  ;;  %v2187_v34 = vshrl.u32 %v6907_v46, %v2175_v11  ;;  %v1920_v42 = vsub.s32 32, %v5529_v50  ;;  %v1925_v61 = vadd.s32 127, %v1924_v19 }
 0x2c4   : > { %v2189_v27 = vshll.u32 %v6907_v46, %v2174_v38  ;;  %v2190_v17 = vshrl.u32 %v6911_v1, %v2175_v11  ;;  %v2020_v32 = vclz %v3679_v8  ;;  %v5575_v52 = vshrl.u32 %v2117_v51, 30 }
 0x2c5   : > { %v2188_v12 = vor.u32 %v2187_v34, %v2186_v41  ;;  %v1554_v23 = vshrl.u32 %v6909_v58, %v5309_v44  ;;  %vm2192_vm3 = vcmp.lt.s32.totalorder %v2173_v4, 1  ;;  %vm2195_vm2 = vcmp.lt.s32.totalorder %v2173_v4, 4 }
 0x2c6   : > { %v2191_v35 = vor.u32 %v2190_v17, %v2189_v27  ;;  %v2208_v22 = vshll.u32 %v2168_v5, 8  ;;  %v2197_v0 = vsel %vm2195_vm2, %v2185_v47, 2102212464  ;;  %v2200_v49 = vsel %vm2192_vm3, %v2179_v62, %v2182_v63 }
 0x2c7   : > { %v1556_v19 = vshll.u32 %v6909_v58, %v5295_v25  ;;  %v1557_v38 = vshrl.u32 %v6910_v59, %v5309_v44  ;;  %v2176_v8 = vshrl.u32 %v6912_v55, %v2175_v11  ;;  %vm2194_vm4 = vcmp.lt.s32.totalorder %v2173_v4, 3 }
 0x2c8   : > { %v2201_v51 = vsel %vm2195_vm2, %v2188_v12, 920167782  ;;  %v2204_v41 = vsel %vm2192_vm3, %v2182_v63, %v2185_v47  ;;  %v2119_v34 = vshll.u32 %v5575_v52, 30  ;;  %vm2193_vm10 = vcmp.lt.s32.totalorder %v2173_v4, 2 }
 0x2c9   : > { %v2202_v27 = vsel %vm2194_vm4, %v2185_v47, %v2201_v51  ;;  %v2205_v17 = vsel %vm2195_vm2, %v2191_v35, 1326507024  ;;  %v2196_v60 = vsel %vm2192_vm3, %v2176_v8, %v2179_v62  ;;  %v2198_v5 = vsel %vm2194_vm4, %v2182_v63, %v2197_v0 }
 0x2ca   : > { %v2203_v1 = vsel %vm2193_vm10, %v2200_v49, %v2202_v27  ;;  %v2206_v46 = vsel %vm2194_vm4, %v2188_v12, %v2205_v17  ;;  %v3680_v6 = vadd.s32 4294967294, %v2020_v32  ;;  %v1559_v56 = vshll.u32 %v6910_v59, %v5295_v25 }
 0x2cb   : > { %v2207_v24 = vsel %vm2193_vm10, %v2204_v41, %v2206_v46  ;;  %v5585_v40 = vmul.u32.u64.low %v2208_v22, %v2203_v1  ;;  %v5586_v33 = vmul.u32.u64.high %v2208_v22, %v2203_v1, %v5585_v40  ;;  %v1560_v4 = vshrl.u32 %v6908_v15, %v5309_v44 }
 0x2cc   : > { %v5589_v45 = vmul.u32.u64.low %v2208_v22, %v2207_v24  ;;  %v5590_v11 = vmul.u32.u64.high %v2208_v22, %v2207_v24, %v5589_v45  ;;  %v5596_v47 = vsub.s32 %v2116_v36, %v2119_v34  ;;  %v2199_v62 = vsel %vm2193_vm10, %v2196_v60, %v2198_v5 }
 0x2cd   : > { %v1555_v63 = vor.u32 %v1554_v23, %v1553_v53  ;;  %v1558_v12 = vor.u32 %v1557_v38, %v1556_v19  ;;  %v1510_v46 = vshll.u32 %v5553_v2, 23  ;;  %v1712_v1 = vsub.s32 32, %v5527_v9 }
 0x2ce   : > { %v5600_v32 = vadd.s32 127, %v1716_v29  ;;  %v1561_v35 = vor.u32 %v1560_v4, %v1559_v56  ;;  %v1921_v24 = vshll.u32 %v5423_v48, %v5529_v50  ;;  %v1922_v25 = vshrl.u32 %v5558_v18, %v1920_v42 }
 0x2cf   : > { %v1926_v45 = vshll.u32 %v1925_v61, 23  ;;  %v2218_v44 = vadd.s32 1, %v5586_v33  ;;  %vm3681_vm0 = vcmp.lt.s32.totalorder %v3680_v6, 0  ;;  %v2215_v36 = vmul.u32 %v2208_v22, %v2199_v62 }
 0x2d0   : > { %vm2217_vm6 = vc.u32 %v5590_v11, %v5585_v40  ;;  %vm1568_vm8 = vcmp.lt.s32.totalorder %v5383_v30, 1  ;;  %v2122_v2 = vsub.s32 0, %v5596_v47  ;;  %vm1570_vm11 = vcmp.lt.s32.totalorder %v5383_v30, 3 }
 0x2d1   : > { %v2219_v29 = vsel %vm2217_vm6, %v2218_v44, %v5586_v33  ;;  %v1576_v48 = vsel %vm1568_vm8, %v1555_v63, %v1558_v12  ;;  %v1573_v61 = vsel %vm1571_vm9, %v1561_v35, 2102212464  ;;  %v1578_v42 = vsel %vm1570_vm11, %v1561_v35, %v5442_v57 }
 0x2d2   : > { %v2220_v56 = vadd.s32 %v2219_v29, %v2215_v36  ;;  %v1580_v50 = vsel %vm1568_vm8, %v1558_v12, %v1561_v35  ;;  %v5621_v18 = vor.u32 %v1922_v25, %v1921_v24  ;;  %v5623_v53 = vor.u32 4788187, %v1926_v45 }
 0x2d3   : > { %v5625_v33 = vsel %vm3681_vm0, 0, %v3680_v6  ;;  %vm1569_vm12 = vcmp.lt.s32.totalorder %v5383_v30, 2  ;;  %v1582_v57 = vsel %vm1570_vm11, %v5393_v28, %v5446_v16  ;;  %v6969_v0 = vor.u32 8388608, %v5388_v43 }
 0x2d4   : > { %v2221_v23 = vadd.s32 536870912, %v2220_v56  ;;  %v1579_v22 = vsel %vm1569_vm12, %v1576_v48, %v1578_v42  ;;  %v3683_v19 = vmin.u32 %v2122_v2, %v5596_v47  ;;  %v1572_v6 = vsel %vm1568_vm8, %v5551_v20, %v1555_v63 }
 0x2d5   : > { %v1584_v49 = vshll.u32 %v6969_v0, 8  ;;  %v1574_v38 = vsel %vm1570_vm11, %v1558_v12, %v1573_v61  ;;  %v1583_v8 = vsel %vm1569_vm12, %v1580_v50, %v1582_v57  ;;  %v1744_v43 = vand.u32 2147483647, %v5229_v13 }
 0x2d6   : > { %v5644_v51 = vshrl.u32 %v2221_v23, 30  ;;  %v5650_v28 = vor.u32 4788187, %v1510_v46  ;;  %v5653_v16 = vshrl.u32 %v5521_v54, %v1712_v1  ;;  %v1718_v17 = vshll.u32 %v5600_v32, 23 }
 0x2d7   : > { %v5646_v41 = vmul.u32.u64.low %v1584_v49, %v1583_v8  ;;  %v5647_v34 = vmul.u32.u64.high %v1584_v49, %v1583_v8, %v5646_v41  ;;  %v5655_v27 = vmul.u32.u64.low %v1584_v49, %v1579_v22  ;;  %v5656_v20 = vmul.u32.u64.high %v1584_v49, %v1579_v22, %v5655_v27 }
 0x2d8   : > { %v1930_v60 = vcvt.s32.f32 %v5621_v18  ;;  %v2008_v5 = vadd.s32 %v5427_v37, %v5433_v26  ;;  %v2223_v4 = vshll.u32 %v5644_v51, 30  ;;  %v1928_v62 = vand.u32 2147483647, %v5623_v53 }
 0x2d9   : > { %v2028_v63 = vsub.s32 4294967266, %v5625_v33  ;;  %v1575_v54 = vsel %vm1569_vm12, %v1572_v6, %v1574_v38  ;;  %v1762_v12 = vshrl.u32 %v6909_v58, %v5455_v14  ;;  %v2124_v46 = vclz %v3683_v19 }
 0x2da   : > { %v5670_v1 = vsub.s32 %v2220_v56, %v2223_v4  ;;  %vm1593_vm9 = vc.u32 %v5647_v34, %v5655_v27  ;;  %v1751_v37 = vand.u32 8388607, %v1744_v43  ;;  %v1594_v26 = vadd.s32 1, %v5656_v20 }
 0x2db   : > { %v1761_v35 = vshll.u32 %v6912_v55, %v5398_v31  ;;  %v1764_v30 = vshll.u32 %v6909_v58, %v5398_v31  ;;  %v1765_v24 = vshrl.u32 %v6910_v59, %v5455_v14  ;;  %v1591_v45 = vmul.u32 %v1584_v49, %v1575_v54 }
 0x2dc   : > { %v2226_v25 = vsub.s32 0, %v5670_v1  ;;  %v1767_v44 = vshll.u32 %v6910_v59, %v5398_v31  ;;  %v1768_v36 = vshrl.u32 %v6908_v15, %v5455_v14  ;;  %v2029_v2 = vadd.s32 127, %v2028_v63 }
 0x2dd   : > { %v1595_v29 = vsel %vm1593_vm9, %v1594_v26, %v5656_v20  ;;  %v1763_v48 = vor.u32 %v1762_v12, %v1761_v35  ;;  %v1766_v56 = vor.u32 %v1765_v24, %v1764_v30  ;;  %v2024_v61 = vsub.s32 32, %v5625_v33 }
 0x2de   : > { %v3687_v42 = vmin.u32 %v2226_v25, %v5670_v1  ;;  %v1596_v50 = vadd.s32 %v1595_v29, %v1591_v45  ;;  %v1769_v53 = vor.u32 %v1768_v36, %v1767_v44  ;;  %v2025_v23 = vshll.u32 %v5514_v21, %v5625_v33  ;;  %v6970_v44 = vld [vmem:[#allocation16_spill] sm:$0xff]  ;;  %v6971_v36 = vld [vmem:[#allocation22_spill] sm:$0xff] }
 0x2df   : > { %v3684_v22 = vadd.s32 4294967294, %v2124_v46  ;;  %v1752_v57 = vor.u32 8388608, %v1751_v37  ;;  %vm1778_vm14 = vcmp.lt.s32.totalorder %v5481_v7, 3  ;;  %vm1776_vm5 = vcmp.lt.s32.totalorder %v5481_v7, 1  ;;  %v6973_v29 = vld [vmem:[#allocation24_spill] sm:$0xff] }
 0x2e0   : > { %v2228_v31 = vclz %v3687_v42  ;;  %v1597_v0 = vadd.s32 536870912, %v1596_v50  ;;  %v1790_v49 = vsel %vm1778_vm14, %v5512_v3, %v5540_v39  ;;  %v2030_v19 = vshll.u32 %v2029_v2, 23  ;;  %v6974_v42 = vld [vmem:[#allocation8_spill] sm:$0xff] }
 0x2e1   : > { %v1784_v6 = vsel %vm1776_vm5, %v1763_v48, %v1766_v56  ;;  %v1786_v21 = vsel %vm1778_vm14, %v1769_v53, %v5536_v10  ;;  %v1788_v33 = vsel %vm1776_vm5, %v1766_v56, %v1769_v53  ;;  %v2026_v38 = vshrl.u32 %v2008_v5, %v2024_v61 }
 0x2e2   : > { %v3688_v8 = vadd.s32 4294967294, %v2228_v31  ;;  %v5706_v41 = vshrl.u32 %v1597_v0, 30  ;;  %vm1777_vm15 = vcmp.lt.s32.totalorder %v5481_v7, 2  ;;  %vm3685_vm1 = vcmp.lt.s32.totalorder %v3684_v22, 0 }
 0x2e3   : > { %v1781_v3 = vsel %vm1779_vm13, %v1769_v53, 2102212464  ;;  %v1791_v39 = vsel %vm1777_vm15, %v1788_v33, %v1790_v49  ;;  %v1792_v20 = vshll.u32 %v1752_v57, 8  ;;  %v1760_v4 = vshrl.u32 %v6912_v55, %v5455_v14  ;;  %v6975_v53 = vld [vmem:[#allocation21_spill] sm:$0xff] }
 0x2e4   : > { %vm3689_vm3 = vcmp.lt.s32.totalorder %v3688_v8, 0  ;;  %v1599_v10 = vshll.u32 %v5706_v41, 30  ;;  %v1787_v5 = vsel %vm1777_vm15, %v1784_v6, %v1786_v21  ;;  %v2031_v63 = vor.u32 4788187, %v2030_v19  ;;  %v6979_v33 = vld [vmem:[#allocation9_spill] sm:$0xff] }
 0x2e5   : > { %v5718_v54 = vsel %vm3689_vm3, 0, %v3688_v8  ;;  %v5720_v12 = vmul.u32.u64.low %v1792_v20, %v1791_v39  ;;  %v5721_v46 = vmul.u32.u64.high %v1792_v20, %v1791_v39, %v5720_v12  ;;  %v5723_v37 = vsel %vm3685_vm1, 0, %v3684_v22 }
 0x2e6   : > { %v5725_v26 = vsub.s32 %v1596_v50, %v1599_v10  ;;  %v1780_v35 = vsel %vm1776_vm5, %v1760_v4, %v1763_v48  ;;  %v1782_v30 = vsel %vm1778_vm14, %v1766_v56, %v1781_v3  ;;  %v2027_v14 = vor.u32 %v2026_v38, %v2025_v23 }
 0x2e7   : > { %v2236_v24 = vsub.s32 4294967266, %v5718_v54  ;;  %v5732_v25 = vmul.u32.u64.low %v1792_v20, %v1787_v5  ;;  %v5733_v45 = vmul.u32.u64.high %v1792_v20, %v1787_v5, %v5732_v25  ;;  %v6972_v2 = vshll.u32 %v6970_v44, %v6971_v36 }
 0x2e8   : > { %v1713_v50 = vshll.u32 %v6974_v42, %v5527_v9  ;;  %v1931_v48 = vmul.f32 %v1930_v60, %v1928_v62  ;;  %v1602_v56 = vsub.s32 0, %v5725_v26  ;;  %vm1850_vm13 = vcmp.lt.s32.totalorder %v6975_v53, 0 }
 0x2e9   : > { %v1507_v61 = vor.u32 %v6973_v29, %v6972_v2  ;;  %v2032_v23 = vand.u32 2147483647, %v2031_v63  ;;  %v2132_v22 = vsub.s32 4294967266, %v5723_v37  ;;  %v1783_v57 = vsel %vm1777_vm15, %v1780_v35, %v1782_v30  ;;  %v6980_v30 = vld [vmem:[#allocation23_spill] sm:$0xff] }
 0x2ea   : > { %v1512_v31 = vand.u32 2147483647, %v5650_v28  ;;  %v1715_v0 = vor.u32 %v5653_v16, %v1713_v50  ;;  %v3663_v49 = vmin.u32 %v1602_v56, %v5725_v26  ;;  %vm1801_vm2 = vc.u32 %v5721_v46, %v5732_v25 }
 0x2eb   : > { %v1719_v9 = vor.u32 4788187, %v1718_v17  ;;  %v6976_v18 = vand.u32 2147483647, %v6975_v53  ;;  %v2034_v7 = vcvt.s32.f32 %v2027_v14  ;;  %v2237_v62 = vadd.s32 127, %v2236_v24  ;;  %v6981_v14 = vld [vmem:[#allocation17_spill] sm:$0xff] }
 0x2ec   : > { %v1802_v28 = vadd.s32 1, %v5733_v45  ;;  %v1514_v19 = vcvt.s32.f32 %v1507_v61  ;;  %v1932_v16 = vxor.u32 2147483648, %v1931_v48  ;;  %v1604_v6 = vclz %v3663_v49 }
 0x2ed   : > { %vm5758_vm4 = vcmp.le.f32.partialorder %v6976_v18, 0.7853982  ;;  %v1799_v21 = vmul.u32 %v1792_v20, %v1783_v57  ;;  %vm1954_vm10 = vcmp.lt.s32.totalorder %v6979_v33, 0  ;;  %v2035_v38 = vmul.f32 %v2034_v7, %v2032_v23 }
 0x2ee   : > { %v2133_v8 = vadd.s32 127, %v2132_v22  ;;  %v2232_v32 = vsub.s32 32, %v5718_v54  ;;  %v1803_v17 = vsel %vm1801_vm2, %v1802_v28, %v5733_v45  ;;  %v1515_v3 = vmul.f32 %v1514_v19, %v1512_v31  ;;  %v6982_v45 = vld [vmem:[#allocation18_spill] sm:$0xff] }
 0x2ef   : > { %v2128_v39 = vsub.s32 32, %v5723_v37  ;;  %v3664_v10 = vadd.s32 4294967294, %v1604_v6  ;;  %v1804_v4 = vadd.s32 %v1803_v17, %v1799_v21  ;;  %v1720_v5 = vand.u32 2147483647, %v1719_v9  ;;  %v6983_v28 = vld [vmem:[#allocation10_spill] sm:$0xff] }
 0x2f0   : > { %v1722_v63 = vcvt.s32.f32 %v1715_v0  ;;  %v2216_v12 = vadd.s32 %v5585_v40, %v5590_v11  ;;  %v2238_v35 = vshll.u32 %v2237_v62, 23  ;;  %v1933_v20 = vsel %vm1850_vm13, %v1932_v16, %v1931_v48 }
 0x2f1   : > { %v2112_v24 = vadd.s32 %v6981_v14, %v6980_v30  ;;  %vm3665_vm0 = vcmp.lt.s32.totalorder %v3664_v10, 0  ;;  %v1805_v44 = vadd.s32 536870912, %v1804_v4  ;;  %vm1434_vm6 = vcmp.lt.s32.totalorder %v6982_v45, 0 }
 0x2f2   : > { %v2036_v36 = vxor.u32 2147483648, %v2035_v38  ;;  %v2134_v2 = vshll.u32 %v2133_v8, 23  ;;  %v2234_v29 = vshrl.u32 %v2216_v12, %v2232_v32  ;;  %v1607_v61 = vsel %vm3665_vm0, 0, %v3664_v10 }
 0x2f3   : > { %v2130_v42 = vshrl.u32 %v2112_v24, %v2128_v39  ;;  %v1592_v50 = vadd.s32 %v5655_v27, %v5647_v34  ;;  %v1608_v40 = vsub.s32 32, %v1607_v61  ;;  %v1612_v11 = vsub.s32 4294967266, %v1607_v61 }
 0x2f4   : > { %v1723_v56 = vmul.f32 %v1722_v63, %v1720_v5  ;;  %v2233_v48 = vshll.u32 %v5670_v1, %v5718_v54  ;;  %v2239_v23 = vor.u32 4788187, %v2238_v35  ;;  %v5778_v22 = vshrl.u32 %v1805_v44, 30  ;;  %v6987_v35 = vld [vmem:[#allocation20_spill] sm:$0xff] }
 0x2f5   : > { %v1936_v57 = vsel %vm5758_vm4, %v6975_v53, %v1933_v20  ;;  %v2129_v31 = vshll.u32 %v5596_v47, %v5723_v37  ;;  %v1610_v0 = vshrl.u32 %v1592_v50, %v1608_v40  ;;  %v1613_v49 = vadd.s32 127, %v1612_v11 }
 0x2f6   : > { %v2135_v9 = vor.u32 4788187, %v2134_v2  ;;  %v2235_v34 = vor.u32 %v2234_v29, %v2233_v48  ;;  %v1609_v27 = vshll.u32 %v5725_v26, %v1607_v61  ;;  %v1807_v18 = vshll.u32 %v5778_v22, 30  ;;  %v6991_v29 = vld [vmem:[#allocation15_spill] sm:$0xff] }
 0x2f7   : > { %v1516_v7 = vxor.u32 2147483648, %v1515_v3  ;;  %v2037_v1 = vsel %vm1954_vm10, %v2036_v36, %v2035_v38  ;;  %v2131_v54 = vor.u32 %v2130_v42, %v2129_v31  ;;  %v1614_v62 = vshll.u32 %v1613_v49, 23  ;;  %v6992_v61 = vld [vmem:[#allocation11_spill] sm:$0xff] }
 0x2f8   : > { %vm1642_vm8 = vcmp.lt.s32.totalorder %v6983_v28, 0  ;;  %v2240_v19 = vand.u32 2147483647, %v2239_v23  ;;  %v1611_v16 = vor.u32 %v1610_v0, %v1609_v27  ;;  %v5790_v6 = vsub.s32 %v1804_v4, %v1807_v18 }
 0x2f9   : > { %v1724_v47 = vxor.u32 2147483648, %v1723_v56  ;;  %3956 = vcosq.f32 %v1936_v57  ;;  %v6984_v37 = vand.u32 2147483647, %v6979_v33  ;;  %v1615_v21 = vor.u32 4788187, %v1614_v62  ;;  %v7003_v62 = vld [vmem:[#allocation12_spill] sm:$0xff] }
 0x2fa   : > { %v2136_v8 = vand.u32 2147483647, %v2135_v9  ;;  %v2242_v32 = vcvt.s32.f32 %v2235_v34  ;;  %v1810_v17 = vsub.s32 0, %v5790_v6  ;;  %v1517_v39 = vsel %vm1434_vm6, %v1516_v7, %v1515_v3 }
 0x2fb   : > { %vm5794_vm11 = vcmp.le.f32.partialorder %v6984_v37, 0.7853982  ;;  %3958 = vsinq.f32 %v1936_v57  ;;  %v2138_v10 = vcvt.s32.f32 %v2131_v54  ;;  %v1616_v4 = vand.u32 2147483647, %v1615_v21  ;;  %v6999_v57 = vld [vmem:[#allocation14_spill] sm:$0xff] }
 0x2fc   : > { %v2040_v38 = vsel %vm5794_vm11, %v6979_v33, %v2037_v1  ;;  %v2243_v5 = vmul.f32 %v2242_v32, %v2240_v19  ;;  %v1618_v63 = vcvt.s32.f32 %v1611_v16  ;;  %v3671_v12 = vmin.u32 %v1810_v17, %v5790_v6 }
 0x2fd   : > { %v1518_v20 = vsub.s32 4, %v6987_v35  ;;  %v1725_v30 = vsel %vm1642_vm8, %v1724_v47, %v1723_v56  ;;  %3960 = vcosq.f32 %v2040_v38  ;;  %v6988_v14 = vand.u32 2147483647, %v6982_v45 }
 0x2fe   : > { %v2139_v3 = vmul.f32 %v2138_v10, %v2136_v8  ;;  %v1619_v44 = vmul.f32 %v1618_v63, %v1616_v4  ;;  %v1812_v36 = vclz %v3671_v12  ;;  %3962 = vsinq.f32 %v2040_v38 }
 0x2ff   : > { %vm5810_vm12 = vcmp.le.f32.partialorder %v6988_v14, 0.7853982  ;;  %vm2058_vm9 = vcmp.lt.s32.totalorder %v6991_v29, 0  ;;  %v6993_v42 = vand.u32 2147483647, %v6992_v61  ;;  %vm1538_vm5 = vcmp.lt.s32.totalorder %v6992_v61, 0 }
 0x300   : > { %v1520_v2 = vsel %vm5810_vm12, %v6982_v45, %v1517_v39  ;;  %v2244_v40 = vxor.u32 2147483648, %v2243_v5  ;;  %v3672_v11 = vadd.s32 4294967294, %v1812_v36  ;;  %v1519_v56 = vsel %vm1434_vm6, %v1518_v20, %v6987_v35 }
 0x301   : > { %vm5820_vm14 = vcmp.le.f32.partialorder %v6993_v42, 0.7853982  ;;  %v6996_v48 = vand.u32 2147483647, %v6983_v28  ;;  %vm2162_vm1 = vcmp.lt.s32.totalorder %v6999_v57, 0  ;;  %v1622_v31 = vsub.s32 4, %v5706_v41 }
 0x302   : > { %3964 = vcosq.f32 %v1520_v2  ;;  %v7000_v49 = vand.u32 2147483647, %v6991_v29  ;;  %v2140_v34 = vxor.u32 2147483648, %v2139_v3  ;;  %v1620_v27 = vxor.u32 2147483648, %v1619_v44 }
 0x303   : > { %vm5830_vm15 = vcmp.le.f32.partialorder %v6996_v48, 0.7853982  ;;  %vm3673_vm2 = vcmp.lt.s32.totalorder %v3672_v11, 0  ;;  %3966 = vsinq.f32 %v1520_v2  ;;  %v5845_v18 = vpop.eup %3956  ;;  %v1800_v7 = vadd.s32 %v5732_v25, %v5721_v46 }
 0x304   : > { %v1728_v0 = vsel %vm5830_vm15, %v6983_v28, %v1725_v30  ;;  %vm5841_vm3 = vcmp.le.f32.partialorder %v7000_v49, 0.7853982  ;;  %v1815_v1 = vsel %vm3673_vm2, 0, %v3672_v11  ;;  %v1521_v54 = vsel %vm5810_vm12, 0, %v1519_v56  ;;  %v7007_v30 = vld [vmem:[#allocation19_spill] sm:$0xff] }
 0x305   : > { %v1726_v19 = vsub.s32 4, %v7003_v62  ;;  %v2245_v16 = vsel %vm2162_vm1, %v2244_v40, %v2243_v5  ;;  %v1816_v47 = vsub.s32 32, %v1815_v1  ;;  %v1820_v37 = vsub.s32 4294967266, %v1815_v1  ;;  %v5854_v21 = vpop.eup %3958 }
 0x306   : > { %3968 = vcosq.f32 %v1728_v0  ;;  %v7004_v38 = vand.u32 2147483647, %v6999_v57  ;;  %v1623_v46 = vsel %vm1538_vm5, %v1622_v31, %v5706_v41  ;;  %v1830_v25 = vsub.s32 4, %v5778_v22 }
 0x307   : > { %3970 = vsinq.f32 %v1728_v0  ;;  %v1621_v32 = vsel %vm1538_vm5, %v1620_v27, %v1619_v44  ;;  %v1817_v17 = vshll.u32 %v5790_v6, %v1815_v1  ;;  %v1818_v39 = vshrl.u32 %v1800_v7, %v1816_v47  ;;  %v5869_v4 = vpop.eup %3960 }
 0x308   : > { %vm5858_vm0 = vcmp.le.f32.partialorder %v7004_v38, 0.7853982  ;;  %v1821_v10 = vadd.s32 127, %v1820_v37  ;;  %v2141_v5 = vsel %vm2058_vm9, %v2140_v34, %v2139_v3  ;;  %v1525_v41 = vadd.s32 3, %v1521_v54  ;;  %v5882_v24 = vpop.eup %3962 }
 0x309   : > { %v2248_v63 = vsel %vm5858_vm0, %v6999_v57, %v2245_v16  ;;  %v1727_v12 = vsel %vm1642_vm8, %v1726_v19, %v7003_v62  ;;  %v1625_v35 = vsel %vm5820_vm14, 0, %v1623_v46  ;;  %v1819_v6 = vor.u32 %v1818_v39, %v1817_v17  ;;  %v7010_v46 = vld [vmem:[#allocation13_spill] sm:$0xff] }
 0x30a   : > { %v1822_v20 = vshll.u32 %v1821_v10, 23  ;;  %v2038_v14 = vsub.s32 4, %v7007_v30  ;;  %v1624_v3 = vsel %vm5820_vm14, %v6992_v61, %v1621_v32  ;;  %vm5889_vm6 = vcmp.le.f32.partialorder %v1744_v43, 0.7853982 }
 0x30b   : > { %vm1746_vm8 = vcmp.lt.s32.totalorder %v5229_v13, 0  ;;  %v2246_v36 = vsub.s32 4, %v5644_v51  ;;  %3972 = vcosq.f32 %v2248_v63  ;;  %v1729_v50 = vsel %vm5830_vm15, 0, %v1727_v12 }
 0x30c   : > { %v1823_v2 = vor.u32 4788187, %v1822_v20  ;;  %v1831_v42 = vsel %vm1746_vm8, %v1830_v25, %v5778_v22  ;;  %v3965_v40 = vpop.eup %3964  ;;  %v2144_v43 = vsel %vm5841_vm3, %v6991_v29, %v2141_v5  ;;  %3974 = vsinq.f32 %v2248_v63 }
 0x30d   : > { %v1629_v11 = vadd.s32 3, %v1625_v35  ;;  %v1526_v56 = vand.u32 3, %v1525_v41  ;;  %v3967_v48 = vpop.eup %3966  ;;  %3976 = vcosq.f32 %v1624_v3  ;;  %v1826_v0 = vcvt.s32.f32 %v1819_v6 }
 0x30e   : > { %v1824_v31 = vand.u32 2147483647, %v1823_v2  ;;  %v2039_v49 = vsel %vm1954_vm10, %v2038_v14, %v7007_v30  ;;  %3978 = vsinq.f32 %v1624_v3  ;;  %v1833_v22 = vsel %vm5889_vm6, 0, %v1831_v42 }
 0x30f   : > { %v1733_v23 = vadd.s32 3, %v1729_v50  ;;  %v2247_v34 = vsel %vm2162_vm1, %v2246_v36, %v5644_v51  ;;  %3980 = vcosq.f32 %v2144_v43  ;;  %v2142_v1 = vsub.s32 4, %v5575_v52 }
 0x310   : > { %v3969_v27 = vpop.eup %3968  ;;  %v1827_v7 = vmul.f32 %v1826_v0, %v1824_v31  ;;  %3982 = vsinq.f32 %v2144_v43  ;;  %v1529_v62 = vxor.u32 2147483648, %v3967_v48  ;;  %v1532_v19 = vxor.u32 2147483648, %v3965_v40 }
 0x311   : > { %v3971_v54 = vpop.eup %3970  ;;  %v2041_v16 = vsel %vm5794_vm11, 0, %v2039_v49  ;;  %v1837_v37 = vadd.s32 3, %v1833_v22  ;;  %v2249_v38 = vsel %vm5858_vm0, 0, %v2247_v34  ;;  %v1934_v25 = vsub.s32 4, %v7010_v46 }
 0x312   : > { %v1828_v47 = vxor.u32 2147483648, %v1827_v7  ;;  %v5917_v51 = vand.u32 3, %v1629_v11  ;;  %vm1531_vm10 = vcmp.eq.s32.totalorder %v1526_v56, 2  ;;  %v1734_v32 = vand.u32 3, %v1733_v23 }
 0x313   : > { %v1740_v17 = vxor.u32 2147483648, %v3969_v27  ;;  %v1737_v10 = vxor.u32 2147483648, %v3971_v54  ;;  %v2045_v5 = vadd.s32 3, %v2041_v16  ;;  %v2143_v26 = vsel %vm2058_vm9, %v2142_v1, %v5575_v52 }
 0x314   : > { %v1829_v39 = vsel %vm1746_vm8, %v1828_v47, %v1827_v7  ;;  %vm1528_vm11 = vcmp.eq.s32.totalorder %v1526_v56, 0  ;;  %v1533_v63 = vsel %vm1531_vm10, %v1532_v19, %v3967_v48  ;;  %vm1732_vm12 = vweird.f32 %v6983_v28 }
 0x315   : > { %v1832_v8 = vsel %vm5889_vm6, %v5229_v13, %v1829_v39  ;;  %v2253_v41 = vadd.s32 3, %v2249_v38  ;;  %v3973_v12 = vpop.eup %3972  ;;  %v5928_v35 = vand.u32 3, %v1837_v37  ;;  %v1530_v6 = vsel %vm1528_vm11, %v3965_v40, %v1529_v62 }
 0x316   : > { %3984 = vcosq.f32 %v1832_v8  ;;  %v1935_v20 = vsel %vm1850_vm13, %v1934_v25, %v7010_v46  ;;  %v3975_v30 = vpop.eup %3974  ;;  %vm1632_vm9 = vcmp.eq.s32.totalorder %v5917_v51, 0  ;;  %vm1635_vm14 = vcmp.eq.s32.totalorder %v5917_v51, 2 }
 0x317   : > { %3986 = vsinq.f32 %v1832_v8  ;;  %vm1736_vm5 = vcmp.eq.s32.totalorder %v1734_v32, 0  ;;  %vm1739_vm15 = vcmp.eq.s32.totalorder %v1734_v32, 2  ;;  %v2145_v52 = vsel %vm5841_vm3, 0, %v2143_v26  ;;  %v3977_v14 = vpop.eup %3976 }
 0x318   : > { %vm1527_vm1 = vcmp.lt.s32.totalorder %v1526_v56, 2  ;;  %v1738_v3 = vsel %vm1736_vm5, %v3969_v27, %v1737_v10  ;;  %v1741_v44 = vsel %vm1739_vm15, %v1740_v17, %v3971_v54  ;;  %v2046_v36 = vand.u32 3, %v2045_v5  ;;  %v3979_v2 = vpop.eup %3978 }
 0x319   : > { %v5937_v42 = vsel %vm1527_vm1, %v1530_v6, %v1533_v63  ;;  %v2049_v50 = vxor.u32 2147483648, %v5882_v24  ;;  %v2254_v40 = vand.u32 3, %v2253_v41  ;;  %v1937_v43 = vsel %vm5758_vm4, 0, %v1935_v20  ;;  %v3981_v11 = vpop.eup %3980 }
 0x31a   : > { %vm1631_vm13 = vcmp.lt.s32.totalorder %v5917_v51, 2  ;;  %vm1735_vm2 = vcmp.lt.s32.totalorder %v1734_v32, 2  ;;  %v2257_v9 = vxor.u32 2147483648, %v3975_v30  ;;  %v2260_v48 = vxor.u32 2147483648, %v3973_v12  ;;  %v3983_v56 = vpop.eup %3982 }
 0x31b   : > { %v2149_v31 = vadd.s32 3, %v2145_v52  ;;  %vm1843_vm0 = vcmp.eq.s32.totalorder %v5928_v35, 2  ;;  %v1742_v0 = vsel %vm1735_vm2, %v1738_v3, %v1741_v44  ;;  %v2052_v49 = vxor.u32 2147483648, %v5869_v4 }
 0x31c   : > { %vm2252_vm6 = vweird.f32 %v6999_v57  ;;  %v1633_v22 = vxor.u32 2147483648, %v3979_v2  ;;  %v1636_v60 = vxor.u32 2147483648, %v3977_v14  ;;  %vm1839_vm4 = vcmp.lt.s32.totalorder %v5928_v35, 2 }
 0x31d   : > { %vm2047_vm8 = vcmp.lt.s32.totalorder %v2046_v36, 2  ;;  %v1941_v23 = vadd.s32 3, %v1937_v43  ;;  %vm1628_vm10 = vweird.f32 %v6992_v61  ;;  %vm1836_vm11 = vweird.f32 %v5229_v13 }
 0x31e   : > { %vm2044_vm5 = vweird.f32 %v6979_v33  ;;  %vm2048_vm15 = vcmp.eq.s32.totalorder %v2046_v36, 0  ;;  %vm2051_vm1 = vcmp.eq.s32.totalorder %v2046_v36, 2  ;;  %vm2256_vm7 = vcmp.eq.s32.totalorder %v2254_v40, 0  ;;  %v2267_v36 = vld [vmem:[%s6795_s5 + $0x18] sm:$0xff] }
 0x31f   : > { %vm2259_vm2 = vcmp.eq.s32.totalorder %v2254_v40, 2  ;;  %v1743_v34 = vsel %vm1732_vm12, nan, %v1742_v0  ;;  %v2258_v27 = vsel %vm2256_vm7, %v3973_v12, %v2257_v9  ;;  %v2150_v1 = vand.u32 3, %v2149_v31 }
 0x320   : > { %v2261_v7 = vsel %vm2259_vm2, %v2260_v48, %v3975_v30  ;;  %v2050_v54 = vsel %vm2048_vm15, %v5869_v4, %v2049_v50  ;;  %v2053_v62 = vsel %vm2051_vm1, %v2052_v49, %v5882_v24  ;;  %v2153_v19 = vxor.u32 2147483648, %v3983_v56  ;;  %v3985_v47 = vpop.eup %3984  ;;  %v2280_v48 = vpop.permute.xlu1 %2279 }
 0x321   : > { %v2156_v16 = vxor.u32 2147483648, %v3981_v11  ;;  %v1634_v37 = vsel %vm1632_vm9, %v3977_v14, %v1633_v22  ;;  %v1637_v38 = vsel %vm1635_vm14, %v1636_v60, %v3979_v2  ;;  %vm2255_vm3 = vcmp.lt.s32.totalorder %v2254_v40, 2  ;;  %v3987_v28 = vpop.eup %3986  ;;  %v2275_v2 = vpop.permute.xlu0 %2274 }
 0x322   : > { %v1942_v46 = vand.u32 3, %v1941_v23  ;;  %v1844_v25 = vxor.u32 2147483648, %v3985_v47  ;;  %v2262_v32 = vsel %vm2255_vm3, %v2258_v27, %v2261_v7  ;;  %v1945_v17 = vxor.u32 2147483648, %v5854_v21 }
 0x323   : > { %v1948_v4 = vxor.u32 2147483648, %v5845_v18  ;;  %v1841_v39 = vxor.u32 2147483648, %v3987_v28  ;;  %v2054_v24 = vsel %vm2047_vm8, %v2050_v54, %v2053_v62  ;;  %vm2152_vm7 = vcmp.eq.s32.totalorder %v2150_v1, 0 }
 0x324   : > { %vm2155_vm12 = vcmp.eq.s32.totalorder %v2150_v1, 2  ;;  %v1638_v10 = vsel %vm1631_vm13, %v1634_v37, %v1637_v38  ;;  %v1845_v5 = vsel %vm1843_vm0, %v1844_v25, %v3987_v28  ;;  %v2154_v26 = vsel %vm2152_vm7, %v3981_v11, %v2153_v19 }
 0x325   : > { %v2157_v8 = vsel %vm2155_vm12, %v2156_v16, %v3983_v56  ;;  %vm7011_vm9 = vcmp.eq.s32.totalorder %v5928_v35, 0  ;;  %v2263_v41 = vsel %vm2252_vm6, nan, %v2262_v32  ;;  %vm1944_vm14 = vcmp.eq.s32.totalorder %v1942_v46, 0 }
 0x326   : > { %v1842_v63 = vsel %vm7011_vm9, %v3985_v47, %v1841_v39  ;;  %vm1947_vm3 = vcmp.eq.s32.totalorder %v1942_v46, 2  ;;  %v1946_v6 = vsel %vm1944_vm14, %v5845_v18, %v1945_v17  ;;  %vm2151_vm13 = vcmp.lt.s32.totalorder %v2150_v1, 2 }
 0x327   : > { %v1846_v12 = vsel %vm1839_vm4, %v1842_v63, %v1845_v5  ;;  %v1949_v51 = vsel %vm1947_vm3, %v1948_v4, %v5854_v21  ;;  %v1639_v20 = vsel %vm1628_vm10, nan, %v1638_v10  ;;  %v2055_v57 = vsel %vm2044_vm5, nan, %v2054_v24 }
 0x328   : > { %v1847_v30 = vsel %vm1836_vm11, nan, %v1846_v12  ;;  %v2158_v52 = vsel %vm2151_vm13, %v2154_v26, %v2157_v8  ;;  %vm7012_vm0 = vweird.f32 %v6982_v45  ;;  %v3753_v3 = vpack.c.bf16 %v2263_v41, %v2055_v57  ;;  %v2264_v45 = vld [vmem:[%s6795_s5] sm:$0xff] }
 0x329   : > { %v3749_v14 = vpack.c.bf16 %v1847_v30, %v1639_v20  ;;  %v1535_v35 = vsel %vm7012_vm0, nan, %v5937_v42  ;;  %vm1943_vm6 = vcmp.lt.s32.totalorder %v1942_v46, 2  ;;  %vm2148_vm4 = vweird.f32 %v6991_v29  ;;  %v2265_v29 = vld [vmem:[%s6795_s5 + $0x8] sm:$0xff] }
 0x32a   : > { %v3751_v18 = vpack.c.bf16 %v1743_v34, %v1535_v35  ;;  %v1950_v21 = vsel %vm1943_vm6, %v1946_v6, %v1949_v51  ;;  %v2159_v61 = vsel %vm2148_vm4, nan, %v2158_v52  ;;  %vm1940_vm8 = vweird.f32 %v6975_v53  ;;  %v2266_v53 = vld [vmem:[%s6795_s5 + $0x10] sm:$0xff] }
 0x32b   : > { %3750 = vmatprep.subr.bf16.mxu1 %v3749_v14  ;;  %v1951_v13 = vsel %vm1940_vm8, nan, %v1950_v21  ;;  %vm7013_vm10 = vcmask 261120   ;;  %v7014_v44 = vmov 0.0   ;;  %v7018_v52 = vmov 920167782  }
 0x32c   : > { %3752 = vmatpush1.bf16.msra.mxu1 %v3751_v18  ;;  %v3755_v33 = vpack.c.bf16 %v2159_v61, %v1951_v13  ;;  %vm7015_vm11 = vmmov %vm7013_vm10  ;;  %v7019_v13 = vmov 1326507024  }
 0x32d   : > { %3754 = vmatprep.subr.bf16.mxu1 %v3753_v3  ;;  %vm7016_vm5 = vmmov %vm7013_vm10 }
 0x32e   : > { %vm7017_vm15 = vmmov %vm7016_vm5 }
 0x330   : > { %3756 = vmatpush1.bf16.msra.mxu1 %v3755_v33 }
 0x333   : > { %3690 = vmatmul.mubr.msk.f32.vlgmr.msra.gmra.mrb[0].mxu1 %vm7013_vm10, %v2264_v45 }
 0x334   : > { %2374 = vmatprep.mubr.f32.mxu1 %v7014_v44 }
 0x337   : > { %3691 = vmatmul.mubr.msk.f32.gmra.mrb[2].mxu1 %vm7015_vm11, %v2265_v29 }
 0x338   : > { %2380 = vmatprep.mubr.f32.mxu1 %v7014_v44 }
 0x33b   : > { %3692 = vmatmul.mubr.msk.f32.gmra.mrb[4].mxu1 %vm7016_vm5, %v2266_v53 }
 0x33c   : > { %2386 = vmatprep.mubr.f32.mxu1 %v7014_v44 }
 0x33f   : > { %3693 = vmatmul.mubr.msk.f32.gmra.mrb[6].mxu1 %vm7017_vm15, %v2267_v36 }
 0x406   : > { %v2370_v42 = vpop.f32.mrb[0].mxu1 }
 0x407   : > { %v6005_v50 = vadd.f32 %v2370_v42, %v2275_v2  ;;  %v2372_v40 = vpop.f32.mrb[1].mxu1 }
 0x408   : > { %v6007_v43 = vadd.f32 %v2372_v40, %v2275_v2 }
 0x409   : > { %v2393_v11 = vand.u32 2147483647, %v6005_v50  ;;  %v2396_v9 = vand.u32 2139095040, %v6005_v50 }
 0x40a   : > { %v2497_v31 = vand.u32 2147483647, %v6007_v43  ;;  %v2500_v56 = vand.u32 2139095040, %v6007_v43  ;;  %v2376_v0 = vpop.f32.mrb[2].mxu1 }
 0x40b   : > { %v2397_v49 = vshrl.u32 %v2396_v9, 23  ;;  %v6013_v22 = vadd.f32 %v2376_v0, %v2280_v48  ;;  %v2378_v60 = vpop.f32.mrb[3].mxu1  ;;  %v2400_v23 = vand.u32 8388607, %v2393_v11 }
 0x40c   : > { %v2501_v34 = vshrl.u32 %v2500_v56, 23  ;;  %v2504_v27 = vand.u32 8388607, %v2497_v31  ;;  %v6026_v24 = vadd.f32 %v2378_v60, %v2280_v48 }
 0x40d   : > { %v3694_v7 = vadd.s32 4294967169, %v2397_v49  ;;  %v2604_v54 = vand.u32 2139095040, %v6013_v22  ;;  %v2401_v16 = vor.u32 8388608, %v2400_v23  ;;  %v6887_v63 = vand.u32 2147483647, %v6013_v22 }
 0x40e   : > { %v3698_v1 = vadd.s32 4294967169, %v2501_v34  ;;  %v6020_v62 = vpop.f32.mrb[4].mxu1  ;;  %v2505_v47 = vor.u32 8388608, %v2504_v27 }
 0x40f   : > { %v2403_v19 = vadd.s32 1, %v3694_v7  ;;  %v2605_v38 = vshrl.u32 %v2604_v54, 23  ;;  %v6022_v46 = vpop.f32.mrb[5].mxu1  ;;  %v6030_v5 = vshll.u32 %v2401_v16, 8 }
 0x410   : > { %v2507_v37 = vadd.s32 1, %v3698_v1  ;;  %v6034_v8 = vshll.u32 %v2505_v47, 8 }
 0x411   : > { %vm2404_vm1 = vcmp.gt.s32.totalorder %v2403_v19, 0  ;;  %v3702_v25 = vadd.s32 4294967169, %v2605_v38 }
 0x412   : > { %v2405_v28 = vsel %vm2404_vm1, %v2403_v19, 0  ;;  %vm2508_vm2 = vcmp.gt.s32.totalorder %v2507_v37, 0  ;;  %v6024_v32 = vpop.f32.mrb[6].mxu1 }
 0x413   : > { %v2406_v17 = vshrl.u32 %v2405_v28, 5  ;;  %v2407_v4 = vand.u32 31, %v2405_v28  ;;  %v2509_v39 = vsel %vm2508_vm2, %v2507_v37, 0  ;;  %v6028_v10 = vpop.f32.mrb[7].mxu1  ;;  %v6038_v51 = vadd.s32 1, %v3702_v25 }
 0x414   : > { %v6032_v26 = vshrl.u32 %v2509_v39, 5  ;;  %v2511_v6 = vand.u32 31, %v2509_v39 }
 0x415   : > { %v2408_v41 = vsub.s32 32, %v2407_v4  ;;  %v2410_v12 = vshll.u32 %v6912_v55, %v2407_v4  ;;  %v2413_v20 = vshll.u32 %v6909_v58, %v2407_v4  ;;  %v2416_v30 = vshll.u32 %v6910_v59, %v2407_v4 }
 0x416   : > { %v2419_v57 = vshll.u32 %v6908_v15, %v2407_v4  ;;  %v2422_v14 = vshll.u32 %v7018_v52, %v2407_v4  ;;  %vm2425_vm7 = vcmp.lt.s32.totalorder %v2406_v17, 1  ;;  %vm2426_vm12 = vcmp.lt.s32.totalorder %v2406_v17, 2 }
 0x417   : > { %v2411_v35 = vshrl.u32 %v6909_v58, %v2408_v41  ;;  %v2414_v3 = vshrl.u32 %v6910_v59, %v2408_v41  ;;  %v2417_v18 = vshrl.u32 %v6908_v15, %v2408_v41  ;;  %v2409_v21 = vshrl.u32 %v6912_v55, %v2408_v41 }
 0x418   : > { %v2420_v61 = vshrl.u32 %v7018_v52, %v2408_v41  ;;  %v2423_v33 = vshrl.u32 %v7019_v13, %v2408_v41  ;;  %v2512_v53 = vsub.s32 32, %v2511_v6  ;;  %vm2427_vm9 = vcmp.lt.s32.totalorder %v2406_v17, 3 }
 0x419   : > { %v2412_v45 = vor.u32 %v2411_v35, %v2410_v12  ;;  %v2415_v44 = vor.u32 %v2414_v3, %v2413_v20  ;;  %v2418_v29 = vor.u32 %v2417_v18, %v2416_v30  ;;  %vm2428_vm14 = vcmp.lt.s32.totalorder %v2406_v17, 4 }
 0x41a   : > { %v2421_v36 = vor.u32 %v2420_v61, %v2419_v57  ;;  %v2424_v2 = vor.u32 %v2423_v33, %v2422_v14  ;;  %v2514_v60 = vshll.u32 %v6912_v55, %v2511_v6  ;;  %v2515_v27 = vshrl.u32 %v6909_v58, %v2512_v53 }
 0x41b   : > { %v2429_v42 = vsel %vm2425_vm7, %v2409_v21, %v2412_v45  ;;  %v2430_v40 = vsel %vm2428_vm14, %v2418_v29, 2102212464  ;;  %v2433_v9 = vsel %vm2425_vm7, %v2412_v45, %v2415_v44  ;;  %v2437_v48 = vsel %vm2425_vm7, %v2415_v44, %v2418_v29 }
 0x41c   : > { %v2431_v56 = vsel %vm2427_vm9, %v2415_v44, %v2430_v40  ;;  %v2434_v0 = vsel %vm2428_vm14, %v2421_v36, 920167782  ;;  %v2438_v49 = vsel %vm2428_vm14, %v2424_v2, 1326507024  ;;  %v2517_v7 = vshll.u32 %v6909_v58, %v2511_v6 }
 0x41d   : > { %v2435_v23 = vsel %vm2427_vm9, %v2418_v29, %v2434_v0  ;;  %v2439_v34 = vsel %vm2427_vm9, %v2421_v36, %v2438_v49  ;;  %v2432_v1 = vsel %vm2426_vm12, %v2429_v42, %v2431_v56  ;;  %v2518_v16 = vshrl.u32 %v6910_v59, %v2512_v53 }
 0x41e   : > { %v2436_v54 = vsel %vm2426_vm12, %v2433_v9, %v2435_v23  ;;  %v2440_v19 = vsel %vm2426_vm12, %v2437_v48, %v2439_v34  ;;  %v2516_v25 = vor.u32 %v2515_v27, %v2514_v60  ;;  %v2520_v39 = vshll.u32 %v6910_v59, %v2511_v6 }
 0x41f   : > { %v6061_v47 = vmul.u32.u64.low %v6030_v5, %v2440_v19  ;;  %v6062_v37 = vmul.u32.u64.high %v6030_v5, %v2440_v19, %v6061_v47  ;;  %v6065_v38 = vmul.u32.u64.low %v6030_v5, %v2436_v54  ;;  %v6066_v28 = vmul.u32.u64.high %v6030_v5, %v2436_v54, %v6065_v38 }
 0x420   : > { %v2519_v4 = vor.u32 %v2518_v16, %v2517_v7  ;;  %v2521_v41 = vshrl.u32 %v6908_v15, %v2512_v53  ;;  %v2513_v17 = vshrl.u32 %v6912_v55, %v2512_v53  ;;  %v2523_v12 = vshll.u32 %v6908_v15, %v2511_v6 }
 0x421   : > { %v2524_v20 = vshrl.u32 %v7018_v52, %v2512_v53  ;;  %v2527_v30 = vshrl.u32 %v7019_v13, %v2512_v53  ;;  %v2448_v57 = vmul.u32 %v6030_v5, %v2432_v1  ;;  %v2526_v35 = vshll.u32 %v7018_v52, %v2511_v6 }
 0x422   : > { %v2522_v14 = vor.u32 %v2521_v41, %v2520_v39  ;;  %vm2529_vm3 = vcmp.lt.s32.totalorder %v6032_v26, 1  ;;  %vm2450_vm13 = vc.u32 %v6062_v37, %v6065_v38  ;;  %v2451_v3 = vadd.s32 1, %v6066_v28 }
 0x423   : > { %v2525_v18 = vor.u32 %v2524_v20, %v2523_v12  ;;  %vm2530_vm0 = vcmp.lt.s32.totalorder %v6032_v26, 2  ;;  %v2528_v21 = vor.u32 %v2527_v30, %v2526_v35  ;;  %vm2531_vm6 = vcmp.lt.s32.totalorder %v6032_v26, 3 }
 0x424   : > { %vm2532_vm4 = vcmp.lt.s32.totalorder %v6032_v26, 4  ;;  %v2537_v61 = vsel %vm2529_vm3, %v2516_v25, %v2519_v4  ;;  %v2452_v5 = vsel %vm2450_vm13, %v2451_v3, %v6066_v28  ;;  %v2541_v45 = vsel %vm2529_vm3, %v2519_v4, %v2522_v14 }
 0x425   : > { %v2534_v33 = vsel %vm2532_vm4, %v2522_v14, 2102212464  ;;  %v2538_v6 = vsel %vm2532_vm4, %v2525_v18, 920167782  ;;  %v2453_v44 = vadd.s32 %v2452_v5, %v2448_v57  ;;  %v2533_v29 = vsel %vm2529_vm3, %v2513_v17, %v2516_v25 }
 0x426   : > { %v2539_v53 = vsel %vm2531_vm6, %v2522_v14, %v2538_v6  ;;  %v2542_v36 = vsel %vm2532_vm4, %v2528_v21, 1326507024  ;;  %v2535_v2 = vsel %vm2531_vm6, %v2519_v4, %v2534_v33  ;;  %vm2612_vm8 = vcmp.gt.s32.totalorder %v6038_v51, 0 }
 0x427   : > { %v2540_v42 = vsel %vm2530_vm0, %v2537_v61, %v2539_v53  ;;  %v2543_v40 = vsel %vm2531_vm6, %v2525_v18, %v2542_v36  ;;  %v2454_v9 = vadd.s32 536870912, %v2453_v44  ;;  %v2608_v23 = vand.u32 8388607, %v6887_v63 }
 0x428   : > { %v2544_v48 = vsel %vm2530_vm0, %v2541_v45, %v2543_v40  ;;  %v6091_v56 = vmul.u32.u64.low %v6034_v8, %v2540_v42  ;;  %v6092_v0 = vmul.u32.u64.high %v6034_v8, %v2540_v42, %v6091_v56  ;;  %v2613_v34 = vsel %vm2612_vm8, %v6038_v51, 0 }
 0x429   : > { %v6096_v49 = vmul.u32.u64.low %v6034_v8, %v2544_v48  ;;  %v6097_v60 = vmul.u32.u64.high %v6034_v8, %v2544_v48, %v6096_v49  ;;  %v6102_v27 = vshrl.u32 %v2454_v9, 30  ;;  %v2536_v7 = vsel %vm2530_vm0, %v2533_v29, %v2535_v2 }
 0x42a   : > { %v2615_v1 = vand.u32 31, %v2613_v34  ;;  %v2708_v54 = vand.u32 2139095040, %v6026_v24  ;;  %v2555_v16 = vadd.s32 1, %v6092_v0  ;;  %v2552_v28 = vmul.u32 %v6034_v8, %v2536_v7 }
 0x42b   : > { %v2456_v19 = vshll.u32 %v6102_v27, 30  ;;  %vm2554_vm10 = vc.u32 %v6097_v60, %v6091_v56  ;;  %v2609_v25 = vor.u32 8388608, %v2608_v23  ;;  %v2614_v30 = vshrl.u32 %v2613_v34, 5 }
 0x42c   : > { %v2616_v47 = vsub.s32 32, %v2615_v1  ;;  %v2556_v4 = vsel %vm2554_vm10, %v2555_v16, %v6092_v0  ;;  %v2709_v26 = vshrl.u32 %v2708_v54, 23  ;;  %v2618_v41 = vshll.u32 %v6912_v55, %v2615_v1 }
 0x42d   : > { %v6112_v51 = vsub.s32 %v2453_v44, %v2456_v19  ;;  %v2557_v39 = vadd.s32 %v2556_v4, %v2552_v28  ;;  %v2621_v8 = vshll.u32 %v6909_v58, %v2615_v1  ;;  %v2624_v3 = vshll.u32 %v6910_v59, %v2615_v1 }
 0x42e   : > { %v2619_v17 = vshrl.u32 %v6909_v58, %v2616_v47  ;;  %v2622_v12 = vshrl.u32 %v6910_v59, %v2616_v47  ;;  %v2625_v57 = vshrl.u32 %v6908_v15, %v2616_v47  ;;  %v2649_v18 = vshll.u32 %v2609_v25, 8 }
 0x42f   : > { %v2459_v20 = vsub.s32 0, %v6112_v51  ;;  %v2558_v14 = vadd.s32 536870912, %v2557_v39  ;;  %v2627_v5 = vshll.u32 %v6908_v15, %v2615_v1  ;;  %v2628_v33 = vshrl.u32 %v7018_v52, %v2616_v47 }
 0x430   : > { %v2620_v35 = vor.u32 %v2619_v17, %v2618_v41  ;;  %v2623_v61 = vor.u32 %v2622_v12, %v2621_v8  ;;  %v2626_v45 = vor.u32 %v2625_v57, %v2624_v3  ;;  %v2630_v44 = vshll.u32 %v7018_v52, %v2615_v1 }
 0x431   : > { %v3695_v21 = vmin.u32 %v2459_v20, %v6112_v51  ;;  %v6125_v6 = vshrl.u32 %v2558_v14, 30  ;;  %v2631_v29 = vshrl.u32 %v7019_v13, %v2616_v47  ;;  %v2629_v36 = vor.u32 %v2628_v33, %v2627_v5 }
 0x432   : > { %vm2633_vm11 = vcmp.lt.s32.totalorder %v2614_v30, 1  ;;  %v3706_v2 = vadd.s32 4294967169, %v2709_v26  ;;  %vm2634_vm5 = vcmp.lt.s32.totalorder %v2614_v30, 2  ;;  %vm2636_vm15 = vcmp.lt.s32.totalorder %v2614_v30, 4 }
 0x433   : > { %v2461_v53 = vclz %v3695_v21  ;;  %v2560_v42 = vshll.u32 %v6125_v6, 30  ;;  %v2632_v40 = vor.u32 %v2631_v29, %v2630_v44  ;;  %vm2635_vm1 = vcmp.lt.s32.totalorder %v2614_v30, 3 }
 0x434   : > { %v2641_v48 = vsel %vm2633_vm11, %v2620_v35, %v2623_v61  ;;  %v2642_v0 = vsel %vm2636_vm15, %v2629_v36, 920167782  ;;  %v2638_v23 = vsel %vm2636_vm15, %v2626_v45, 2102212464  ;;  %v2645_v7 = vsel %vm2633_vm11, %v2623_v61, %v2626_v45 }
 0x435   : > { %v3696_v9 = vadd.s32 4294967294, %v2461_v53  ;;  %v6131_v49 = vsub.s32 %v2557_v39, %v2560_v42  ;;  %v2643_v34 = vsel %vm2635_vm1, %v2626_v45, %v2642_v0  ;;  %v2617_v1 = vshrl.u32 %v6912_v55, %v2616_v47 }
 0x436   : > { %v2644_v54 = vsel %vm2634_vm5, %v2641_v48, %v2643_v34  ;;  %v2646_v19 = vsel %vm2636_vm15, %v2632_v40, 1326507024  ;;  %v2715_v4 = vadd.s32 1, %v3706_v2  ;;  %v2639_v41 = vsel %vm2635_vm1, %v2623_v61, %v2638_v23  ;;  %v2285_v48 = vpop.permute.xlu0 %2284 }
 0x437   : > { %vm3697_vm2 = vcmp.lt.s32.totalorder %v3696_v9, 0  ;;  %v2563_v28 = vsub.s32 0, %v6131_v49  ;;  %v2647_v25 = vsel %vm2635_vm1, %v2629_v36, %v2646_v19  ;;  %v2637_v39 = vsel %vm2633_vm11, %v2617_v1, %v2620_v35 }
 0x438   : > { %v2464_v16 = vsel %vm3697_vm2, 0, %v3696_v9  ;;  %v2648_v17 = vsel %vm2634_vm5, %v2645_v7, %v2647_v25  ;;  %vm2716_vm7 = vcmp.gt.s32.totalorder %v2715_v4, 0  ;;  %v6886_v3 = vand.u32 2147483647, %v6026_v24 }
 0x439   : > { %v2469_v26 = vsub.s32 4294967266, %v2464_v16  ;;  %v3699_v12 = vmin.u32 %v2563_v28, %v6131_v49  ;;  %v6143_v20 = vmul.u32.u64.low %v2649_v18, %v2648_v17  ;;  %v6144_v47 = vmul.u32.u64.high %v2649_v18, %v2648_v17, %v6143_v20 }
 0x43a   : > { %v6146_v8 = vmul.u32.u64.low %v2649_v18, %v2644_v54  ;;  %v6147_v57 = vmul.u32.u64.high %v2649_v18, %v2644_v54, %v6146_v8  ;;  %v2717_v21 = vsel %vm2716_vm7, %v2715_v4, 0  ;;  %v2465_v5 = vsub.s32 32, %v2464_v16 }
 0x43b   : > { %v2565_v14 = vclz %v3699_v12  ;;  %v2470_v35 = vadd.s32 127, %v2469_v26  ;;  %v2640_v61 = vsel %vm2634_vm5, %v2637_v39, %v2639_v41  ;;  %v2719_v33 = vand.u32 31, %v2717_v21 }
 0x43c   : > { %vm2658_vm12 = vc.u32 %v6144_v47, %v6146_v8  ;;  %v2449_v44 = vadd.s32 %v6065_v38, %v6062_v37  ;;  %v2659_v29 = vadd.s32 1, %v6147_v57  ;;  %v2656_v53 = vmul.u32 %v2649_v18, %v2640_v61 }
 0x43d   : > { %v3700_v45 = vadd.s32 4294967294, %v2565_v14  ;;  %v2712_v36 = vand.u32 8388607, %v6886_v3  ;;  %v2471_v42 = vshll.u32 %v2470_v35, 23  ;;  %v2720_v40 = vsub.s32 32, %v2719_v33 }
 0x43e   : > { %v2467_v2 = vshrl.u32 %v2449_v44, %v2465_v5  ;;  %v2660_v30 = vsel %vm2658_vm12, %v2659_v29, %v6147_v57  ;;  %v2466_v0 = vshll.u32 %v6112_v51, %v2464_v16  ;;  %v6162_v37 = vadd.f32 %v6020_v62, %v2285_v48 }
 0x43f   : > { %vm3701_vm9 = vcmp.lt.s32.totalorder %v3700_v45, 0  ;;  %v2661_v9 = vadd.s32 %v2660_v30, %v2656_v53  ;;  %v2713_v7 = vor.u32 8388608, %v2712_v36  ;;  %v2472_v18 = vor.u32 4788187, %v2471_v42 }
 0x440   : > { %v2568_v23 = vsel %vm3701_vm9, 0, %v3700_v45  ;;  %v2468_v38 = vor.u32 %v2467_v2, %v2466_v0  ;;  %v2723_v1 = vshrl.u32 %v6909_v58, %v2720_v40  ;;  %v2726_v54 = vshrl.u32 %v6910_v59, %v2720_v40 }
 0x441   : > { %v2662_v34 = vadd.s32 536870912, %v2661_v9  ;;  %v2573_v19 = vsub.s32 4294967266, %v2568_v23  ;;  %v2729_v25 = vshrl.u32 %v6908_v15, %v2720_v40  ;;  %v2732_v4 = vshrl.u32 %v7018_v52, %v2720_v40 }
 0x442   : > { %v2722_v51 = vshll.u32 %v6912_v55, %v2719_v33  ;;  %v2725_v16 = vshll.u32 %v6909_v58, %v2719_v33  ;;  %v2731_v62 = vshll.u32 %v6908_v15, %v2719_v33  ;;  %v2735_v26 = vshrl.u32 %v7019_v13, %v2720_v40 }
 0x443   : > { %v6166_v28 = vshrl.u32 %v2662_v34, 30  ;;  %v2718_v41 = vshrl.u32 %v2717_v21, 5  ;;  %v2728_v17 = vshll.u32 %v6910_v59, %v2719_v33  ;;  %v6177_v12 = vadd.f32 %v6022_v46, %v2285_v48 }
 0x444   : > { %v2724_v20 = vor.u32 %v2723_v1, %v2722_v51  ;;  %v2727_v57 = vor.u32 %v2726_v54, %v2725_v16  ;;  %v2733_v14 = vor.u32 %v2732_v4, %v2731_v62  ;;  %v2734_v5 = vshll.u32 %v7018_v52, %v2719_v33 }
 0x445   : > { %v2664_v39 = vshll.u32 %v6166_v28, 30  ;;  %v2553_v35 = vadd.s32 %v6091_v56, %v6097_v60  ;;  %v2574_v61 = vadd.s32 127, %v2573_v19  ;;  %v2730_v44 = vor.u32 %v2729_v25, %v2728_v17 }
 0x446   : > { %v2473_v29 = vand.u32 2147483647, %v2472_v18  ;;  %v2475_v53 = vcvt.s32.f32 %v2468_v38  ;;  %v2736_v21 = vor.u32 %v2735_v26, %v2734_v5  ;;  %v2753_v36 = vshll.u32 %v2713_v7, 8 }
 0x447   : > { %v6182_v45 = vsub.s32 %v2661_v9, %v2664_v39  ;;  %v2569_v2 = vsub.s32 32, %v2568_v23  ;;  %vm2737_vm14 = vcmp.lt.s32.totalorder %v2718_v41, 1  ;;  %vm2740_vm3 = vcmp.lt.s32.totalorder %v2718_v41, 4 }
 0x448   : > { %v2721_v42 = vshrl.u32 %v6912_v55, %v2720_v40  ;;  %vm2739_vm13 = vcmp.lt.s32.totalorder %v2718_v41, 3  ;;  %v2745_v33 = vsel %vm2737_vm14, %v2724_v20, %v2727_v57  ;;  %v2746_v30 = vsel %vm2740_vm3, %v2733_v14, 920167782 }
 0x449   : > { %v2667_v46 = vsub.s32 0, %v6182_v45  ;;  %v2575_v56 = vshll.u32 %v2574_v61, 23  ;;  %vm2738_vm0 = vcmp.lt.s32.totalorder %v2718_v41, 2  ;;  %v2742_v60 = vsel %vm2740_vm3, %v2730_v44, 2102212464 }
 0x44a   : > { %v2747_v9 = vsel %vm2739_vm13, %v2730_v44, %v2746_v30  ;;  %v2749_v34 = vsel %vm2737_vm14, %v2727_v57, %v2730_v44  ;;  %v2750_v7 = vsel %vm2740_vm3, %v2736_v21, 1326507024  ;;  %v2570_v38 = vshll.u32 %v6131_v49, %v2568_v23 }
 0x44b   : > { %v3703_v48 = vmin.u32 %v2667_v46, %v6182_v45  ;;  %v2748_v0 = vsel %vm2738_vm0, %v2745_v33, %v2747_v9  ;;  %v2571_v18 = vshrl.u32 %v2553_v35, %v2569_v2  ;;  %v2741_v40 = vsel %vm2737_vm14, %v2721_v42, %v2724_v20  ;;  %v6217_v9 = vpop.permute.xlu1 %2289 }
 0x44c   : > { %v2751_v1 = vsel %vm2739_vm13, %v2733_v14, %v2750_v7  ;;  %v2743_v54 = vsel %vm2739_vm13, %v2727_v57, %v2742_v60  ;;  %v6193_v25 = vmul.u32.u64.low %v2753_v36, %v2748_v0  ;;  %v6194_v4 = vmul.u32.u64.high %v2753_v36, %v2748_v0, %v6193_v25 }
 0x44d   : > { %v2752_v19 = vsel %vm2738_vm0, %v2749_v34, %v2751_v1  ;;  %v2476_v51 = vmul.f32 %v2475_v53, %v2473_v29  ;;  %v2576_v16 = vor.u32 4788187, %v2575_v56  ;;  %v2669_v39 = vclz %v3703_v48 }
 0x44e   : > { %v6197_v62 = vmul.u32.u64.low %v2753_v36, %v2752_v19  ;;  %v6198_v26 = vmul.u32.u64.high %v2753_v36, %v2752_v19, %v6197_v62  ;;  %v2812_v17 = vand.u32 2139095040, %v6162_v37  ;;  %v2572_v49 = vor.u32 %v2571_v18, %v2570_v38 }
 0x44f   : > { %v2744_v23 = vsel %vm2738_vm0, %v2741_v40, %v2743_v54  ;;  %v2916_v20 = vand.u32 2139095040, %v6177_v12  ;;  %v2763_v57 = vadd.s32 1, %v6194_v4  ;;  %v2477_v5 = vxor.u32 2147483648, %v2476_v51 }
 0x450   : > { %v2813_v14 = vshrl.u32 %v2812_v17, 23  ;;  %v2479_v35 = vsub.s32 4, %v6102_v27  ;;  %v2577_v61 = vand.u32 2147483647, %v2576_v16  ;;  %v6885_v44 = vand.u32 2147483647, %v6162_v37 }
 0x451   : > { %v3704_v29 = vadd.s32 4294967294, %v2669_v39  ;;  %v2760_v53 = vmul.u32 %v2753_v36, %v2744_v23  ;;  %vm2762_vm6 = vc.u32 %v6198_v26, %v6193_v25  ;;  %v2579_v2 = vcvt.s32.f32 %v2572_v49 }
 0x452   : > { %v3710_v21 = vadd.s32 4294967169, %v2813_v14  ;;  %v2764_v41 = vsel %vm2762_vm6, %v2763_v57, %v6194_v4  ;;  %v2917_v46 = vshrl.u32 %v2916_v20, 23  ;;  %vm2395_vm4 = vcmp.lt.s32.totalorder %v6005_v50, 0 }
 0x453   : > { %v2765_v42 = vadd.s32 %v2764_v41, %v2760_v53  ;;  %v2478_v30 = vsel %vm2395_vm4, %v2477_v5, %v2476_v51  ;;  %v6211_v56 = vsel %vm2395_vm4, %v2479_v35, %v6102_v27  ;;  %v6213_v60 = vmul.f32 %v2579_v2, %v2577_v61 }
 0x454   : > { %v2819_v33 = vadd.s32 1, %v3710_v21  ;;  %v2816_v36 = vand.u32 8388607, %v6885_v44  ;;  %vm3705_vm8 = vcmp.lt.s32.totalorder %v3704_v29, 0  ;;  %v3714_v0 = vadd.s32 4294967169, %v2917_v46 }
 0x455   : > { %v2766_v48 = vadd.s32 536870912, %v2765_v42  ;;  %vm6221_vm11 = vcmp.le.f32.partialorder %v2393_v11, 0.7853982  ;;  %v6227_v27 = vadd.f32 %v6024_v32, %v6217_v9  ;;  %v6234_v18 = vadd.s32 %v6146_v8, %v6144_v47 }
 0x456   : > { %vm2820_vm10 = vcmp.gt.s32.totalorder %v2819_v33, 0  ;;  %v6241_v11 = vsel %vm6221_vm11, %v6005_v50, %v2478_v30  ;;  %v2581_v54 = vxor.u32 2147483648, %v6213_v60  ;;  %v6244_v32 = vsel %vm3705_vm8, 0, %v3704_v29 }
 0x457   : > { %v2821_v7 = vsel %vm2820_vm10, %v2819_v33, 0  ;;  %v6236_v40 = vshrl.u32 %v2766_v48, 30  ;;  %v2817_v51 = vor.u32 8388608, %v2816_v36  ;;  %v2923_v47 = vadd.s32 1, %v3714_v0 }
 0x458   : > { %v2823_v1 = vand.u32 31, %v2821_v7  ;;  %v2822_v8 = vshrl.u32 %v2821_v7, 5  ;;  %v6884_v2 = vand.u32 2147483647, %v6177_v12  ;;  %vm2499_vm5 = vcmp.lt.s32.totalorder %v6007_v43, 0 }
 0x459   : > { %v2768_v4 = vshll.u32 %v6236_v40, 30  ;;  %v2677_v41 = vsub.s32 4294967266, %v6244_v32  ;;  %v2857_v36 = vshll.u32 %v2817_v51, 8  ;;  %vm2924_vm1 = vcmp.gt.s32.totalorder %v2923_v47, 0 }
 0x45a   : > { %v2824_v16 = vsub.s32 32, %v2823_v1  ;;  %v2826_v62 = vshll.u32 %v6912_v55, %v2823_v1  ;;  %v2829_v39 = vshll.u32 %v6909_v58, %v2823_v1  ;;  %v2832_v17 = vshll.u32 %v6910_v59, %v2823_v1 }
 0x45b   : > { %v6251_v49 = vsub.s32 %v2765_v42, %v2768_v4  ;;  %v2835_v57 = vshll.u32 %v6908_v15, %v2823_v1  ;;  %v2838_v35 = vshll.u32 %v7018_v52, %v2823_v1  ;;  %vm2841_vm15 = vcmp.lt.s32.totalorder %v2822_v8, 1 }
 0x45c   : > { %v2827_v23 = vshrl.u32 %v6909_v58, %v2824_v16  ;;  %v2830_v20 = vshrl.u32 %v6910_v59, %v2824_v16  ;;  %v2833_v14 = vshrl.u32 %v6908_v15, %v2824_v16  ;;  %v2836_v5 = vshrl.u32 %v7018_v52, %v2824_v16 }
 0x45d   : > { %v2839_v61 = vshrl.u32 %v7019_v13, %v2824_v16  ;;  %v2771_v29 = vsub.s32 0, %v6251_v49  ;;  %v2825_v48 = vshrl.u32 %v6912_v55, %v2824_v16  ;;  %vm2842_vm2 = vcmp.lt.s32.totalorder %v2822_v8, 2 }
 0x45e   : > { %v2828_v53 = vor.u32 %v2827_v23, %v2826_v62  ;;  %v2831_v21 = vor.u32 %v2830_v20, %v2829_v39  ;;  %v2834_v46 = vor.u32 %v2833_v14, %v2832_v17  ;;  %v2837_v42 = vor.u32 %v2836_v5, %v2835_v57 }
 0x45f   : > { %v2840_v33 = vor.u32 %v2839_v61, %v2838_v35  ;;  %v3707_v30 = vmin.u32 %v2771_v29, %v6251_v49  ;;  %vm2844_vm7 = vcmp.lt.s32.totalorder %v2822_v8, 4  ;;  %vm2843_vm12 = vcmp.lt.s32.totalorder %v2822_v8, 3 }
 0x460   : > { %v2849_v0 = vsel %vm2841_vm15, %v2828_v53, %v2831_v21  ;;  %v2846_v1 = vsel %vm2844_vm7, %v2834_v46, 2102212464  ;;  %v2850_v4 = vsel %vm2844_vm7, %v2837_v42, 920167782  ;;  %v2845_v62 = vsel %vm2841_vm15, %v2825_v48, %v2828_v53 }
 0x461   : > { %v2773_v7 = vclz %v3707_v30  ;;  %v2851_v39 = vsel %vm2843_vm12, %v2834_v46, %v2850_v4  ;;  %v2853_v23 = vsel %vm2841_vm15, %v2831_v21, %v2834_v46  ;;  %v2854_v17 = vsel %vm2844_vm7, %v2840_v33, 1326507024 }
 0x462   : > { %v2847_v57 = vsel %vm2843_vm12, %v2831_v21, %v2846_v1  ;;  %v2852_v14 = vsel %vm2842_vm2, %v2849_v0, %v2851_v39  ;;  %v2855_v5 = vsel %vm2843_vm12, %v2837_v42, %v2854_v17  ;;  %v2678_v51 = vadd.s32 127, %v2677_v41 }
 0x463   : > { %v3708_v20 = vadd.s32 4294967294, %v2773_v7  ;;  %v2856_v35 = vsel %vm2842_vm2, %v2853_v23, %v2855_v5  ;;  %v6268_v16 = vmul.u32.u64.low %v2857_v36, %v2852_v14  ;;  %v6269_v61 = vmul.u32.u64.high %v2857_v36, %v2852_v14, %v6268_v16 }
 0x464   : > { %v6272_v29 = vmul.u32.u64.low %v2857_v36, %v2856_v35  ;;  %v6273_v30 = vmul.u32.u64.high %v2857_v36, %v2856_v35, %v6272_v29  ;;  %v2925_v53 = vsel %vm2924_vm1, %v2923_v47, 0  ;;  %v2848_v21 = vsel %vm2842_vm2, %v2845_v62, %v2847_v57 }
 0x465   : > { %vm3709_vm9 = vcmp.lt.s32.totalorder %v3708_v20, 0  ;;  %v2920_v42 = vand.u32 8388607, %v6884_v2  ;;  %v2927_v41 = vand.u32 31, %v2925_v53  ;;  %v6284_v33 = vsel %vm2499_vm5, %v2581_v54, %v6213_v60 }
 0x466   : > { %v6276_v46 = vsel %vm3709_vm9, 0, %v3708_v20  ;;  %v2673_v48 = vsub.s32 32, %v6244_v32  ;;  %v3020_v7 = vand.u32 2139095040, %v6227_v27  ;;  %v2867_v1 = vadd.s32 1, %v6269_v61 }
 0x467   : > { %v2781_v8 = vsub.s32 4294967266, %v6276_v46  ;;  %v2928_v4 = vsub.s32 32, %v2927_v41  ;;  %v2679_v62 = vshll.u32 %v2678_v51, 23  ;;  %v2761_v39 = vadd.s32 %v6193_v25, %v6198_v26 }
 0x468   : > { %v2864_v60 = vmul.u32 %v2857_v36, %v2848_v21  ;;  %vm2866_vm14 = vc.u32 %v6273_v30, %v6268_v16  ;;  %v2921_v23 = vor.u32 8388608, %v2920_v42  ;;  %v2777_v57 = vsub.s32 32, %v6276_v46 }
 0x469   : > { %v2868_v54 = vsel %vm2866_vm14, %v2867_v1, %v6269_v61  ;;  %v2931_v17 = vshrl.u32 %v6909_v58, %v2928_v4  ;;  %v2934_v20 = vshrl.u32 %v6910_v59, %v2928_v4  ;;  %v2926_v5 = vshrl.u32 %v2925_v53, 5 }
 0x46a   : > { %v2869_v14 = vadd.s32 %v2868_v54, %v2864_v60  ;;  %v3021_v35 = vshrl.u32 %v3020_v7, 23  ;;  %v2782_v51 = vadd.s32 127, %v2781_v8  ;;  %v2930_v29 = vshll.u32 %v6912_v55, %v2927_v41 }
 0x46b   : > { %v2933_v25 = vshll.u32 %v6909_v58, %v2927_v41  ;;  %v2937_v26 = vshrl.u32 %v6908_v15, %v2928_v4  ;;  %v2936_v61 = vshll.u32 %v6910_v59, %v2927_v41  ;;  %v2939_v21 = vshll.u32 %v6908_v15, %v2927_v41 }
 0x46c   : > { %v2870_v36 = vadd.s32 536870912, %v2869_v14  ;;  %v2940_v42 = vshrl.u32 %v7018_v52, %v2928_v4  ;;  %vm6309_vm3 = vcmp.le.f32.partialorder %v2497_v31, 0.7853982  ;;  %v2932_v53 = vor.u32 %v2931_v17, %v2930_v29 }
 0x46d   : > { %v2935_v7 = vor.u32 %v2934_v20, %v2933_v25  ;;  %v2942_v8 = vshll.u32 %v7018_v52, %v2927_v41  ;;  %v2943_v60 = vshrl.u32 %v7019_v13, %v2928_v4  ;;  %v2675_v54 = vshrl.u32 %v6234_v18, %v2673_v48 }
 0x46e   : > { %v6316_v2 = vshrl.u32 %v2870_v36, 30  ;;  %v2938_v44 = vor.u32 %v2937_v26, %v2936_v61  ;;  %v2941_v38 = vor.u32 %v2940_v42, %v2939_v21  ;;  %v2680_v3 = vor.u32 4788187, %v2679_v62 }
 0x46f   : > { %v2944_v63 = vor.u32 %v2943_v60, %v2942_v8  ;;  %v2961_v19 = vshll.u32 %v2921_v23, 8  ;;  %v3718_v0 = vadd.s32 4294967169, %v3021_v35  ;;  %v2783_v31 = vshll.u32 %v2782_v51, 23 }
 0x470   : > { %v2872_v47 = vshll.u32 %v6316_v2, 30  ;;  %vm2945_vm13 = vcmp.lt.s32.totalorder %v2926_v5, 1  ;;  %vm2948_vm0 = vcmp.lt.s32.totalorder %v2926_v5, 4  ;;  %vm2603_vm6 = vcmp.lt.s32.totalorder %v6013_v22, 0 }
 0x471   : > { %v2778_v41 = vshll.u32 %v6251_v49, %v6276_v46  ;;  %v2779_v17 = vshrl.u32 %v2761_v39, %v2777_v57  ;;  %v2953_v18 = vsel %vm2945_vm13, %v2932_v53, %v2935_v7  ;;  %v2954_v48 = vsel %vm2948_vm0, %v2941_v38, 920167782 }
 0x472   : > { %v6323_v20 = vsub.s32 %v2869_v14, %v2872_v47  ;;  %v2929_v62 = vshrl.u32 %v6912_v55, %v2928_v4  ;;  %vm2947_vm4 = vcmp.lt.s32.totalorder %v2926_v5, 3  ;;  %v2950_v23 = vsel %vm2948_vm0, %v2938_v44, 2102212464 }
 0x473   : > { %vm2946_vm8 = vcmp.lt.s32.totalorder %v2926_v5, 2  ;;  %v2955_v35 = vsel %vm2947_vm4, %v2938_v44, %v2954_v48  ;;  %v2957_v51 = vsel %vm2945_vm13, %v2935_v7, %v2938_v44  ;;  %v2958_v29 = vsel %vm2948_vm0, %v2944_v63, 1326507024 }
 0x474   : > { %v2784_v25 = vor.u32 4788187, %v2783_v31  ;;  %v2875_v26 = vsub.s32 0, %v6323_v20  ;;  %v2949_v49 = vsel %vm2945_vm13, %v2929_v62, %v2932_v53  ;;  %v2956_v46 = vsel %vm2946_vm8, %v2953_v18, %v2955_v35 }
 0x475   : > { %v2951_v39 = vsel %vm2947_vm4, %v2935_v7, %v2950_v23  ;;  %v2959_v57 = vsel %vm2947_vm4, %v2941_v38, %v2958_v29  ;;  %v6330_v47 = vmul.u32.u64.low %v2961_v19, %v2956_v46  ;;  %v6331_v14 = vmul.u32.u64.high %v2961_v19, %v2956_v46, %v6330_v47 }
 0x476   : > { %v2585_v4 = vsel %vm6309_vm3, %v6007_v43, %v6284_v33  ;;  %v3711_v63 = vmin.u32 %v2875_v26, %v6323_v20  ;;  %v2960_v44 = vsel %vm2946_vm8, %v2957_v51, %v2959_v57  ;;  %v3027_v36 = vadd.s32 1, %v3718_v0 }
 0x477   : > { %v7024_v61 = vshll.u32 %v6182_v45, %v6244_v32  ;;  %v2780_v42 = vor.u32 %v2779_v17, %v2778_v41  ;;  %v6343_v38 = vmul.u32.u64.low %v2961_v19, %v2960_v44  ;;  %v6344_v53 = vmul.u32.u64.high %v2961_v19, %v2960_v44, %v6343_v38 }
 0x478   : > { %v2681_v7 = vand.u32 2147483647, %v2680_v3  ;;  %v2877_v8 = vclz %v3711_v63  ;;  %v2952_v60 = vsel %vm2946_vm8, %v2949_v49, %v2951_v39  ;;  %vm3028_vm10 = vcmp.gt.s32.totalorder %v3027_v36, 0 }
 0x479   : > { %v2676_v21 = vor.u32 %v2675_v54, %v7024_v61  ;;  %v2785_v31 = vand.u32 2147483647, %v2784_v25  ;;  %v2971_v33 = vadd.s32 1, %v6331_v14  ;;  %v7025_v18 = vand.u32 2147483647, %v6227_v27 }
 0x47a   : > { %v3029_v0 = vsel %vm3028_vm10, %v3027_v36, 0  ;;  %3988 = vcosq.f32 %v2585_v4  ;;  %v7026_v45 = vsub.s32 4, %v6166_v28  ;;  %v3712_v3 = vadd.s32 4294967294, %v2877_v8 }
 0x47b   : > { %v3024_v48 = vand.u32 8388607, %v7025_v18  ;;  %v3031_v54 = vand.u32 31, %v3029_v0  ;;  %v2683_v5 = vcvt.s32.f32 %v2676_v21  ;;  %v2787_v41 = vcvt.s32.f32 %v2780_v42 }
 0x47c   : > { %v6355_v32 = vsel %vm2603_vm6, %v7026_v45, %v6166_v28  ;;  %v2968_v17 = vmul.u32 %v2961_v19, %v2952_v60  ;;  %vm2970_vm15 = vc.u32 %v6344_v53, %v6330_v47  ;;  %3990 = vsinq.f32 %v2585_v4 }
 0x47d   : > { %vm3713_vm1 = vcmp.lt.s32.totalorder %v3712_v3, 0  ;;  %v2972_v62 = vsel %vm2970_vm15, %v2971_v33, %v6331_v14  ;;  %v3032_v23 = vsub.s32 32, %v3031_v54  ;;  %v2684_v35 = vmul.f32 %v2683_v5, %v2681_v7 }
 0x47e   : > { %v6360_v51 = vmul.f32 %v2787_v41, %v2785_v31  ;;  %v2973_v29 = vadd.s32 %v2972_v62, %v2968_v17  ;;  %v3025_v25 = vor.u32 8388608, %v3024_v48  ;;  %v6362_v28 = vsel %vm3713_vm1, 0, %v3712_v3 }
 0x47f   : > { %v6364_v26 = vshrl.u32 %v3029_v0, 5  ;;  %v3040_v49 = vshll.u32 %v6910_v59, %v3031_v54  ;;  %v6369_v19 = vadd.f32 %v6028_v10, %v6217_v9  ;;  %v3035_v39 = vshrl.u32 %v6909_v58, %v3032_v23 }
 0x480   : > { %v2974_v46 = vadd.s32 536870912, %v2973_v29  ;;  %v3038_v57 = vshrl.u32 %v6910_v59, %v3032_v23  ;;  %v3041_v14 = vshrl.u32 %v6908_v15, %v3032_v23  ;;  %v3034_v4 = vshll.u32 %v6912_v55, %v3031_v54 }
 0x481   : > { %v3037_v63 = vshll.u32 %v6909_v58, %v3031_v54  ;;  %v3043_v44 = vshll.u32 %v6908_v15, %v3031_v54  ;;  %v3044_v36 = vshrl.u32 %v7018_v52, %v3032_v23  ;;  %v2685_v61 = vxor.u32 2147483648, %v2684_v35 }
 0x482   : > { %v2789_v21 = vxor.u32 2147483648, %v6360_v51  ;;  %v6379_v10 = vshrl.u32 %v2974_v46, 30  ;;  %v3042_v9 = vor.u32 %v3041_v14, %v3040_v49  ;;  %v2885_v42 = vsub.s32 4294967266, %v6362_v28 }
 0x483   : > { %v3036_v38 = vor.u32 %v3035_v39, %v3034_v4  ;;  %v3039_v7 = vor.u32 %v3038_v57, %v3037_v63  ;;  %v3045_v8 = vor.u32 %v3044_v36, %v3043_v44  ;;  %v7027_v60 = vand.u32 2147483647, %v6013_v22 }
 0x484   : > { %v2976_v33 = vshll.u32 %v6379_v10, 30  ;;  %v3046_v18 = vshll.u32 %v7018_v52, %v3031_v54  ;;  %v3047_v48 = vshrl.u32 %v7019_v13, %v3032_v23  ;;  %v3065_v0 = vshll.u32 %v3025_v25, 8  ;;  %v6391_v45 = vpop.eup %3988 }
 0x485   : > { %vm6384_vm2 = vcmp.le.f32.partialorder %v7027_v60, 0.7853982  ;;  %vm2707_vm7 = vcmp.lt.s32.totalorder %v6026_v24, 0  ;;  %v2881_v3 = vsub.s32 32, %v6362_v28  ;;  %v3033_v5 = vshrl.u32 %v6912_v55, %v3032_v23 }
 0x486   : > { %vm3052_vm12 = vcmp.lt.s32.totalorder %v6364_v26, 4  ;;  %v3124_v41 = vand.u32 2139095040, %v6369_v19  ;;  %v6398_v17 = vsub.s32 %v2973_v29, %v2976_v33  ;;  %v3048_v62 = vor.u32 %v3047_v48, %v3046_v18  ;;  %v6403_v25 = vpop.eup %3990 }
 0x487   : > { %vm3049_vm9 = vcmp.lt.s32.totalorder %v6364_v26, 1  ;;  %v3054_v54 = vsel %vm3052_vm12, %v3042_v9, 2102212464  ;;  %v2886_v49 = vadd.s32 127, %v2885_v42  ;;  %vm3051_vm14 = vcmp.lt.s32.totalorder %v6364_v26, 3 }
 0x488   : > { %v3057_v46 = vsel %vm3049_vm9, %v3036_v38, %v3039_v7  ;;  %v3058_v23 = vsel %vm3052_vm12, %v3045_v8, 920167782  ;;  %v7030_v39 = vand.u32 2147483647, %v6026_v24  ;;  %v2979_v57 = vsub.s32 0, %v6398_v17 }
 0x489   : > { %vm3050_vm0 = vcmp.lt.s32.totalorder %v6364_v26, 2  ;;  %v3059_v14 = vsel %vm3051_vm14, %v3042_v9, %v3058_v23  ;;  %v3061_v4 = vsel %vm3049_vm9, %v3039_v7, %v3042_v9  ;;  %v3053_v63 = vsel %vm3049_vm9, %v3033_v5, %v3036_v38 }
 0x48a   : > { %vm6410_vm13 = vcmp.le.f32.partialorder %v7030_v39, 0.7853982  ;;  %v3055_v44 = vsel %vm3051_vm14, %v3039_v7, %v3054_v54  ;;  %v3060_v36 = vsel %vm3050_vm0, %v3057_v46, %v3059_v14  ;;  %v3062_v42 = vsel %vm3052_vm12, %v3048_v62, 1326507024 }
 0x48b   : > { %v3715_v60 = vmin.u32 %v2979_v57, %v6398_v17  ;;  %v3063_v33 = vsel %vm3051_vm14, %v3045_v8, %v3062_v42  ;;  %v6421_v18 = vmul.u32.u64.low %v3065_v0, %v3060_v36  ;;  %v6422_v48 = vmul.u32.u64.high %v3065_v0, %v3060_v36, %v6421_v18 }
 0x48c   : > { %v7033_v39 = vsel %vm6221_vm11, 0, %v6211_v56  ;;  %v2686_v9 = vsel %vm2603_vm6, %v2685_v61, %v2684_v35  ;;  %v3064_v38 = vsel %vm3050_vm0, %v3061_v4, %v3063_v33  ;;  %v3125_v7 = vshrl.u32 %v3124_v41, 23 }
 0x48d   : > { %v6428_v23 = vadd.s32 3, %v7033_v39  ;;  %v2865_v5 = vadd.s32 %v6268_v16, %v6273_v30  ;;  %v2981_v8 = vclz %v3715_v60  ;;  %3992 = vcosq.f32 %v6241_v11 }
 0x48e   : > { %v6436_v62 = vmul.u32.u64.low %v3065_v0, %v3064_v38  ;;  %v6437_v54 = vmul.u32.u64.high %v3065_v0, %v3064_v38, %v6436_v62  ;;  %v2690_v56 = vsel %vm6384_vm2, 0, %v6355_v32  ;;  %v3056_v34 = vsel %vm3050_vm0, %v3053_v63, %v3055_v44 }
 0x48f   : > { %v3722_v35 = vadd.s32 4294967169, %v3125_v7  ;;  %v2790_v61 = vsel %vm2707_vm7, %v2789_v21, %v6360_v51  ;;  %v2883_v41 = vshrl.u32 %v2865_v5, %v2881_v3  ;;  %v2887_v16 = vshll.u32 %v2886_v49, 23 }
 0x490   : > { %v3075_v30 = vadd.s32 1, %v6422_v48  ;;  %v2689_v46 = vsel %vm6384_vm2, %v6013_v22, %v2686_v9  ;;  %v6888_v57 = vand.u32 2147483647, %v6369_v19  ;;  %v2583_v32 = vsub.s32 4, %v6125_v6 }
 0x491   : > { %v3131_v14 = vadd.s32 1, %v3722_v35  ;;  %v2882_v26 = vshll.u32 %v6323_v20, %v6362_v28  ;;  %v3716_v4 = vadd.s32 4294967294, %v2981_v8  ;;  %v3072_v63 = vmul.u32 %v3065_v0, %v3056_v34 }
 0x492   : > { %vm3074_vm11 = vc.u32 %v6437_v54, %v6421_v18  ;;  %3994 = vsinq.f32 %v6241_v11  ;;  %v2793_v51 = vsel %vm6410_vm13, %v6026_v24, %v2790_v61  ;;  %v6464_v3 = vor.u32 4788187, %v2887_v16 }
 0x493   : > { %v3076_v21 = vsel %vm3074_vm11, %v3075_v30, %v6422_v48  ;;  %vm3132_vm6 = vcmp.gt.s32.totalorder %v3131_v14, 0  ;;  %3996 = vcosq.f32 %v2689_v46  ;;  %v6462_v31 = vor.u32 %v2883_v41, %v2882_v26 }
 0x494   : > { %v3077_v49 = vadd.s32 %v3076_v21, %v3072_v63  ;;  %3998 = vsinq.f32 %v2689_v46  ;;  %v6466_v20 = vadd.s32 3, %v2690_v56  ;;  %v3128_v28 = vand.u32 8388607, %v6888_v57 }
 0x495   : > { %v3133_v11 = vsel %vm3132_vm6, %v3131_v14, 0  ;;  %4000 = vcosq.f32 %v2793_v51  ;;  %vm3717_vm4 = vcmp.lt.s32.totalorder %v3716_v4, 0  ;;  %v2584_v44 = vsel %vm2499_vm5, %v2583_v32, %v6125_v6 }
 0x496   : > { %v3078_v0 = vadd.s32 536870912, %v3077_v49  ;;  %4002 = vsinq.f32 %v2793_v51  ;;  %v6475_v36 = vadd.s32 %v6330_v47, %v6344_v53  ;;  %v3135_v42 = vand.u32 31, %v3133_v11 }
 0x497   : > { %v6483_v38 = vpop.eup %3992  ;;  %v6485_v7 = vsel %vm3717_vm4, 0, %v3716_v4  ;;  %v3129_v6 = vor.u32 8388608, %v3128_v28  ;;  %v2586_v47 = vsel %vm6309_vm3, 0, %v2584_v44  ;;  %v6490_v53 = vadd.s32 %v6421_v18, %v6437_v54 }
 0x498   : > { %v6480_v39 = vshrl.u32 %v3078_v0, 30  ;;  %v3136_v5 = vsub.s32 32, %v3135_v42  ;;  %v3138_v62 = vshll.u32 %v6912_v55, %v3135_v42  ;;  %v2791_v56 = vsub.s32 4, %v6236_v40 }
 0x499   : > { %v3141_v35 = vshll.u32 %v6909_v58, %v3135_v42  ;;  %v2989_v1 = vsub.s32 4294967266, %v6485_v7  ;;  %v3134_v18 = vshrl.u32 %v3133_v11, 5  ;;  %v3144_v54 = vshll.u32 %v6910_v59, %v3135_v42 }
 0x49a   : > { %v3080_v8 = vshll.u32 %v6480_v39, 30  ;;  %v3139_v34 = vshrl.u32 %v6909_v58, %v3136_v5  ;;  %v3142_v61 = vshrl.u32 %v6910_v59, %v3136_v5  ;;  %v3145_v41 = vshrl.u32 %v6908_v15, %v3136_v5 }
 0x49b   : > { %v2985_v46 = vsub.s32 32, %v6485_v7  ;;  %v6506_v26 = vshll.u32 %v3129_v6, 8  ;;  %v3147_v21 = vshll.u32 %v6908_v15, %v3135_v42  ;;  %v3150_v11 = vshll.u32 %v7018_v52, %v3135_v42 }
 0x49c   : > { %v6500_v16 = vsub.s32 %v3077_v49, %v3080_v8  ;;  %v6503_v30 = vpop.eup %3994  ;;  %v3140_v14 = vor.u32 %v3139_v34, %v3138_v62  ;;  %v3143_v32 = vor.u32 %v3142_v61, %v3141_v35  ;;  %v3146_v51 = vor.u32 %v3145_v41, %v3144_v54 }
 0x49d   : > { %v6508_v4 = vpop.eup %3996  ;;  %v3148_v49 = vshrl.u32 %v7018_v52, %v3136_v5  ;;  %v3151_v0 = vshrl.u32 %v7019_v13, %v3136_v5  ;;  %v2590_v44 = vadd.s32 3, %v2586_v47  ;;  %v2792_v6 = vsel %vm2707_vm7, %v2791_v56, %v6236_v40 }
 0x49e   : > { %v3083_v63 = vsub.s32 0, %v6500_v16  ;;  %v6513_v28 = vpop.eup %3998  ;;  %v2990_v62 = vadd.s32 127, %v2989_v1  ;;  %vm3153_vm5 = vcmp.lt.s32.totalorder %v3134_v18, 1  ;;  %v3137_v41 = vshrl.u32 %v6912_v55, %v3136_v5 }
 0x49f   : > { %v6520_v8 = vpop.eup %4000  ;;  %v3149_v35 = vor.u32 %v3148_v49, %v3147_v21  ;;  %v3152_v54 = vor.u32 %v3151_v0, %v3150_v11  ;;  %vm3156_vm3 = vcmp.lt.s32.totalorder %v3134_v18, 4  ;;  %v3161_v42 = vsel %vm3153_vm5, %v3140_v14, %v3143_v32 }
 0x4a0   : > { %v3719_v34 = vmin.u32 %v3083_v63, %v6500_v16  ;;  %v4003_v61 = vpop.eup %4002  ;;  %vm3155_vm8 = vcmp.lt.s32.totalorder %v3134_v18, 3  ;;  %v3158_v47 = vsel %vm3156_vm3, %v3146_v51, 2102212464  ;;  %vm3154_vm10 = vcmp.lt.s32.totalorder %v3134_v18, 2 }
 0x4a1   : > { %v3162_v48 = vsel %vm3156_vm3, %v3149_v35, 920167782  ;;  %v3165_v40 = vsel %vm3153_vm5, %v3143_v32, %v3146_v51  ;;  %v2591_v56 = vand.u32 3, %v2590_v44  ;;  %v3157_v1 = vsel %vm3153_vm5, %v3137_v41, %v3140_v14 }
 0x4a2   : > { %v3085_v57 = vclz %v3719_v34  ;;  %v3163_v33 = vsel %vm3155_vm8, %v3146_v51, %v3162_v48  ;;  %v3166_v21 = vsel %vm3156_vm3, %v3152_v54, 1326507024  ;;  %v3159_v49 = vsel %vm3155_vm8, %v3143_v32, %v3158_v47 }
 0x4a3   : > { %v3164_v63 = vsel %vm3154_vm10, %v3161_v42, %v3163_v33  ;;  %v3167_v60 = vsel %vm3155_vm8, %v3149_v35, %v3166_v21  ;;  %v2986_v0 = vshll.u32 %v6398_v17, %v6485_v7  ;;  %v2987_v14 = vshrl.u32 %v6475_v36, %v2985_v46 }
 0x4a4   : > { %v3720_v9 = vadd.s32 4294967294, %v3085_v57  ;;  %v6526_v5 = vmul.u32.u64.low %v6506_v26, %v3164_v63  ;;  %v6527_v11 = vmul.u32.u64.high %v6506_v26, %v3164_v63, %v6526_v5  ;;  %v3168_v48 = vsel %vm3154_vm10, %v3165_v40, %v3167_v60 }
 0x4a5   : > { %v2794_v57 = vsel %vm6410_vm13, 0, %v2792_v6  ;;  %v6537_v32 = vmul.u32.u64.low %v6506_v26, %v3168_v48  ;;  %v6538_v51 = vmul.u32.u64.high %v6506_v26, %v3168_v48, %v6537_v32  ;;  %vm2589_vm1 = vweird.f32 %v6007_v43 }
 0x4a6   : > { %vm3721_vm15 = vcmp.lt.s32.totalorder %v3720_v9, 0  ;;  %vm2797_vm2 = vweird.f32 %v6026_v24  ;;  %v2991_v44 = vshll.u32 %v2990_v62, 23  ;;  %v3160_v17 = vsel %vm3154_vm10, %v3157_v1, %v3159_v49 }
 0x4a7   : > { %v3088_v33 = vsel %vm3721_vm15, 0, %v3720_v9  ;;  %v2802_v7 = vxor.u32 2147483648, %v4003_v61  ;;  %v3179_v60 = vadd.s32 1, %v6527_v11  ;;  %vm2593_vm7 = vcmp.eq.s32.totalorder %v2591_v56, 0 }
 0x4a8   : > { %v3093_v34 = vsub.s32 4294967266, %v3088_v33  ;;  %vm2596_vm12 = vcmp.eq.s32.totalorder %v2591_v56, 2  ;;  %v2798_v29 = vadd.s32 3, %v2794_v57  ;;  %v7034_v9 = vxor.u32 2147483648, %v6403_v25 }
 0x4a9   : > { %v7035_v6 = vxor.u32 2147483648, %v6391_v45  ;;  %v2805_v62 = vxor.u32 2147483648, %v6520_v8  ;;  %v2988_v41 = vor.u32 %v2987_v14, %v2986_v0  ;;  %v3176_v18 = vmul.u32 %v6506_v26, %v3160_v17 }
 0x4aa   : > { %v3094_v36 = vadd.s32 127, %v3093_v34  ;;  %v2595_v46 = vsel %vm2593_vm7, %v6391_v45, %v7034_v9  ;;  %vm3178_vm9 = vc.u32 %v6538_v51, %v6526_v5  ;;  %v2799_v54 = vand.u32 3, %v2798_v29 }
 0x4ab   : > { %v2598_v35 = vsel %vm2596_vm12, %v7035_v6, %v6403_v25  ;;  %v2992_v42 = vor.u32 4788187, %v2991_v44  ;;  %v3089_v47 = vsub.s32 32, %v3088_v33  ;;  %v3180_v40 = vsel %vm3178_vm9, %v3179_v60, %v6527_v11 }
 0x4ac   : > { %vm2592_vm14 = vcmp.lt.s32.totalorder %v2591_v56, 2  ;;  %v3181_v1 = vadd.s32 %v3180_v40, %v3176_v18  ;;  %vm2801_vm13 = vcmp.eq.s32.totalorder %v2799_v54, 0  ;;  %vm2804_vm0 = vcmp.eq.s32.totalorder %v2799_v54, 2 }
 0x4ad   : > { %v2599_v63 = vsel %vm2592_vm14, %v2595_v46, %v2598_v35  ;;  %v3095_v45 = vshll.u32 %v3094_v36, 23  ;;  %vm2800_vm11 = vcmp.lt.s32.totalorder %v2799_v54, 2  ;;  %v2803_v25 = vsel %vm2801_vm13, %v6520_v8, %v2802_v7 }
 0x4ae   : > { %v2806_v21 = vsel %vm2804_vm0, %v2805_v62, %v4003_v61  ;;  %v3182_v49 = vadd.s32 536870912, %v3181_v1  ;;  %v2487_v0 = vand.u32 3, %v6428_v23  ;;  %v2490_v48 = vxor.u32 2147483648, %v6503_v30 }
 0x4af   : > { %v2807_v26 = vsel %vm2800_vm11, %v2803_v25, %v2806_v21  ;;  %v3091_v57 = vshrl.u32 %v6490_v53, %v3089_v47  ;;  %v2600_v56 = vsel %vm2589_vm1, nan, %v2599_v63  ;;  %v2493_v14 = vxor.u32 2147483648, %v6483_v38 }
 0x4b0   : > { %v2808_v11 = vsel %vm2797_vm2, nan, %v2807_v26  ;;  %v3090_v32 = vshll.u32 %v6500_v16, %v3088_v33  ;;  %v6565_v8 = vshrl.u32 %v3182_v49, 30  ;;  %vm2489_vm6 = vcmp.eq.s32.totalorder %v2487_v0, 0 }
 0x4b1   : > { %v3757_v61 = vpack.c.bf16 %v2808_v11, %v2600_v56  ;;  %v3096_v44 = vor.u32 4788187, %v3095_v45  ;;  %v2491_v23 = vsel %vm2489_vm6, %v6483_v38, %v2490_v48  ;;  %vm2492_vm4 = vcmp.eq.s32.totalorder %v2487_v0, 2 }
 0x4b2   : > { %v2695_v53 = vand.u32 3, %v6466_v20  ;;  %v3184_v43 = vshll.u32 %v6565_v8, 30  ;;  %v2494_v24 = vsel %vm2492_vm4, %v2493_v14, %v6503_v30  ;;  %v2698_v34 = vxor.u32 2147483648, %v6513_v28 }
 0x4b3   : > { %3758 = vmatprep.subr.bf16.mxu0 %v3757_v61  ;;  %v2701_v17 = vxor.u32 2147483648, %v6508_v4  ;;  %v2993_v16 = vand.u32 2147483647, %v2992_v42  ;;  %v3092_v33 = vor.u32 %v3091_v57, %v3090_v32  ;;  %vm2488_vm5 = vcmp.lt.s32.totalorder %v2487_v0, 2 }
 0x4b4   : > { %vm2697_vm3 = vcmp.eq.s32.totalorder %v2695_v53, 0  ;;  %v3185_v7 = vsub.s32 %v3181_v1, %v3184_v43  ;;  %v2495_v60 = vsel %vm2488_vm5, %v2491_v23, %v2494_v24  ;;  %vm2700_vm8 = vcmp.eq.s32.totalorder %v2695_v53, 2 }
 0x4b5   : > { %v2699_v38 = vsel %vm2697_vm3, %v6508_v4, %v2698_v34  ;;  %v2995_v29 = vcvt.s32.f32 %v2988_v41  ;;  %v3097_v20 = vand.u32 2147483647, %v3096_v44  ;;  %vm2696_vm10 = vcmp.lt.s32.totalorder %v2695_v53, 2 }
 0x4b6   : > { %v2702_v36 = vsel %vm2700_vm8, %v2701_v17, %v6513_v28  ;;  %v3187_v9 = vsub.s32 0, %v3185_v7  ;;  %vm2485_vm15 = vweird.f32 %v6005_v50  ;;  %vm2693_vm1 = vweird.f32 %v6013_v22 }
 0x4b7   : > { %v2703_v30 = vsel %vm2696_vm10, %v2699_v38, %v2702_v36  ;;  %v7036_v46 = vand.u32 2147483647, %v6464_v3  ;;  %v7037_v6 = vcvt.s32.f32 %v6462_v31  ;;  %v3099_v62 = vcvt.s32.f32 %v3092_v33 }
 0x4b8   : > { %v2496_v18 = vsel %vm2485_vm15, nan, %v2495_v60  ;;  %v2704_v4 = vsel %vm2693_vm1, nan, %v2703_v30  ;;  %v2996_v54 = vmul.f32 %v2995_v29, %v2993_v16  ;;  %v3723_v41 = vmin.u32 %v3187_v9, %v3185_v7 }
 0x4b9   : > { %v2892_v35 = vmul.f32 %v7037_v6, %v7036_v46  ;;  %v3759_v42 = vpack.c.bf16 %v2704_v4, %v2496_v18  ;;  %v3100_v47 = vmul.f32 %v3099_v62, %v3097_v20  ;;  %vm2811_vm2 = vcmp.lt.s32.totalorder %v6162_v37, 0 }
 0x4ba   : > { %v3189_v40 = vclz %v3723_v41  ;;  %v2997_v1 = vxor.u32 2147483648, %v2996_v54  ;;  %vm2915_vm12 = vcmp.lt.s32.totalorder %v6177_v12, 0  ;;  %vm3019_vm9 = vcmp.lt.s32.totalorder %v6227_v27, 0 }
 0x4bb   : > { %3760 = vmatpush1.bf16.msra.mxu0 %v3759_v42  ;;  %v2893_v28 = vxor.u32 2147483648, %v2892_v35  ;;  %v3101_v63 = vxor.u32 2147483648, %v3100_v47  ;;  %v3177_v45 = vadd.s32 %v6526_v5, %v6538_v51  ;;  %v7038_v49 = vand.u32 2147483647, %v6162_v37 }
 0x4bc   : > { %v3724_v50 = vadd.s32 4294967294, %v3189_v40  ;;  %v2998_v3 = vsel %vm2915_vm12, %v2997_v1, %v2996_v54  ;;  %v7041_v0 = vand.u32 2147483647, %v6177_v12  ;;  %v7044_v32 = vand.u32 2147483647, %v6227_v27 }
 0x4bd   : > { %v2894_v22 = vsel %vm2811_vm2, %v2893_v28, %v2892_v35  ;;  %vm6592_vm14 = vcmp.le.f32.partialorder %v7038_v49, 0.7853982  ;;  %v3102_v57 = vsel %vm3019_vm9, %v3101_v63, %v3100_v47  ;;  %v3103_v43 = vsub.s32 4, %v6480_v39 }
 0x4be   : > { %vm3725_vm7 = vcmp.lt.s32.totalorder %v3724_v50, 0  ;;  %vm6598_vm13 = vcmp.le.f32.partialorder %v7041_v0, 0.7853982  ;;  %v2897_v5 = vsel %vm6592_vm14, %v6162_v37, %v2894_v22  ;;  %vm6612_vm0 = vcmp.le.f32.partialorder %v7044_v32, 0.7853982 }
 0x4bf   : > { %v3192_v31 = vsel %vm3725_vm7, 0, %v3724_v50  ;;  %v3001_v14 = vsel %vm6598_vm13, %v6177_v12, %v2998_v3  ;;  %v3105_v44 = vsel %vm6612_vm0, %v6227_v27, %v3102_v57  ;;  %4004 = vcosq.f32 %v2897_v5 }
 0x4c0   : > { %v3193_v25 = vsub.s32 32, %v3192_v31  ;;  %v3197_v21 = vsub.s32 4294967266, %v3192_v31  ;;  %v3194_v51 = vshll.u32 %v3185_v7, %v3192_v31  ;;  %4006 = vcosq.f32 %v3001_v14 }
 0x4c1   : > { %4008 = vcosq.f32 %v3105_v44  ;;  %v2999_v34 = vsub.s32 4, %v6379_v10  ;;  %v2895_v17 = vsub.s32 4, %v6316_v2  ;;  %v3104_v7 = vsel %vm3019_vm9, %v3103_v43, %v6480_v39 }
 0x4c2   : > { %v3195_v56 = vshrl.u32 %v3177_v45, %v3193_v25  ;;  %v3198_v11 = vadd.s32 127, %v3197_v21  ;;  %4010 = vsinq.f32 %v3105_v44  ;;  %v3207_v38 = vsub.s32 4, %v6565_v8 }
 0x4c3   : > { %4012 = vsinq.f32 %v3001_v14  ;;  %v3000_v29 = vsel %vm2915_vm12, %v2999_v34, %v6379_v10  ;;  %v2896_v20 = vsel %vm2811_vm2, %v2895_v17, %v6316_v2  ;;  %v3106_v9 = vsel %vm6612_vm0, 0, %v3104_v7 }
 0x4c4   : > { %v3196_v23 = vor.u32 %v3195_v56, %v3194_v51  ;;  %v3199_v53 = vshll.u32 %v3198_v11, 23  ;;  %4014 = vsinq.f32 %v2897_v5  ;;  %vm3123_vm11 = vcmp.lt.s32.totalorder %v6369_v19, 0 }
 0x4c5   : > { %v7047_v30 = vand.u32 2147483647, %v6369_v19  ;;  %v3002_v10 = vsel %vm6598_vm13, 0, %v3000_v29  ;;  %v3208_v6 = vsel %vm3123_vm11, %v3207_v38, %v6565_v8  ;;  %v2898_v2 = vsel %vm6592_vm14, 0, %v2896_v20  ;;  %v3225_v29 = vld [vmem:[%s6797_s7] sm:$0x1] }
 0x4c6   : > { %v3200_v24 = vor.u32 4788187, %v3199_v53  ;;  %v3203_v33 = vcvt.s32.f32 %v3196_v23  ;;  %v3110_v4 = vadd.s32 3, %v3106_v9  ;;  %v3006_v41 = vadd.s32 3, %v3002_v10 }
 0x4c7   : > { %vm6637_vm6 = vcmp.le.f32.partialorder %v7047_v30, 0.7853982  ;;  %v2902_v40 = vadd.s32 3, %v2898_v2  ;;  %vm3109_vm13 = vweird.f32 %v6227_v27  ;;  %vm3005_vm0 = vweird.f32 %v6177_v12  ;;  %v3230_v12 = vpop.permute.xlu0 %3229  ;;  %v7051_v27 = vld [vmem:[#allocation7_spill] sm:$0xff] }
 0x4c8   : > { %v3201_v16 = vand.u32 2147483647, %v3200_v24  ;;  %v3210_v42 = vsel %vm6637_vm6, 0, %v3208_v6  ;;  %v3111_v50 = vand.u32 3, %v3110_v4  ;;  %v3007_v63 = vand.u32 3, %v3006_v41 }
 0x4c9   : > { %v4005_v35 = vpop.eup %4004  ;;  %v3214_v1 = vadd.s32 3, %v3210_v42  ;;  %v2903_v25 = vand.u32 3, %v2902_v40 }
 0x4ca   : > { %v3204_v60 = vmul.f32 %v3203_v33, %v3201_v16  ;;  %v4007_v18 = vpop.eup %4006  ;;  %v2909_v49 = vxor.u32 2147483648, %v4005_v35  ;;  %vm3113_vm4 = vcmp.eq.s32.totalorder %v3111_v50, 0  ;;  %vm3116_vm5 = vcmp.eq.s32.totalorder %v3111_v50, 2 }
 0x4cb   : > { %v4009_v54 = vpop.eup %4008  ;;  %v3013_v45 = vxor.u32 2147483648, %v4007_v18  ;;  %v3215_v26 = vand.u32 3, %v3214_v1  ;;  %vm3009_vm3 = vcmp.eq.s32.totalorder %v3007_v63, 0  ;;  %vm3012_vm8 = vcmp.eq.s32.totalorder %v3007_v63, 2 }
 0x4cc   : > { %v3205_v36 = vxor.u32 2147483648, %v3204_v60  ;;  %v4011_v47 = vpop.eup %4010  ;;  %v3117_v31 = vxor.u32 2147483648, %v4009_v54  ;;  %vm2905_vm10 = vcmp.eq.s32.totalorder %v2903_v25, 0  ;;  %vm2908_vm15 = vcmp.eq.s32.totalorder %v2903_v25, 2 }
 0x4cd   : > { %v4013_v8 = vpop.eup %4012  ;;  %v3114_v22 = vxor.u32 2147483648, %v4011_v47  ;;  %vm3112_vm1 = vcmp.lt.s32.totalorder %v3111_v50, 2  ;;  %vm3008_vm2 = vcmp.lt.s32.totalorder %v3007_v63, 2  ;;  %vm3220_vm7 = vcmp.eq.s32.totalorder %v3215_v26, 2 }
 0x4ce   : > { %v3206_v46 = vsel %vm3123_vm11, %v3205_v36, %v3204_v60  ;;  %v4015_v28 = vpop.eup %4014  ;;  %v3010_v3 = vxor.u32 2147483648, %v4013_v8  ;;  %v3118_v48 = vsel %vm3116_vm5, %v3117_v31, %v4011_v47  ;;  %v3014_v51 = vsel %vm3012_vm8, %v3013_v45, %v4013_v8 }
 0x4cf   : > { %v3209_v62 = vsel %vm6637_vm6, %v6369_v19, %v3206_v46  ;;  %v2906_v21 = vxor.u32 2147483648, %v4015_v28  ;;  %v3115_v0 = vsel %vm3113_vm4, %v4009_v54, %v3114_v22  ;;  %v2910_v32 = vsel %vm2908_vm15, %v2909_v49, %v4015_v28 }
 0x4d0   : > { %4016 = vcosq.f32 %v3209_v62  ;;  %v3011_v5 = vsel %vm3009_vm3, %v4007_v18, %v3010_v3  ;;  %v3119_v44 = vsel %vm3112_vm1, %v3115_v0, %v3118_v48  ;;  %vm3217_vm12 = vcmp.eq.s32.totalorder %v3215_v26, 0 }
 0x4d1   : > { %4018 = vsinq.f32 %v3209_v62  ;;  %v2907_v14 = vsel %vm2905_vm10, %v4005_v35, %v2906_v21  ;;  %v3015_v23 = vsel %vm3008_vm2, %v3011_v5, %v3014_v51  ;;  %vm2904_vm9 = vcmp.lt.s32.totalorder %v2903_v25, 2 }
 0x4d2   : > { %vm3216_vm14 = vcmp.lt.s32.totalorder %v3215_v26, 2  ;;  %v2911_v24 = vsel %vm2904_vm9, %v2907_v14, %v2910_v32  ;;  %vm3213_vm11 = vweird.f32 %v6369_v19  ;;  %v3120_v17 = vsel %vm3109_vm13, nan, %v3119_v44 }
 0x4d3   : > { %v3016_v16 = vsel %vm3005_vm0, nan, %v3015_v23  ;;  %vm2901_vm6 = vweird.f32 %v6162_v37  ;;  %vm7050_vm4 = vcmask 261120   ;;  %v3235_v19 = vrot.slane %v3230_v12, %v7051_v27 }
 0x4d4   : > { %v2912_v60 = vsel %vm2901_vm6, nan, %v2911_v24 }
 0x4d5   : > { %v3763_v38 = vpack.c.bf16 %v3120_v17, %v2912_v60 }
 0x4da   : > { %v4017_v57 = vpop.eup %4016 }
 0x4db   : > { %v4019_v56 = vpop.eup %4018  ;;  %v3221_v11 = vxor.u32 2147483648, %v4017_v57 }
 0x4dc   : > { %v3218_v61 = vxor.u32 2147483648, %v4019_v56 }
 0x4dd   : > { %v3222_v53 = vsel %vm3220_vm7, %v3221_v11, %v4019_v56 }
 0x4de   : > { %v3219_v43 = vsel %vm3217_vm12, %v4017_v57, %v3218_v61 }
 0x4df   : > { %v3223_v34 = vsel %vm3216_vm14, %v3219_v43, %v3222_v53 }
 0x4e0   : > { %v3224_v33 = vsel %vm3213_vm11, nan, %v3223_v34 }
 0x4e1   : > { %v3761_v7 = vpack.c.bf16 %v3224_v33, %v3016_v16 }
 0x4e3   : > { %3762 = vmatprep.subr.bf16.mxu0 %v3761_v7 }
 0x4e4   : > { %3764 = vmatpush1.bf16.msra.mxu0 %v3763_v38 }
 0x4e7   : > { %3726 = vmatmul.mubr.msk.f32.vlgmr.msra.gmra.mrb[8].mxu0 %vm7050_vm4, %v3225_v29 }
 0x5ba   : > { %v3305_v20 = vpop.f32.mrb[8].mxu0 }
 0x5bb   : > { %v6660_v36 = vadd.f32 %v3305_v20, %v3235_v19  ;;  %v3307_v9 = vpop.f32.mrb[9].mxu0 }
 0x5bc   : > { %v6662_v30 = vadd.f32 %v3307_v9, %v3235_v19 }
 0x5bd   : > { %v3310_v37 = vand.u32 2147483647, %v6660_v36  ;;  %v3313_v39 = vand.u32 2139095040, %v6660_v36  ;;  %vm3312_vm6 = vcmp.lt.s32.totalorder %v6660_v36, 0 }
 0x5be   : > { %v3417_v46 = vand.u32 2139095040, %v6662_v30  ;;  %v3414_v35 = vand.u32 2147483647, %v6662_v30 }
 0x5bf   : > { %v3314_v10 = vshrl.u32 %v3313_v39, 23  ;;  %v3317_v6 = vand.u32 8388607, %v3310_v37  ;;  %vm3311_vm4 = vcmp.le.f32.partialorder %v3310_v37, 0.7853982 }
 0x5c0   : > { %v3418_v2 = vshrl.u32 %v3417_v46, 23  ;;  %v3421_v41 = vand.u32 8388607, %v3414_v35 }
 0x5c1   : > { %v3727_v62 = vadd.s32 4294967169, %v3314_v10  ;;  %v3318_v54 = vor.u32 8388608, %v3317_v6 }
 0x5c2   : > { %v3731_v18 = vadd.s32 4294967169, %v3418_v2  ;;  %v3422_v50 = vor.u32 8388608, %v3421_v41 }
 0x5c3   : > { %v3320_v4 = vadd.s32 1, %v3727_v62  ;;  %v6672_v1 = vshll.u32 %v3318_v54, 8 }
 0x5c4   : > { %v3424_v42 = vadd.s32 1, %v3731_v18  ;;  %v3462_v41 = vshll.u32 %v3422_v50, 8 }
 0x5c5   : > { %vm3321_vm5 = vcmp.gt.s32.totalorder %v3320_v4, 0 }
 0x5c6   : > { %v3322_v47 = vsel %vm3321_vm5, %v3320_v4, 0  ;;  %vm3425_vm3 = vcmp.gt.s32.totalorder %v3424_v42, 0  ;;  %vm3416_vm5 = vcmp.lt.s32.totalorder %v6662_v30, 0 }
 0x5c7   : > { %v3323_v40 = vshrl.u32 %v3322_v47, 5  ;;  %v3324_v8 = vand.u32 31, %v3322_v47  ;;  %v3426_v28 = vsel %vm3425_vm3, %v3424_v42, 0  ;;  %vm3415_vm3 = vcmp.le.f32.partialorder %v3414_v35, 0.7853982 }
 0x5c8   : > { %v6675_v31 = vshrl.u32 %v3426_v28, 5  ;;  %v3428_v3 = vand.u32 31, %v3426_v28 }
 0x5c9   : > { %v3325_v63 = vsub.s32 32, %v3324_v8  ;;  %v3327_v22 = vshll.u32 %v6912_v55, %v3324_v8  ;;  %v3330_v45 = vshll.u32 %v6909_v58, %v3324_v8  ;;  %v3333_v25 = vshll.u32 %v6910_v59, %v3324_v8 }
 0x5ca   : > { %v3336_v21 = vshll.u32 %v6908_v15, %v3324_v8  ;;  %v3339_v49 = vshll.u32 %v7018_v52, %v3324_v8  ;;  %vm3342_vm8 = vcmp.lt.s32.totalorder %v3323_v40, 1  ;;  %vm3343_vm10 = vcmp.lt.s32.totalorder %v3323_v40, 2 }
 0x5cb   : > { %v3328_v26 = vshrl.u32 %v6909_v58, %v3325_v63  ;;  %v3331_v0 = vshrl.u32 %v6910_v59, %v3325_v63  ;;  %v3334_v48 = vshrl.u32 %v6908_v15, %v3325_v63  ;;  %v3326_v57 = vshrl.u32 %v6912_v55, %v3325_v63 }
 0x5cc   : > { %v3337_v5 = vshrl.u32 %v7018_v52, %v3325_v63  ;;  %v3340_v51 = vshrl.u32 %v7019_v13, %v3325_v63  ;;  %v3429_v32 = vsub.s32 32, %v3428_v3  ;;  %vm3344_vm15 = vcmp.lt.s32.totalorder %v3323_v40, 3 }
 0x5cd   : > { %v3329_v56 = vor.u32 %v3328_v26, %v3327_v22  ;;  %v3332_v11 = vor.u32 %v3331_v0, %v3330_v45  ;;  %v3335_v14 = vor.u32 %v3334_v48, %v3333_v25  ;;  %vm3345_vm1 = vcmp.lt.s32.totalorder %v3323_v40, 4 }
 0x5ce   : > { %v3338_v61 = vor.u32 %v3337_v5, %v3336_v21  ;;  %v3341_v44 = vor.u32 %v3340_v51, %v3339_v49  ;;  %v3431_v33 = vshll.u32 %v6912_v55, %v3428_v3  ;;  %v3432_v38 = vshrl.u32 %v6909_v58, %v3429_v32 }
 0x5cf   : > { %v3346_v23 = vsel %vm3342_vm8, %v3326_v57, %v3329_v56  ;;  %v3347_v53 = vsel %vm3345_vm1, %v3335_v14, 2102212464  ;;  %v3350_v43 = vsel %vm3342_vm8, %v3329_v56, %v3332_v11  ;;  %v3354_v24 = vsel %vm3342_vm8, %v3332_v11, %v3335_v14 }
 0x5d0   : > { %v3348_v34 = vsel %vm3344_vm15, %v3332_v11, %v3347_v53  ;;  %v3351_v17 = vsel %vm3345_vm1, %v3338_v61, 920167782  ;;  %v3355_v16 = vsel %vm3345_vm1, %v3341_v44, 1326507024  ;;  %v3434_v29 = vshll.u32 %v6909_v58, %v3428_v3 }
 0x5d1   : > { %v3352_v7 = vsel %vm3344_vm15, %v3335_v14, %v3351_v17  ;;  %v3356_v60 = vsel %vm3344_vm15, %v3338_v61, %v3355_v16  ;;  %v3349_v12 = vsel %vm3343_vm10, %v3346_v23, %v3348_v34  ;;  %v3435_v20 = vshrl.u32 %v6910_v59, %v3429_v32 }
 0x5d2   : > { %v3353_v27 = vsel %vm3343_vm10, %v3350_v43, %v3352_v7  ;;  %v3357_v19 = vsel %vm3343_vm10, %v3354_v24, %v3356_v60  ;;  %v3433_v6 = vor.u32 %v3432_v38, %v3431_v33  ;;  %v3437_v58 = vshll.u32 %v6910_v59, %v3428_v3 }
 0x5d3   : > { %v6698_v9 = vmul.u32.u64.low %v6672_v1, %v3357_v19  ;;  %v6699_v39 = vmul.u32.u64.high %v6672_v1, %v3357_v19, %v6698_v9  ;;  %v6702_v46 = vmul.u32.u64.low %v6672_v1, %v3353_v27  ;;  %v6703_v10 = vmul.u32.u64.high %v6672_v1, %v3353_v27, %v6702_v46 }
 0x5d4   : > { %v3436_v2 = vor.u32 %v3435_v20, %v3434_v29  ;;  %v3438_v62 = vshrl.u32 %v6908_v15, %v3429_v32  ;;  %v3440_v18 = vshll.u32 %v6908_v15, %v3428_v3  ;;  %v3441_v4 = vshrl.u32 %v7018_v52, %v3429_v32 }
 0x5d5   : > { %v3444_v54 = vshrl.u32 %v7019_v13, %v3429_v32  ;;  %v3365_v42 = vmul.u32 %v6672_v1, %v3349_v12  ;;  %v3430_v47 = vshrl.u32 %v6912_v55, %v3429_v32  ;;  %v3443_v8 = vshll.u32 %v7018_v52, %v3428_v3 }
 0x5d6   : > { %v3439_v40 = vor.u32 %v3438_v62, %v3437_v58  ;;  %vm3367_vm2 = vc.u32 %v6699_v39, %v6702_v46  ;;  %v3368_v59 = vadd.s32 1, %v6703_v10  ;;  %v3442_v28 = vor.u32 %v3441_v4, %v3440_v18 }
 0x5d7   : > { %vm3446_vm7 = vcmp.lt.s32.totalorder %v6675_v31, 1  ;;  %v3445_v15 = vor.u32 %v3444_v54, %v3443_v8  ;;  %vm3448_vm12 = vcmp.lt.s32.totalorder %v6675_v31, 3  ;;  %vm3449_vm9 = vcmp.lt.s32.totalorder %v6675_v31, 4 }
 0x5d8   : > { %v3454_v13 = vsel %vm3446_vm7, %v3433_v6, %v3436_v2  ;;  %v3369_v1 = vsel %vm3367_vm2, %v3368_v59, %v6703_v10  ;;  %v3451_v50 = vsel %vm3449_vm9, %v3439_v40, 2102212464  ;;  %v3455_v55 = vsel %vm3449_vm9, %v3442_v28, 920167782 }
 0x5d9   : > { %v3458_v63 = vsel %vm3446_vm7, %v3436_v2, %v3439_v40  ;;  %v3370_v22 = vadd.s32 %v3369_v1, %v3365_v42  ;;  %vm3447_vm14 = vcmp.lt.s32.totalorder %v6675_v31, 2  ;;  %v3456_v52 = vsel %vm3448_vm12, %v3439_v40, %v3455_v55 }
 0x5da   : > { %v3459_v3 = vsel %vm3449_vm9, %v3445_v15, 1326507024  ;;  %v3450_v45 = vsel %vm3446_vm7, %v3430_v47, %v3433_v6  ;;  %v3452_v25 = vsel %vm3448_vm12, %v3436_v2, %v3451_v50  ;;  %v3457_v21 = vsel %vm3447_vm14, %v3454_v13, %v3456_v52 }
 0x5db   : > { %v3460_v49 = vsel %vm3448_vm12, %v3442_v28, %v3459_v3  ;;  %v3371_v26 = vadd.s32 536870912, %v3370_v22  ;;  %v6720_v48 = vmul.u32.u64.low %v3462_v41, %v3457_v21  ;;  %v6721_v57 = vmul.u32.u64.high %v3462_v41, %v3457_v21, %v6720_v48 }
 0x5dc   : > { %v3461_v0 = vsel %vm3447_vm14, %v3458_v63, %v3460_v49  ;;  %v3453_v11 = vsel %vm3447_vm14, %v3450_v45, %v3452_v25  ;;  %v3366_v29 = vadd.s32 %v6702_v46, %v6699_v39  ;;  %vm3402_vm1 = vweird.f32 %v6660_v36 }
 0x5dd   : > { %v6723_v5 = vmul.u32.u64.low %v3462_v41, %v3461_v0  ;;  %v6724_v51 = vmul.u32.u64.high %v3462_v41, %v3461_v0, %v6723_v5  ;;  %v3372_v56 = vshrl.u32 %v3371_v26, 30  ;;  %v3472_v32 = vadd.s32 1, %v6721_v57 }
 0x5de   : > { %v3469_v31 = vmul.u32 %v3462_v41, %v3453_v11  ;;  %vm3506_vm9 = vweird.f32 %v6662_v30 }
 0x5df   : > { %v3373_v14 = vshll.u32 %v3372_v56, 30  ;;  %vm3471_vm13 = vc.u32 %v6724_v51, %v6720_v48  ;;  %v3470_v42 = vadd.s32 %v6720_v48, %v6724_v51  ;;  %v3396_v46 = vsub.s32 4, %v3372_v56 }
 0x5e0   : > { %v3473_v44 = vsel %vm3471_vm13, %v3472_v32, %v6721_v57 }
 0x5e1   : > { %v3374_v61 = vsub.s32 %v3370_v22, %v3373_v14  ;;  %v3474_v23 = vadd.s32 %v3473_v44, %v3469_v31  ;;  %v3397_v55 = vsel %vm3312_vm6, %v3396_v46, %v3372_v56 }
 0x5e2   : > { %v3399_v52 = vsel %vm3311_vm4, 0, %v3397_v55 }
 0x5e3   : > { %v3376_v53 = vsub.s32 0, %v3374_v61  ;;  %v3475_v43 = vadd.s32 536870912, %v3474_v23  ;;  %v3403_v49 = vadd.s32 3, %v3399_v52 }
 0x5e5   : > { %v3728_v24 = vmin.u32 %v3376_v53, %v3374_v61  ;;  %v3476_v34 = vshrl.u32 %v3475_v43, 30  ;;  %v3404_v48 = vand.u32 3, %v3403_v49 }
 0x5e7   : > { %v3378_v17 = vclz %v3728_v24  ;;  %v3477_v16 = vshll.u32 %v3476_v34, 30  ;;  %v3500_v21 = vsub.s32 4, %v3476_v34  ;;  %vm3409_vm8 = vcmp.eq.s32.totalorder %v3404_v48, 2 }
 0x5e8   : > { %vm3406_vm10 = vcmp.eq.s32.totalorder %v3404_v48, 0  ;;  %vm3405_vm15 = vcmp.lt.s32.totalorder %v3404_v48, 2 }
 0x5e9   : > { %v3729_v33 = vadd.s32 4294967294, %v3378_v17  ;;  %v3478_v7 = vsub.s32 %v3474_v23, %v3477_v16  ;;  %v3501_v0 = vsel %vm3416_vm5, %v3500_v21, %v3476_v34  ;;  %v4101_v23 = vmov 1966171168  }
 0x5ea   : > { %v3503_v51 = vsel %vm3415_vm3, 0, %v3501_v0  ;;  %v3522_v53 = vunpack.c.l.s4 %v4101_v23 }
 0x5eb   : > { %vm3730_vm0 = vcmp.lt.s32.totalorder %v3729_v33, 0  ;;  %v3480_v38 = vsub.s32 0, %v3478_v7  ;;  %v3507_v32 = vadd.s32 3, %v3503_v51 }
 0x5ec   : > { %v3381_v60 = vsel %vm3730_vm0, 0, %v3729_v33  ;;  %v3523_v16 = vunpack.c.0.s8 %v3522_v53 }
 0x5ed   : > { %v3382_v12 = vsub.s32 32, %v3381_v60  ;;  %v3386_v27 = vsub.s32 4294967266, %v3381_v60  ;;  %v3732_v19 = vmin.u32 %v3480_v38, %v3478_v7  ;;  %v3383_v20 = vshll.u32 %v3374_v61, %v3381_v60  ;;  %v7052_v38 = vld [vmem:[#allocation6_spill] sm:$0xff] }
 0x5ee   : > { %v3508_v43 = vand.u32 3, %v3507_v32 }
 0x5ef   : > { %v3384_v9 = vshrl.u32 %v3366_v29, %v3382_v12  ;;  %v3387_v10 = vadd.s32 127, %v3386_v27  ;;  %v3482_v6 = vclz %v3732_v19  ;;  %v3526_v29 = vsub.s32 %v3523_v16, %v7052_v38 }
 0x5f0   : > { %vm3513_vm2 = vcmp.eq.s32.totalorder %v3508_v43, 2  ;;  %vm3510_vm7 = vcmp.eq.s32.totalorder %v3508_v43, 0  ;;  %vm3509_vm12 = vcmp.lt.s32.totalorder %v3508_v43, 2 }
 0x5f1   : > { %v3385_v2 = vor.u32 %v3384_v9, %v3383_v20  ;;  %v3388_v58 = vshll.u32 %v3387_v10, 23  ;;  %v3733_v62 = vadd.s32 4294967294, %v3482_v6  ;;  %v7053_v20 = vlaneseq }
 0x5f3   : > { %v3389_v18 = vor.u32 4788187, %v3388_v58  ;;  %vm3734_vm11 = vcmp.lt.s32.totalorder %v3733_v62, 0  ;;  %v3392_v54 = vcvt.s32.f32 %v3385_v2  ;;  %vm3538_vm14 = vcmp.lt.s32.totalorder %v7053_v20, 256 }
 0x5f4   : > { %v3485_v41 = vsel %vm3734_vm11, 0, %v3733_v62 }
 0x5f5   : > { %v3390_v4 = vand.u32 2147483647, %v3389_v18  ;;  %v3486_v47 = vsub.s32 32, %v3485_v41  ;;  %v3490_v40 = vsub.s32 4294967266, %v3485_v41  ;;  %v3487_v8 = vshll.u32 %v3478_v7, %v3485_v41 }
 0x5f7   : > { %v3393_v39 = vmul.f32 %v3392_v54, %v3390_v4  ;;  %v3488_v59 = vshrl.u32 %v3470_v42, %v3486_v47  ;;  %v3491_v28 = vadd.s32 127, %v3490_v40 }
 0x5f9   : > { %v3394_v15 = vxor.u32 2147483648, %v3393_v39  ;;  %v3489_v13 = vor.u32 %v3488_v59, %v3487_v8  ;;  %v3492_v1 = vshll.u32 %v3491_v28, 23 }
 0x5fb   : > { %v3395_v50 = vsel %vm3312_vm6, %v3394_v15, %v3393_v39  ;;  %v3493_v22 = vor.u32 4788187, %v3492_v1  ;;  %v3496_v45 = vcvt.s32.f32 %v3489_v13 }
 0x5fc   : > { %v3398_v63 = vsel %vm3311_vm4, %v6660_v36, %v3395_v50 }
 0x5fd   : > { %4020 = vcosq.f32 %v3398_v63  ;;  %v3494_v3 = vand.u32 2147483647, %v3493_v22 }
 0x5fe   : > { %4022 = vsinq.f32 %v3398_v63 }
 0x5ff   : > { %v3497_v25 = vmul.f32 %v3496_v45, %v3494_v3 }
 0x601   : > { %v3498_v26 = vxor.u32 2147483648, %v3497_v25 }
 0x603   : > { %v3499_v37 = vsel %vm3416_vm5, %v3498_v26, %v3497_v25 }
 0x604   : > { %v3502_v57 = vsel %vm3415_vm3, %v6662_v30, %v3499_v37 }
 0x605   : > { %4024 = vcosq.f32 %v3502_v57 }
 0x606   : > { %4026 = vsinq.f32 %v3502_v57 }
 0x607   : > { %v4021_v5 = vpop.eup %4020 }
 0x608   : > { %v4023_v56 = vpop.eup %4022  ;;  %v3410_v11 = vxor.u32 2147483648, %v4021_v5 }
 0x609   : > { %v3407_v14 = vxor.u32 2147483648, %v4023_v56 }
 0x60a   : > { %v3411_v31 = vsel %vm3409_vm8, %v3410_v11, %v4023_v56 }
 0x60b   : > { %v3408_v61 = vsel %vm3406_vm10, %v4021_v5, %v3407_v14 }
 0x60c   : > { %v3412_v35 = vsel %vm3405_vm15, %v3408_v61, %v3411_v31 }
 0x60d   : > { %v3413_v44 = vsel %vm3402_vm1, nan, %v3412_v35 }
 0x60f   : > { %v4025_v24 = vpop.eup %4024 }
 0x610   : > { %v4027_v34 = vpop.eup %4026  ;;  %v3514_v17 = vxor.u32 2147483648, %v4025_v24 }
 0x611   : > { %v3511_v33 = vxor.u32 2147483648, %v4027_v34 }
 0x612   : > { %v3515_v7 = vsel %vm3513_vm2, %v3514_v17, %v4027_v34 }
 0x613   : > { %v3512_v60 = vsel %vm3510_vm7, %v4025_v24, %v3511_v33 }
 0x614   : > { %v3516_v36 = vsel %vm3509_vm12, %v3512_v60, %v3515_v7 }
 0x615   : > { %v3517_v12 = vsel %vm3506_vm9, nan, %v3516_v36 }
 0x616   : > { %v3520_v27 = vcombine.low %v3413_v44, %v3517_v12 }
 0x618   : > { %v3527_v19 = vrot.slane %v3520_v27, %v3526_v29 }
 0x61a   : > { %v3534_v9 = vrot.slane %v3527_v19, %v3526_v29 }
 0x61c   : > { %3540 = vst.msk [vmem:[%s328_s28] sm:$0x3] %vm3538_vm14, %v3534_v9 }
 0x61d   : > { %4041 = shalt.err (!%p4038_p3)
}
 0x61e   : > { %s4042_s24 = scalar_lea.hbm %s6748_s15, 32  ;;  %s4046_s27 = scalar_lea.hbm %s6799_s9, 64 }
 0x61f   : > { %p4043_p4 = scmp.ne.s32.totalorder %s6748_s15, %s4042_s24  ;;  %p4047_p9 = scmp.lt.u32.totalorder %s6748_s15, %s6799_s9 }
 0x620   : > { %p4048_p10 = scmp.lt.u32.totalorder %s4046_s27, %s4042_s24  ;;  %p4050_p12 = scmp.lt.u32.totalorder %s4042_s24, %s6748_s15 }
 0x621   : > { %p4044_p7 = pnand %p4043_p4, %p4194_p5 }
 0x622   : > { %p4049_p11 = por %p4048_p10, %p4047_p9 }
 0x623   : > { %p4045_p8 = pneg %p4044_p7 }
 0x624   : > { %p4051_p13 = por %p4050_p12, %p4049_p11 }
 0x626   : > { %p4052_p0 = pnand %p4051_p13, %p4045_p8 }
 0x628   : > { %4055 = shalt.err (!%p4052_p0)
}
 0x629   : > { %3869 = dma.vmem_to_hbm [thread:$0]  (%p4194_p5), %s6750_s29, 32, %s6748_s15, %s3542_s17  }
 0x62a PF: > { %p3875_p1 = scmp.ge.s32.totalorder %s4090_s14, 2  ;;  %s3568_s10 = sand.u32 1, %s4078_s11  }
 0x62b   : > { %s3569_s18 = scalar_lea.sflag [#allocation4], %s3568_s10 }
 0x62c   : > { %p3872_p2 = pnand %p3875_p1, %p4198_p6 }
 0x62e   : > { %4073 = dma.done.wait (!%p3872_p2), %s3569_s18, 32  }
 0x62f   : > { %4075 = vsyncadd (!%p3872_p2), %s3569_s18, 4294967264  ;;  %p21_p3 = scmp.ge.s32.totalorder %s4181_s16, 4   ;;  %s7054_s11 = smov %s4082_s12 }
 0x630   : > { %s7055_s12 = smov %s4086_s13  ;;  %s7056_s13 = smov %s4192_s19 }
 0x631   : > { %s7057_s14 = smov %s4181_s16  ;;  %23 = sbr.rel (!%p21_p3) target bundleno = 6 (0x6), region = 91 }
 0x638   :  { %3574 = vsyncpa [#allocation4], 1 }
 0x639   :  { %3576 = vsyncpa [#allocation4 + $0x1], 1 }

</bundles_post_ra>
